<compile_context>
chip_gen: v7x
topology: tpu7x:2x2x1
jax: 0.10.0
libtpu: 0.0.40
codegen_flags: <defaults>
</compile_context>

<pallas_src>
import functools

import jax
import jax.numpy as jnp
from jax.experimental import pallas as pl
from jax.experimental.pallas import tpu as pltpu

N_EMBED = 256      # module n_embed
BLOCK_SIZE = 256   # module block_size (max T)
DROPOUT_P = 0.5    # module dropout


def mha_kernel(x_ref, wqkv_ref, wproj_ref, bproj_ref, adrop_ref, odrop_ref,
               o_ref, *, num_heads, head_size):
    bb, T, C = x_ref.shape
    HD = num_heads * head_size

    # Causal mask built once per grid step, shared by every batch row / head.
    row = jax.lax.broadcasted_iota(jnp.int32, (T, T), 0)
    col = jax.lax.broadcasted_iota(jnp.int32, (T, T), 1)
    causal = col <= row

    wqkv = wqkv_ref[...]      # (C, 3*HD) bf16  (1/sqrt(C) folded into the Q part)
    wproj = wproj_ref[...]    # (HD, C)  bf16
    bproj = bproj_ref[...]    # (1, C)   f32

    for b in range(bb):                       # static unroll over the batch block
        x = x_ref[b]                          # (T, C) bf16
        # One lane-dense projection producing Q|K|V for all heads at once.
        qkv = jnp.dot(x, wqkv, preferred_element_type=jnp.float32)   # (T, 3*HD) f32

        head_outs = []
        for h in range(num_heads):            # static unroll over heads
            q = qkv[:, h * head_size:(h + 1) * head_size].astype(jnp.bfloat16)
            k = qkv[:, HD + h * head_size:HD + (h + 1) * head_size].astype(jnp.bfloat16)
            v = qkv[:, 2 * HD + h * head_size:2 * HD + (h + 1) * head_size].astype(jnp.bfloat16)

            # scores = (q * C**-0.5) @ k^T ; scale pre-folded into W_q, and the
            # last dims are contracted directly so k is never transposed.
            s = jax.lax.dot_general(q, k, (((1,), (1,)), ((), ())),
                                    preferred_element_type=jnp.float32)   # (T, T)
            s = jnp.where(causal, s, -jnp.inf)

            # softmax (f32) + attention dropout (keep mask pre-scaled: 0 or 1/(1-p))
            m = jnp.max(s, axis=-1, keepdims=True)
            e = jnp.exp(s - m)
            p = (e / jnp.sum(e, axis=-1, keepdims=True)) * adrop_ref[b, h]

            head_outs.append(jnp.dot(p.astype(jnp.bfloat16), v,
                                     preferred_element_type=jnp.float32))  # (T, H)

        cat = jnp.concatenate(head_outs, axis=-1)          # (T, HD) f32
        # output projection + bias + output dropout (keep mask pre-scaled)
        y = jnp.dot(cat.astype(jnp.bfloat16), wproj,
                    preferred_element_type=jnp.float32) + bproj
        o_ref[b] = (y * odrop_ref[b]).astype(o_ref.dtype)


def multi_head_attention_forward(x, wq_heads, wk_heads, wv_heads, w_proj,
                                 b_proj, dropout_key, *, dropout_p=DROPOUT_P,
                                 training=True):
    """x: (B, T, C) f32.
    wq/wk/wv_heads: (num_heads, head_size, C) -- per-head torch Linear weights.
    w_proj: (C, num_heads*head_size), b_proj: (C,) -- torch proj.weight / .bias.
    Returns (B, T, C) f32.
    """
    B, T, C = x.shape
    num_heads, head_size, _ = wq_heads.shape
    HD = num_heads * head_size
    scale = C ** (-0.5)   # module scales by embed dim C (not head_size) -- reproduced.

    # Pack weights: per-head x @ W_h^T  ==  x @ concat_h(W_h^T).
    def pack(w):  # (NH, H, C) -> (C, NH*H)
        return jnp.transpose(w, (2, 0, 1)).reshape(C, HD)

    wqkv = jnp.concatenate(
        [pack(wq_heads) * scale, pack(wk_heads), pack(wv_heads)],
        axis=1).astype(jnp.bfloat16)                                  # (C, 3*HD)
    wproj_t = jnp.transpose(w_proj).astype(jnp.bfloat16)              # (HD, C)
    bproj2d = b_proj.reshape(1, C).astype(jnp.float32)

    # Dropout keep-masks, pre-scaled by 1/(1-p) (training-mode semantics).
    if training and dropout_p > 0.0:
        ka, ko = jax.random.split(dropout_key)
        keep = 1.0 - dropout_p
        adrop = jax.random.bernoulli(
            ka, keep, (B, num_heads, T, T)).astype(jnp.float32) / keep
        odrop = jax.random.bernoulli(
            ko, keep, (B, T, C)).astype(jnp.float32) / keep
    else:
        adrop = jnp.ones((B, num_heads, T, T), jnp.float32)
        odrop = jnp.ones((B, T, C), jnp.float32)

    x_bf = x.astype(jnp.bfloat16)

    # Batch elements per grid step (amortize per-step overhead, keep VMEM modest).
    bb = next(d for d in (4, 2, 1) if B % d == 0)

    kernel = functools.partial(mha_kernel, num_heads=num_heads,
                               head_size=head_size)

    return pl.pallas_call(
        kernel,
        out_shape=jax.ShapeDtypeStruct((B, T, C), x.dtype),
        grid=(B // bb,),
        in_specs=[
            pl.BlockSpec((bb, T, C), lambda i: (i, 0, 0)),                 # x
            pl.BlockSpec((C, 3 * HD), lambda i: (0, 0)),                   # Wq|Wk|Wv
            pl.BlockSpec((HD, C), lambda i: (0, 0)),                       # W_proj^T
            pl.BlockSpec((1, C), lambda i: (0, 0)),                        # proj bias
            pl.BlockSpec((bb, num_heads, T, T), lambda i: (i, 0, 0, 0)),   # attn keep
            pl.BlockSpec((bb, T, C), lambda i: (i, 0, 0)),                 # out keep
        ],
        out_specs=pl.BlockSpec((bb, T, C), lambda i: (i, 0, 0)),
        compiler_params=pltpu.CompilerParams(
            dimension_semantics=("parallel",),   # batch steps are independent
        ),
    )(x_bf, wqkv, wproj_t, bproj2d, adrop, odrop)


if __name__ == "__main__":
    # SMALL shapes consistent with the module: C must equal n_embed (=256).
    B, T = 2, 8
    C = N_EMBED
    num_heads, head_size = 8, 32
    assert T <= BLOCK_SIZE and num_heads * head_size == N_EMBED

    key = jax.random.PRNGKey(0)
    kx, kq, kk, kv, kp, kb, kd = jax.random.split(key, 7)

    x = jax.random.normal(kx, (B, T, C), dtype=jnp.float32)

    # nn.Linear(bias=False) default init: U(-1/sqrt(fan_in), 1/sqrt(fan_in)).
    head_bound = 1.0 / (C ** 0.5)
    wq_heads = jax.random.uniform(kq, (num_heads, head_size, C), jnp.float32,
                                  -head_bound, head_bound)
    wk_heads = jax.random.uniform(kk, (num_heads, head_size, C), jnp.float32,
                                  -head_bound, head_bound)
    wv_heads = jax.random.uniform(kv, (num_heads, head_size, C), jnp.float32,
                                  -head_bound, head_bound)

    proj_bound = 1.0 / ((num_heads * head_size) ** 0.5)
    w_proj = jax.random.uniform(kp, (C, num_heads * head_size), jnp.float32,
                                -proj_bound, proj_bound)
    b_proj = jax.random.uniform(kb, (C,), jnp.float32, -proj_bound, proj_bound)

    out = multi_head_attention_forward(x, wq_heads, wk_heads, wv_heads,
                                       w_proj, b_proj, kd)
    jax.block_until_ready(out)
    assert out.shape == (B, T, C) and out.dtype == jnp.float32
    print("KERNEL_OK")
</pallas_src>

<mosaic_0001>
module attributes {stable_mosaic.version = 11 : i64} {
  func.func @mha_kernel(%arg0: i32, %arg1: memref<2x8x256xbf16, #tpu.memory_space<vmem>>, %arg2: memref<256x768xbf16, #tpu.memory_space<vmem>>, %arg3: memref<256x256xbf16, #tpu.memory_space<vmem>>, %arg4: memref<1x256xf32, #tpu.memory_space<vmem>>, %arg5: memref<2x8x8x8xf32, #tpu.memory_space<vmem>>, %arg6: memref<2x8x256xf32, #tpu.memory_space<vmem>>, %arg7: memref<2x8x256xf32, #tpu.memory_space<vmem>>) attributes {dimension_semantics = [#tpu.dimension_semantics<parallel>], iteration_bounds = array<i64: 1>, scalar_prefetch = 0 : i64, scratch_operands = 0 : i64, tpu.core_type = #tpu.core_type<tc>, window_params = [{transform_indices = @transform_0, window_bounds = array<i64: 2, 8, 256>}, {pipeline_mode = #tpu.pipeline_mode<synchronous>, transform_indices = @transform_1, window_bounds = array<i64: 256, 768>}, {pipeline_mode = #tpu.pipeline_mode<synchronous>, transform_indices = @transform_2, window_bounds = array<i64: 256, 256>}, {pipeline_mode = #tpu.pipeline_mode<synchronous>, transform_indices = @transform_3, window_bounds = array<i64: 1, 256>}, {transform_indices = @transform_4, window_bounds = array<i64: 2, 8, 8, 8>}, {transform_indices = @transform_5, window_bounds = array<i64: 2, 8, 256>}, {transform_indices = @transform_6, window_bounds = array<i64: 2, 8, 256>}]} {
    %0 = tpu.iota {dimensions = array<i32: 0>} : vector<8x8xi32>
    %1 = tpu.iota {dimensions = array<i32: 1>} : vector<8x8xi32>
    %2 = arith.cmpi sle, %1, %0 : vector<8x8xi32>
    %c0 = arith.constant 0 : index
    %c0_0 = arith.constant 0 : index
    %3 = vector.load %arg2[%c0, %c0_0] : memref<256x768xbf16, #tpu.memory_space<vmem>>, vector<256x768xbf16>
    %c0_1 = arith.constant 0 : index
    %c0_2 = arith.constant 0 : index
    %4 = vector.load %arg3[%c0_1, %c0_2] : memref<256x256xbf16, #tpu.memory_space<vmem>>, vector<256x256xbf16>
    %c0_3 = arith.constant 0 : index
    %c0_4 = arith.constant 0 : index
    %5 = vector.load %arg4[%c0_3, %c0_4] : memref<1x256xf32, #tpu.memory_space<vmem>>, vector<1x256xf32>
    %c0_5 = arith.constant 0 : index
    %c0_6 = arith.constant 0 : index
    %c0_7 = arith.constant 0 : index
    %6 = vector.load %arg1[%c0_5, %c0_6, %c0_7] : memref<2x8x256xbf16, #tpu.memory_space<vmem>>, vector<1x8x256xbf16>
    %7 = vector.shape_cast %6 : vector<1x8x256xbf16> to vector<8x256xbf16>
    %cst = arith.constant dense<0.000000e+00> : vector<8x768xf32>
    %8 = tpu.matmul %7, %3, %cst {dimension_numbers = #tpu.dot_dimension_numbers<[1], [0], [0], [1], [0, 0, 1, 1], [], []>} : vector<8x256xbf16>, vector<256x768xbf16>, vector<8x768xf32> -> vector<8x768xf32>
    %9 = vector.extract_strided_slice %8 {offsets = [0, 0], sizes = [8, 32], strides = [1, 1]} : vector<8x768xf32> to vector<8x32xf32>
    %10 = arith.truncf %9 : vector<8x32xf32> to vector<8x32xbf16>
    %11 = vector.extract_strided_slice %8 {offsets = [0, 256], sizes = [8, 32], strides = [1, 1]} : vector<8x768xf32> to vector<8x32xf32>
    %12 = arith.truncf %11 : vector<8x32xf32> to vector<8x32xbf16>
    %13 = vector.extract_strided_slice %8 {offsets = [0, 512], sizes = [8, 32], strides = [1, 1]} : vector<8x768xf32> to vector<8x32xf32>
    %14 = arith.truncf %13 : vector<8x32xf32> to vector<8x32xbf16>
    %cst_8 = arith.constant dense<0.000000e+00> : vector<8x8xf32>
    %15 = tpu.matmul %10, %12, %cst_8 {dimension_numbers = #tpu.dot_dimension_numbers<[1], [1], [0], [0], [0, 0, 1, 0], [], []>} : vector<8x32xbf16>, vector<8x32xbf16>, vector<8x8xf32> -> vector<8x8xf32>
    %cst_9 = arith.constant 0xFF800000 : f32
    %16 = vector.broadcast %cst_9 : f32 to vector<8x8xf32>
    %17 = arith.select %2, %15, %16 : vector<8x8xi1>, vector<8x8xf32>
    %cst_10 = arith.constant dense<0xFF800000> : vector<8xf32>
    %18 = vector.multi_reduction <maximumf>, %17, %cst_10 [1] : vector<8x8xf32> to vector<8xf32>
    %19 = vector.shape_cast %18 : vector<8xf32> to vector<8x1xf32>
    %20 = vector.broadcast %19 : vector<8x1xf32> to vector<8x8xf32>
    %21 = arith.subf %17, %20 : vector<8x8xf32>
    %22 = math.exp %21 : vector<8x8xf32>
    %cst_11 = arith.constant dense<0.000000e+00> : vector<8xf32>
    %23 = vector.multi_reduction <add>, %22, %cst_11 [1] : vector<8x8xf32> to vector<8xf32>
    %24 = vector.shape_cast %23 : vector<8xf32> to vector<8x1xf32>
    %25 = vector.broadcast %24 : vector<8x1xf32> to vector<8x8xf32>
    %26 = arith.divf %22, %25 : vector<8x8xf32>
    %c0_12 = arith.constant 0 : index
    %c0_13 = arith.constant 0 : index
    %c0_14 = arith.constant 0 : index
    %c0_15 = arith.constant 0 : index
    %27 = vector.load %arg5[%c0_12, %c0_13, %c0_14, %c0_15] : memref<2x8x8x8xf32, #tpu.memory_space<vmem>>, vector<1x1x8x8xf32>
    %28 = vector.shape_cast %27 : vector<1x1x8x8xf32> to vector<8x8xf32>
    %29 = arith.mulf %26, %28 : vector<8x8xf32>
    %30 = arith.truncf %29 : vector<8x8xf32> to vector<8x8xbf16>
    %cst_16 = arith.constant dense<0.000000e+00> : vector<8x32xf32>
    %31 = tpu.matmul %30, %14, %cst_16 {dimension_numbers = #tpu.dot_dimension_numbers<[1], [0], [0], [1], [0, 0, 1, 1], [], []>} : vector<8x8xbf16>, vector<8x32xbf16>, vector<8x32xf32> -> vector<8x32xf32>
    %32 = vector.extract_strided_slice %8 {offsets = [0, 32], sizes = [8, 32], strides = [1, 1]} : vector<8x768xf32> to vector<8x32xf32>
    %33 = arith.truncf %32 : vector<8x32xf32> to vector<8x32xbf16>
    %34 = vector.extract_strided_slice %8 {offsets = [0, 288], sizes = [8, 32], strides = [1, 1]} : vector<8x768xf32> to vector<8x32xf32>
    %35 = arith.truncf %34 : vector<8x32xf32> to vector<8x32xbf16>
    %36 = vector.extract_strided_slice %8 {offsets = [0, 544], sizes = [8, 32], strides = [1, 1]} : vector<8x768xf32> to vector<8x32xf32>
    %37 = arith.truncf %36 : vector<8x32xf32> to vector<8x32xbf16>
    %cst_17 = arith.constant dense<0.000000e+00> : vector<8x8xf32>
    %38 = tpu.matmul %33, %35, %cst_17 {dimension_numbers = #tpu.dot_dimension_numbers<[1], [1], [0], [0], [0, 0, 1, 0], [], []>} : vector<8x32xbf16>, vector<8x32xbf16>, vector<8x8xf32> -> vector<8x8xf32>
    %cst_18 = arith.constant 0xFF800000 : f32
    %39 = vector.broadcast %cst_18 : f32 to vector<8x8xf32>
    %40 = arith.select %2, %38, %39 : vector<8x8xi1>, vector<8x8xf32>
    %cst_19 = arith.constant dense<0xFF800000> : vector<8xf32>
    %41 = vector.multi_reduction <maximumf>, %40, %cst_19 [1] : vector<8x8xf32> to vector<8xf32>
    %42 = vector.shape_cast %41 : vector<8xf32> to vector<8x1xf32>
    %43 = vector.broadcast %42 : vector<8x1xf32> to vector<8x8xf32>
    %44 = arith.subf %40, %43 : vector<8x8xf32>
    %45 = math.exp %44 : vector<8x8xf32>
    %cst_20 = arith.constant dense<0.000000e+00> : vector<8xf32>
    %46 = vector.multi_reduction <add>, %45, %cst_20 [1] : vector<8x8xf32> to vector<8xf32>
    %47 = vector.shape_cast %46 : vector<8xf32> to vector<8x1xf32>
    %48 = vector.broadcast %47 : vector<8x1xf32> to vector<8x8xf32>
    %49 = arith.divf %45, %48 : vector<8x8xf32>
    %c0_21 = arith.constant 0 : index
    %c1 = arith.constant 1 : index
    %c0_22 = arith.constant 0 : index
    %c0_23 = arith.constant 0 : index
    %50 = vector.load %arg5[%c0_21, %c1, %c0_22, %c0_23] : memref<2x8x8x8xf32, #tpu.memory_space<vmem>>, vector<1x1x8x8xf32>
    %51 = vector.shape_cast %50 : vector<1x1x8x8xf32> to vector<8x8xf32>
    %52 = arith.mulf %49, %51 : vector<8x8xf32>
    %53 = arith.truncf %52 : vector<8x8xf32> to vector<8x8xbf16>
    %cst_24 = arith.constant dense<0.000000e+00> : vector<8x32xf32>
    %54 = tpu.matmul %53, %37, %cst_24 {dimension_numbers = #tpu.dot_dimension_numbers<[1], [0], [0], [1], [0, 0, 1, 1], [], []>} : vector<8x8xbf16>, vector<8x32xbf16>, vector<8x32xf32> -> vector<8x32xf32>
    %55 = vector.extract_strided_slice %8 {offsets = [0, 64], sizes = [8, 32], strides = [1, 1]} : vector<8x768xf32> to vector<8x32xf32>
    %56 = arith.truncf %55 : vector<8x32xf32> to vector<8x32xbf16>
    %57 = vector.extract_strided_slice %8 {offsets = [0, 320], sizes = [8, 32], strides = [1, 1]} : vector<8x768xf32> to vector<8x32xf32>
    %58 = arith.truncf %57 : vector<8x32xf32> to vector<8x32xbf16>
    %59 = vector.extract_strided_slice %8 {offsets = [0, 576], sizes = [8, 32], strides = [1, 1]} : vector<8x768xf32> to vector<8x32xf32>
    %60 = arith.truncf %59 : vector<8x32xf32> to vector<8x32xbf16>
    %cst_25 = arith.constant dense<0.000000e+00> : vector<8x8xf32>
    %61 = tpu.matmul %56, %58, %cst_25 {dimension_numbers = #tpu.dot_dimension_numbers<[1], [1], [0], [0], [0, 0, 1, 0], [], []>} : vector<8x32xbf16>, vector<8x32xbf16>, vector<8x8xf32> -> vector<8x8xf32>
    %cst_26 = arith.constant 0xFF800000 : f32
    %62 = vector.broadcast %cst_26 : f32 to vector<8x8xf32>
    %63 = arith.select %2, %61, %62 : vector<8x8xi1>, vector<8x8xf32>
    %cst_27 = arith.constant dense<0xFF800000> : vector<8xf32>
    %64 = vector.multi_reduction <maximumf>, %63, %cst_27 [1] : vector<8x8xf32> to vector<8xf32>
    %65 = vector.shape_cast %64 : vector<8xf32> to vector<8x1xf32>
    %66 = vector.broadcast %65 : vector<8x1xf32> to vector<8x8xf32>
    %67 = arith.subf %63, %66 : vector<8x8xf32>
    %68 = math.exp %67 : vector<8x8xf32>
    %cst_28 = arith.constant dense<0.000000e+00> : vector<8xf32>
    %69 = vector.multi_reduction <add>, %68, %cst_28 [1] : vector<8x8xf32> to vector<8xf32>
    %70 = vector.shape_cast %69 : vector<8xf32> to vector<8x1xf32>
    %71 = vector.broadcast %70 : vector<8x1xf32> to vector<8x8xf32>
    %72 = arith.divf %68, %71 : vector<8x8xf32>
    %c0_29 = arith.constant 0 : index
    %c2 = arith.constant 2 : index
    %c0_30 = arith.constant 0 : index
    %c0_31 = arith.constant 0 : index
    %73 = vector.load %arg5[%c0_29, %c2, %c0_30, %c0_31] : memref<2x8x8x8xf32, #tpu.memory_space<vmem>>, vector<1x1x8x8xf32>
    %74 = vector.shape_cast %73 : vector<1x1x8x8xf32> to vector<8x8xf32>
    %75 = arith.mulf %72, %74 : vector<8x8xf32>
    %76 = arith.truncf %75 : vector<8x8xf32> to vector<8x8xbf16>
    %cst_32 = arith.constant dense<0.000000e+00> : vector<8x32xf32>
    %77 = tpu.matmul %76, %60, %cst_32 {dimension_numbers = #tpu.dot_dimension_numbers<[1], [0], [0], [1], [0, 0, 1, 1], [], []>} : vector<8x8xbf16>, vector<8x32xbf16>, vector<8x32xf32> -> vector<8x32xf32>
    %78 = vector.extract_strided_slice %8 {offsets = [0, 96], sizes = [8, 32], strides = [1, 1]} : vector<8x768xf32> to vector<8x32xf32>
    %79 = arith.truncf %78 : vector<8x32xf32> to vector<8x32xbf16>
    %80 = vector.extract_strided_slice %8 {offsets = [0, 352], sizes = [8, 32], strides = [1, 1]} : vector<8x768xf32> to vector<8x32xf32>
    %81 = arith.truncf %80 : vector<8x32xf32> to vector<8x32xbf16>
    %82 = vector.extract_strided_slice %8 {offsets = [0, 608], sizes = [8, 32], strides = [1, 1]} : vector<8x768xf32> to vector<8x32xf32>
    %83 = arith.truncf %82 : vector<8x32xf32> to vector<8x32xbf16>
    %cst_33 = arith.constant dense<0.000000e+00> : vector<8x8xf32>
    %84 = tpu.matmul %79, %81, %cst_33 {dimension_numbers = #tpu.dot_dimension_numbers<[1], [1], [0], [0], [0, 0, 1, 0], [], []>} : vector<8x32xbf16>, vector<8x32xbf16>, vector<8x8xf32> -> vector<8x8xf32>
    %cst_34 = arith.constant 0xFF800000 : f32
    %85 = vector.broadcast %cst_34 : f32 to vector<8x8xf32>
    %86 = arith.select %2, %84, %85 : vector<8x8xi1>, vector<8x8xf32>
    %cst_35 = arith.constant dense<0xFF800000> : vector<8xf32>
    %87 = vector.multi_reduction <maximumf>, %86, %cst_35 [1] : vector<8x8xf32> to vector<8xf32>
    %88 = vector.shape_cast %87 : vector<8xf32> to vector<8x1xf32>
    %89 = vector.broadcast %88 : vector<8x1xf32> to vector<8x8xf32>
    %90 = arith.subf %86, %89 : vector<8x8xf32>
    %91 = math.exp %90 : vector<8x8xf32>
    %cst_36 = arith.constant dense<0.000000e+00> : vector<8xf32>
    %92 = vector.multi_reduction <add>, %91, %cst_36 [1] : vector<8x8xf32> to vector<8xf32>
    %93 = vector.shape_cast %92 : vector<8xf32> to vector<8x1xf32>
    %94 = vector.broadcast %93 : vector<8x1xf32> to vector<8x8xf32>
    %95 = arith.divf %91, %94 : vector<8x8xf32>
    %c0_37 = arith.constant 0 : index
    %c3 = arith.constant 3 : index
    %c0_38 = arith.constant 0 : index
    %c0_39 = arith.constant 0 : index
    %96 = vector.load %arg5[%c0_37, %c3, %c0_38, %c0_39] : memref<2x8x8x8xf32, #tpu.memory_space<vmem>>, vector<1x1x8x8xf32>
    %97 = vector.shape_cast %96 : vector<1x1x8x8xf32> to vector<8x8xf32>
    %98 = arith.mulf %95, %97 : vector<8x8xf32>
    %99 = arith.truncf %98 : vector<8x8xf32> to vector<8x8xbf16>
    %cst_40 = arith.constant dense<0.000000e+00> : vector<8x32xf32>
    %100 = tpu.matmul %99, %83, %cst_40 {dimension_numbers = #tpu.dot_dimension_numbers<[1], [0], [0], [1], [0, 0, 1, 1], [], []>} : vector<8x8xbf16>, vector<8x32xbf16>, vector<8x32xf32> -> vector<8x32xf32>
    %101 = vector.extract_strided_slice %8 {offsets = [0, 128], sizes = [8, 32], strides = [1, 1]} : vector<8x768xf32> to vector<8x32xf32>
    %102 = arith.truncf %101 : vector<8x32xf32> to vector<8x32xbf16>
    %103 = vector.extract_strided_slice %8 {offsets = [0, 384], sizes = [8, 32], strides = [1, 1]} : vector<8x768xf32> to vector<8x32xf32>
    %104 = arith.truncf %103 : vector<8x32xf32> to vector<8x32xbf16>
    %105 = vector.extract_strided_slice %8 {offsets = [0, 640], sizes = [8, 32], strides = [1, 1]} : vector<8x768xf32> to vector<8x32xf32>
    %106 = arith.truncf %105 : vector<8x32xf32> to vector<8x32xbf16>
    %cst_41 = arith.constant dense<0.000000e+00> : vector<8x8xf32>
    %107 = tpu.matmul %102, %104, %cst_41 {dimension_numbers = #tpu.dot_dimension_numbers<[1], [1], [0], [0], [0, 0, 1, 0], [], []>} : vector<8x32xbf16>, vector<8x32xbf16>, vector<8x8xf32> -> vector<8x8xf32>
    %cst_42 = arith.constant 0xFF800000 : f32
    %108 = vector.broadcast %cst_42 : f32 to vector<8x8xf32>
    %109 = arith.select %2, %107, %108 : vector<8x8xi1>, vector<8x8xf32>
    %cst_43 = arith.constant dense<0xFF800000> : vector<8xf32>
    %110 = vector.multi_reduction <maximumf>, %109, %cst_43 [1] : vector<8x8xf32> to vector<8xf32>
    %111 = vector.shape_cast %110 : vector<8xf32> to vector<8x1xf32>
    %112 = vector.broadcast %111 : vector<8x1xf32> to vector<8x8xf32>
    %113 = arith.subf %109, %112 : vector<8x8xf32>
    %114 = math.exp %113 : vector<8x8xf32>
    %cst_44 = arith.constant dense<0.000000e+00> : vector<8xf32>
    %115 = vector.multi_reduction <add>, %114, %cst_44 [1] : vector<8x8xf32> to vector<8xf32>
    %116 = vector.shape_cast %115 : vector<8xf32> to vector<8x1xf32>
    %117 = vector.broadcast %116 : vector<8x1xf32> to vector<8x8xf32>
    %118 = arith.divf %114, %117 : vector<8x8xf32>
    %c0_45 = arith.constant 0 : index
    %c4 = arith.constant 4 : index
    %c0_46 = arith.constant 0 : index
    %c0_47 = arith.constant 0 : index
    %119 = vector.load %arg5[%c0_45, %c4, %c0_46, %c0_47] : memref<2x8x8x8xf32, #tpu.memory_space<vmem>>, vector<1x1x8x8xf32>
    %120 = vector.shape_cast %119 : vector<1x1x8x8xf32> to vector<8x8xf32>
    %121 = arith.mulf %118, %120 : vector<8x8xf32>
    %122 = arith.truncf %121 : vector<8x8xf32> to vector<8x8xbf16>
    %cst_48 = arith.constant dense<0.000000e+00> : vector<8x32xf32>
    %123 = tpu.matmul %122, %106, %cst_48 {dimension_numbers = #tpu.dot_dimension_numbers<[1], [0], [0], [1], [0, 0, 1, 1], [], []>} : vector<8x8xbf16>, vector<8x32xbf16>, vector<8x32xf32> -> vector<8x32xf32>
    %124 = vector.extract_strided_slice %8 {offsets = [0, 160], sizes = [8, 32], strides = [1, 1]} : vector<8x768xf32> to vector<8x32xf32>
    %125 = arith.truncf %124 : vector<8x32xf32> to vector<8x32xbf16>
    %126 = vector.extract_strided_slice %8 {offsets = [0, 416], sizes = [8, 32], strides = [1, 1]} : vector<8x768xf32> to vector<8x32xf32>
    %127 = arith.truncf %126 : vector<8x32xf32> to vector<8x32xbf16>
    %128 = vector.extract_strided_slice %8 {offsets = [0, 672], sizes = [8, 32], strides = [1, 1]} : vector<8x768xf32> to vector<8x32xf32>
    %129 = arith.truncf %128 : vector<8x32xf32> to vector<8x32xbf16>
    %cst_49 = arith.constant dense<0.000000e+00> : vector<8x8xf32>
    %130 = tpu.matmul %125, %127, %cst_49 {dimension_numbers = #tpu.dot_dimension_numbers<[1], [1], [0], [0], [0, 0, 1, 0], [], []>} : vector<8x32xbf16>, vector<8x32xbf16>, vector<8x8xf32> -> vector<8x8xf32>
    %cst_50 = arith.constant 0xFF800000 : f32
    %131 = vector.broadcast %cst_50 : f32 to vector<8x8xf32>
    %132 = arith.select %2, %130, %131 : vector<8x8xi1>, vector<8x8xf32>
    %cst_51 = arith.constant dense<0xFF800000> : vector<8xf32>
    %133 = vector.multi_reduction <maximumf>, %132, %cst_51 [1] : vector<8x8xf32> to vector<8xf32>
    %134 = vector.shape_cast %133 : vector<8xf32> to vector<8x1xf32>
    %135 = vector.broadcast %134 : vector<8x1xf32> to vector<8x8xf32>
    %136 = arith.subf %132, %135 : vector<8x8xf32>
    %137 = math.exp %136 : vector<8x8xf32>
    %cst_52 = arith.constant dense<0.000000e+00> : vector<8xf32>
    %138 = vector.multi_reduction <add>, %137, %cst_52 [1] : vector<8x8xf32> to vector<8xf32>
    %139 = vector.shape_cast %138 : vector<8xf32> to vector<8x1xf32>
    %140 = vector.broadcast %139 : vector<8x1xf32> to vector<8x8xf32>
    %141 = arith.divf %137, %140 : vector<8x8xf32>
    %c0_53 = arith.constant 0 : index
    %c5 = arith.constant 5 : index
    %c0_54 = arith.constant 0 : index
    %c0_55 = arith.constant 0 : index
    %142 = vector.load %arg5[%c0_53, %c5, %c0_54, %c0_55] : memref<2x8x8x8xf32, #tpu.memory_space<vmem>>, vector<1x1x8x8xf32>
    %143 = vector.shape_cast %142 : vector<1x1x8x8xf32> to vector<8x8xf32>
    %144 = arith.mulf %141, %143 : vector<8x8xf32>
    %145 = arith.truncf %144 : vector<8x8xf32> to vector<8x8xbf16>
    %cst_56 = arith.constant dense<0.000000e+00> : vector<8x32xf32>
    %146 = tpu.matmul %145, %129, %cst_56 {dimension_numbers = #tpu.dot_dimension_numbers<[1], [0], [0], [1], [0, 0, 1, 1], [], []>} : vector<8x8xbf16>, vector<8x32xbf16>, vector<8x32xf32> -> vector<8x32xf32>
    %147 = vector.extract_strided_slice %8 {offsets = [0, 192], sizes = [8, 32], strides = [1, 1]} : vector<8x768xf32> to vector<8x32xf32>
    %148 = arith.truncf %147 : vector<8x32xf32> to vector<8x32xbf16>
    %149 = vector.extract_strided_slice %8 {offsets = [0, 448], sizes = [8, 32], strides = [1, 1]} : vector<8x768xf32> to vector<8x32xf32>
    %150 = arith.truncf %149 : vector<8x32xf32> to vector<8x32xbf16>
    %151 = vector.extract_strided_slice %8 {offsets = [0, 704], sizes = [8, 32], strides = [1, 1]} : vector<8x768xf32> to vector<8x32xf32>
    %152 = arith.truncf %151 : vector<8x32xf32> to vector<8x32xbf16>
    %cst_57 = arith.constant dense<0.000000e+00> : vector<8x8xf32>
    %153 = tpu.matmul %148, %150, %cst_57 {dimension_numbers = #tpu.dot_dimension_numbers<[1], [1], [0], [0], [0, 0, 1, 0], [], []>} : vector<8x32xbf16>, vector<8x32xbf16>, vector<8x8xf32> -> vector<8x8xf32>
    %cst_58 = arith.constant 0xFF800000 : f32
    %154 = vector.broadcast %cst_58 : f32 to vector<8x8xf32>
    %155 = arith.select %2, %153, %154 : vector<8x8xi1>, vector<8x8xf32>
    %cst_59 = arith.constant dense<0xFF800000> : vector<8xf32>
    %156 = vector.multi_reduction <maximumf>, %155, %cst_59 [1] : vector<8x8xf32> to vector<8xf32>
    %157 = vector.shape_cast %156 : vector<8xf32> to vector<8x1xf32>
    %158 = vector.broadcast %157 : vector<8x1xf32> to vector<8x8xf32>
    %159 = arith.subf %155, %158 : vector<8x8xf32>
    %160 = math.exp %159 : vector<8x8xf32>
    %cst_60 = arith.constant dense<0.000000e+00> : vector<8xf32>
    %161 = vector.multi_reduction <add>, %160, %cst_60 [1] : vector<8x8xf32> to vector<8xf32>
    %162 = vector.shape_cast %161 : vector<8xf32> to vector<8x1xf32>
    %163 = vector.broadcast %162 : vector<8x1xf32> to vector<8x8xf32>
    %164 = arith.divf %160, %163 : vector<8x8xf32>
    %c0_61 = arith.constant 0 : index
    %c6 = arith.constant 6 : index
    %c0_62 = arith.constant 0 : index
    %c0_63 = arith.constant 0 : index
    %165 = vector.load %arg5[%c0_61, %c6, %c0_62, %c0_63] : memref<2x8x8x8xf32, #tpu.memory_space<vmem>>, vector<1x1x8x8xf32>
    %166 = vector.shape_cast %165 : vector<1x1x8x8xf32> to vector<8x8xf32>
    %167 = arith.mulf %164, %166 : vector<8x8xf32>
    %168 = arith.truncf %167 : vector<8x8xf32> to vector<8x8xbf16>
    %cst_64 = arith.constant dense<0.000000e+00> : vector<8x32xf32>
    %169 = tpu.matmul %168, %152, %cst_64 {dimension_numbers = #tpu.dot_dimension_numbers<[1], [0], [0], [1], [0, 0, 1, 1], [], []>} : vector<8x8xbf16>, vector<8x32xbf16>, vector<8x32xf32> -> vector<8x32xf32>
    %170 = vector.extract_strided_slice %8 {offsets = [0, 224], sizes = [8, 32], strides = [1, 1]} : vector<8x768xf32> to vector<8x32xf32>
    %171 = arith.truncf %170 : vector<8x32xf32> to vector<8x32xbf16>
    %172 = vector.extract_strided_slice %8 {offsets = [0, 480], sizes = [8, 32], strides = [1, 1]} : vector<8x768xf32> to vector<8x32xf32>
    %173 = arith.truncf %172 : vector<8x32xf32> to vector<8x32xbf16>
    %174 = vector.extract_strided_slice %8 {offsets = [0, 736], sizes = [8, 32], strides = [1, 1]} : vector<8x768xf32> to vector<8x32xf32>
    %175 = arith.truncf %174 : vector<8x32xf32> to vector<8x32xbf16>
    %cst_65 = arith.constant dense<0.000000e+00> : vector<8x8xf32>
    %176 = tpu.matmul %171, %173, %cst_65 {dimension_numbers = #tpu.dot_dimension_numbers<[1], [1], [0], [0], [0, 0, 1, 0], [], []>} : vector<8x32xbf16>, vector<8x32xbf16>, vector<8x8xf32> -> vector<8x8xf32>
    %cst_66 = arith.constant 0xFF800000 : f32
    %177 = vector.broadcast %cst_66 : f32 to vector<8x8xf32>
    %178 = arith.select %2, %176, %177 : vector<8x8xi1>, vector<8x8xf32>
    %cst_67 = arith.constant dense<0xFF800000> : vector<8xf32>
    %179 = vector.multi_reduction <maximumf>, %178, %cst_67 [1] : vector<8x8xf32> to vector<8xf32>
    %180 = vector.shape_cast %179 : vector<8xf32> to vector<8x1xf32>
    %181 = vector.broadcast %180 : vector<8x1xf32> to vector<8x8xf32>
    %182 = arith.subf %178, %181 : vector<8x8xf32>
    %183 = math.exp %182 : vector<8x8xf32>
    %cst_68 = arith.constant dense<0.000000e+00> : vector<8xf32>
    %184 = vector.multi_reduction <add>, %183, %cst_68 [1] : vector<8x8xf32> to vector<8xf32>
    %185 = vector.shape_cast %184 : vector<8xf32> to vector<8x1xf32>
    %186 = vector.broadcast %185 : vector<8x1xf32> to vector<8x8xf32>
    %187 = arith.divf %183, %186 : vector<8x8xf32>
    %c0_69 = arith.constant 0 : index
    %c7 = arith.constant 7 : index
    %c0_70 = arith.constant 0 : index
    %c0_71 = arith.constant 0 : index
    %188 = vector.load %arg5[%c0_69, %c7, %c0_70, %c0_71] : memref<2x8x8x8xf32, #tpu.memory_space<vmem>>, vector<1x1x8x8xf32>
    %189 = vector.shape_cast %188 : vector<1x1x8x8xf32> to vector<8x8xf32>
    %190 = arith.mulf %187, %189 : vector<8x8xf32>
    %191 = arith.truncf %190 : vector<8x8xf32> to vector<8x8xbf16>
    %cst_72 = arith.constant dense<0.000000e+00> : vector<8x32xf32>
    %192 = tpu.matmul %191, %175, %cst_72 {dimension_numbers = #tpu.dot_dimension_numbers<[1], [0], [0], [1], [0, 0, 1, 1], [], []>} : vector<8x8xbf16>, vector<8x32xbf16>, vector<8x32xf32> -> vector<8x32xf32>
    %193 = tpu.concatenate %31, %54, %77, %100, %123, %146, %169, %192 in 1 : vector<8x32xf32>, vector<8x32xf32>, vector<8x32xf32>, vector<8x32xf32>, vector<8x32xf32>, vector<8x32xf32>, vector<8x32xf32>, vector<8x32xf32> -> vector<8x256xf32>
    %194 = arith.truncf %193 : vector<8x256xf32> to vector<8x256xbf16>
    %cst_73 = arith.constant dense<0.000000e+00> : vector<8x256xf32>
    %195 = tpu.matmul %194, %4, %cst_73 {dimension_numbers = #tpu.dot_dimension_numbers<[1], [0], [0], [1], [0, 0, 1, 1], [], []>} : vector<8x256xbf16>, vector<256x256xbf16>, vector<8x256xf32> -> vector<8x256xf32>
    %196 = vector.broadcast %5 : vector<1x256xf32> to vector<8x256xf32>
    %197 = arith.addf %195, %196 : vector<8x256xf32>
    %c0_74 = arith.constant 0 : index
    %c0_75 = arith.constant 0 : index
    %c0_76 = arith.constant 0 : index
    %198 = vector.load %arg6[%c0_74, %c0_75, %c0_76] : memref<2x8x256xf32, #tpu.memory_space<vmem>>, vector<1x8x256xf32>
    %199 = vector.shape_cast %198 : vector<1x8x256xf32> to vector<8x256xf32>
    %200 = arith.mulf %197, %199 : vector<8x256xf32>
    %c0_77 = arith.constant 0 : index
    %c0_78 = arith.constant 0 : index
    %c0_79 = arith.constant 0 : index
    %201 = vector.load %arg7[%c0_77, %c0_78, %c0_79] : memref<2x8x256xf32, #tpu.memory_space<vmem>>, vector<1x8x256xf32>
    %202 = vector.shape_cast %201 : vector<1x8x256xf32> to vector<8x256xf32>
    %203 = vector.shape_cast %200 : vector<8x256xf32> to vector<1x8x256xf32>
    tpu.vector_store %arg7[%c0_77, %c0_78, %c0_79], %203 {strides = array<i32>} : memref<2x8x256xf32, #tpu.memory_space<vmem>>, vector<1x8x256xf32>,
    %c1_80 = arith.constant 1 : index
    %c0_81 = arith.constant 0 : index
    %c0_82 = arith.constant 0 : index
    %204 = vector.load %arg1[%c1_80, %c0_81, %c0_82] : memref<2x8x256xbf16, #tpu.memory_space<vmem>>, vector<1x8x256xbf16>
    %205 = vector.shape_cast %204 : vector<1x8x256xbf16> to vector<8x256xbf16>
    %cst_83 = arith.constant dense<0.000000e+00> : vector<8x768xf32>
    %206 = tpu.matmul %205, %3, %cst_83 {dimension_numbers = #tpu.dot_dimension_numbers<[1], [0], [0], [1], [0, 0, 1, 1], [], []>} : vector<8x256xbf16>, vector<256x768xbf16>, vector<8x768xf32> -> vector<8x768xf32>
    %207 = vector.extract_strided_slice %206 {offsets = [0, 0], sizes = [8, 32], strides = [1, 1]} : vector<8x768xf32> to vector<8x32xf32>
    %208 = arith.truncf %207 : vector<8x32xf32> to vector<8x32xbf16>
    %209 = vector.extract_strided_slice %206 {offsets = [0, 256], sizes = [8, 32], strides = [1, 1]} : vector<8x768xf32> to vector<8x32xf32>
    %210 = arith.truncf %209 : vector<8x32xf32> to vector<8x32xbf16>
    %211 = vector.extract_strided_slice %206 {offsets = [0, 512], sizes = [8, 32], strides = [1, 1]} : vector<8x768xf32> to vector<8x32xf32>
    %212 = arith.truncf %211 : vector<8x32xf32> to vector<8x32xbf16>
    %cst_84 = arith.constant dense<0.000000e+00> : vector<8x8xf32>
    %213 = tpu.matmul %208, %210, %cst_84 {dimension_numbers = #tpu.dot_dimension_numbers<[1], [1], [0], [0], [0, 0, 1, 0], [], []>} : vector<8x32xbf16>, vector<8x32xbf16>, vector<8x8xf32> -> vector<8x8xf32>
    %cst_85 = arith.constant 0xFF800000 : f32
    %214 = vector.broadcast %cst_85 : f32 to vector<8x8xf32>
    %215 = arith.select %2, %213, %214 : vector<8x8xi1>, vector<8x8xf32>
    %cst_86 = arith.constant dense<0xFF800000> : vector<8xf32>
    %216 = vector.multi_reduction <maximumf>, %215, %cst_86 [1] : vector<8x8xf32> to vector<8xf32>
    %217 = vector.shape_cast %216 : vector<8xf32> to vector<8x1xf32>
    %218 = vector.broadcast %217 : vector<8x1xf32> to vector<8x8xf32>
    %219 = arith.subf %215, %218 : vector<8x8xf32>
    %220 = math.exp %219 : vector<8x8xf32>
    %cst_87 = arith.constant dense<0.000000e+00> : vector<8xf32>
    %221 = vector.multi_reduction <add>, %220, %cst_87 [1] : vector<8x8xf32> to vector<8xf32>
    %222 = vector.shape_cast %221 : vector<8xf32> to vector<8x1xf32>
    %223 = vector.broadcast %222 : vector<8x1xf32> to vector<8x8xf32>
    %224 = arith.divf %220, %223 : vector<8x8xf32>
    %c1_88 = arith.constant 1 : index
    %c0_89 = arith.constant 0 : index
    %c0_90 = arith.constant 0 : index
    %c0_91 = arith.constant 0 : index
    %225 = vector.load %arg5[%c1_88, %c0_89, %c0_90, %c0_91] : memref<2x8x8x8xf32, #tpu.memory_space<vmem>>, vector<1x1x8x8xf32>
    %226 = vector.shape_cast %225 : vector<1x1x8x8xf32> to vector<8x8xf32>
    %227 = arith.mulf %224, %226 : vector<8x8xf32>
    %228 = arith.truncf %227 : vector<8x8xf32> to vector<8x8xbf16>
    %cst_92 = arith.constant dense<0.000000e+00> : vector<8x32xf32>
    %229 = tpu.matmul %228, %212, %cst_92 {dimension_numbers = #tpu.dot_dimension_numbers<[1], [0], [0], [1], [0, 0, 1, 1], [], []>} : vector<8x8xbf16>, vector<8x32xbf16>, vector<8x32xf32> -> vector<8x32xf32>
    %230 = vector.extract_strided_slice %206 {offsets = [0, 32], sizes = [8, 32], strides = [1, 1]} : vector<8x768xf32> to vector<8x32xf32>
    %231 = arith.truncf %230 : vector<8x32xf32> to vector<8x32xbf16>
    %232 = vector.extract_strided_slice %206 {offsets = [0, 288], sizes = [8, 32], strides = [1, 1]} : vector<8x768xf32> to vector<8x32xf32>
    %233 = arith.truncf %232 : vector<8x32xf32> to vector<8x32xbf16>
    %234 = vector.extract_strided_slice %206 {offsets = [0, 544], sizes = [8, 32], strides = [1, 1]} : vector<8x768xf32> to vector<8x32xf32>
    %235 = arith.truncf %234 : vector<8x32xf32> to vector<8x32xbf16>
    %cst_93 = arith.constant dense<0.000000e+00> : vector<8x8xf32>
    %236 = tpu.matmul %231, %233, %cst_93 {dimension_numbers = #tpu.dot_dimension_numbers<[1], [1], [0], [0], [0, 0, 1, 0], [], []>} : vector<8x32xbf16>, vector<8x32xbf16>, vector<8x8xf32> -> vector<8x8xf32>
    %cst_94 = arith.constant 0xFF800000 : f32
    %237 = vector.broadcast %cst_94 : f32 to vector<8x8xf32>
    %238 = arith.select %2, %236, %237 : vector<8x8xi1>, vector<8x8xf32>
    %cst_95 = arith.constant dense<0xFF800000> : vector<8xf32>
    %239 = vector.multi_reduction <maximumf>, %238, %cst_95 [1] : vector<8x8xf32> to vector<8xf32>
    %240 = vector.shape_cast %239 : vector<8xf32> to vector<8x1xf32>
    %241 = vector.broadcast %240 : vector<8x1xf32> to vector<8x8xf32>
    %242 = arith.subf %238, %241 : vector<8x8xf32>
    %243 = math.exp %242 : vector<8x8xf32>
    %cst_96 = arith.constant dense<0.000000e+00> : vector<8xf32>
    %244 = vector.multi_reduction <add>, %243, %cst_96 [1] : vector<8x8xf32> to vector<8xf32>
    %245 = vector.shape_cast %244 : vector<8xf32> to vector<8x1xf32>
    %246 = vector.broadcast %245 : vector<8x1xf32> to vector<8x8xf32>
    %247 = arith.divf %243, %246 : vector<8x8xf32>
    %c1_97 = arith.constant 1 : index
    %c1_98 = arith.constant 1 : index
    %c0_99 = arith.constant 0 : index
    %c0_100 = arith.constant 0 : index
    %248 = vector.load %arg5[%c1_97, %c1_98, %c0_99, %c0_100] : memref<2x8x8x8xf32, #tpu.memory_space<vmem>>, vector<1x1x8x8xf32>
    %249 = vector.shape_cast %248 : vector<1x1x8x8xf32> to vector<8x8xf32>
    %250 = arith.mulf %247, %249 : vector<8x8xf32>
    %251 = arith.truncf %250 : vector<8x8xf32> to vector<8x8xbf16>
    %cst_101 = arith.constant dense<0.000000e+00> : vector<8x32xf32>
    %252 = tpu.matmul %251, %235, %cst_101 {dimension_numbers = #tpu.dot_dimension_numbers<[1], [0], [0], [1], [0, 0, 1, 1], [], []>} : vector<8x8xbf16>, vector<8x32xbf16>, vector<8x32xf32> -> vector<8x32xf32>
    %253 = vector.extract_strided_slice %206 {offsets = [0, 64], sizes = [8, 32], strides = [1, 1]} : vector<8x768xf32> to vector<8x32xf32>
    %254 = arith.truncf %253 : vector<8x32xf32> to vector<8x32xbf16>
    %255 = vector.extract_strided_slice %206 {offsets = [0, 320], sizes = [8, 32], strides = [1, 1]} : vector<8x768xf32> to vector<8x32xf32>
    %256 = arith.truncf %255 : vector<8x32xf32> to vector<8x32xbf16>
    %257 = vector.extract_strided_slice %206 {offsets = [0, 576], sizes = [8, 32], strides = [1, 1]} : vector<8x768xf32> to vector<8x32xf32>
    %258 = arith.truncf %257 : vector<8x32xf32> to vector<8x32xbf16>
    %cst_102 = arith.constant dense<0.000000e+00> : vector<8x8xf32>
    %259 = tpu.matmul %254, %256, %cst_102 {dimension_numbers = #tpu.dot_dimension_numbers<[1], [1], [0], [0], [0, 0, 1, 0], [], []>} : vector<8x32xbf16>, vector<8x32xbf16>, vector<8x8xf32> -> vector<8x8xf32>
    %cst_103 = arith.constant 0xFF800000 : f32
    %260 = vector.broadcast %cst_103 : f32 to vector<8x8xf32>
    %261 = arith.select %2, %259, %260 : vector<8x8xi1>, vector<8x8xf32>
    %cst_104 = arith.constant dense<0xFF800000> : vector<8xf32>
    %262 = vector.multi_reduction <maximumf>, %261, %cst_104 [1] : vector<8x8xf32> to vector<8xf32>
    %263 = vector.shape_cast %262 : vector<8xf32> to vector<8x1xf32>
    %264 = vector.broadcast %263 : vector<8x1xf32> to vector<8x8xf32>
    %265 = arith.subf %261, %264 : vector<8x8xf32>
    %266 = math.exp %265 : vector<8x8xf32>
    %cst_105 = arith.constant dense<0.000000e+00> : vector<8xf32>
    %267 = vector.multi_reduction <add>, %266, %cst_105 [1] : vector<8x8xf32> to vector<8xf32>
    %268 = vector.shape_cast %267 : vector<8xf32> to vector<8x1xf32>
    %269 = vector.broadcast %268 : vector<8x1xf32> to vector<8x8xf32>
    %270 = arith.divf %266, %269 : vector<8x8xf32>
    %c1_106 = arith.constant 1 : index
    %c2_107 = arith.constant 2 : index
    %c0_108 = arith.constant 0 : index
    %c0_109 = arith.constant 0 : index
    %271 = vector.load %arg5[%c1_106, %c2_107, %c0_108, %c0_109] : memref<2x8x8x8xf32, #tpu.memory_space<vmem>>, vector<1x1x8x8xf32>
    %272 = vector.shape_cast %271 : vector<1x1x8x8xf32> to vector<8x8xf32>
    %273 = arith.mulf %270, %272 : vector<8x8xf32>
    %274 = arith.truncf %273 : vector<8x8xf32> to vector<8x8xbf16>
    %cst_110 = arith.constant dense<0.000000e+00> : vector<8x32xf32>
    %275 = tpu.matmul %274, %258, %cst_110 {dimension_numbers = #tpu.dot_dimension_numbers<[1], [0], [0], [1], [0, 0, 1, 1], [], []>} : vector<8x8xbf16>, vector<8x32xbf16>, vector<8x32xf32> -> vector<8x32xf32>
    %276 = vector.extract_strided_slice %206 {offsets = [0, 96], sizes = [8, 32], strides = [1, 1]} : vector<8x768xf32> to vector<8x32xf32>
    %277 = arith.truncf %276 : vector<8x32xf32> to vector<8x32xbf16>
    %278 = vector.extract_strided_slice %206 {offsets = [0, 352], sizes = [8, 32], strides = [1, 1]} : vector<8x768xf32> to vector<8x32xf32>
    %279 = arith.truncf %278 : vector<8x32xf32> to vector<8x32xbf16>
    %280 = vector.extract_strided_slice %206 {offsets = [0, 608], sizes = [8, 32], strides = [1, 1]} : vector<8x768xf32> to vector<8x32xf32>
    %281 = arith.truncf %280 : vector<8x32xf32> to vector<8x32xbf16>
    %cst_111 = arith.constant dense<0.000000e+00> : vector<8x8xf32>
    %282 = tpu.matmul %277, %279, %cst_111 {dimension_numbers = #tpu.dot_dimension_numbers<[1], [1], [0], [0], [0, 0, 1, 0], [], []>} : vector<8x32xbf16>, vector<8x32xbf16>, vector<8x8xf32> -> vector<8x8xf32>
    %cst_112 = arith.constant 0xFF800000 : f32
    %283 = vector.broadcast %cst_112 : f32 to vector<8x8xf32>
    %284 = arith.select %2, %282, %283 : vector<8x8xi1>, vector<8x8xf32>
    %cst_113 = arith.constant dense<0xFF800000> : vector<8xf32>
    %285 = vector.multi_reduction <maximumf>, %284, %cst_113 [1] : vector<8x8xf32> to vector<8xf32>
    %286 = vector.shape_cast %285 : vector<8xf32> to vector<8x1xf32>
    %287 = vector.broadcast %286 : vector<8x1xf32> to vector<8x8xf32>
    %288 = arith.subf %284, %287 : vector<8x8xf32>
    %289 = math.exp %288 : vector<8x8xf32>
    %cst_114 = arith.constant dense<0.000000e+00> : vector<8xf32>
    %290 = vector.multi_reduction <add>, %289, %cst_114 [1] : vector<8x8xf32> to vector<8xf32>
    %291 = vector.shape_cast %290 : vector<8xf32> to vector<8x1xf32>
    %292 = vector.broadcast %291 : vector<8x1xf32> to vector<8x8xf32>
    %293 = arith.divf %289, %292 : vector<8x8xf32>
    %c1_115 = arith.constant 1 : index
    %c3_116 = arith.constant 3 : index
    %c0_117 = arith.constant 0 : index
    %c0_118 = arith.constant 0 : index
    %294 = vector.load %arg5[%c1_115, %c3_116, %c0_117, %c0_118] : memref<2x8x8x8xf32, #tpu.memory_space<vmem>>, vector<1x1x8x8xf32>
    %295 = vector.shape_cast %294 : vector<1x1x8x8xf32> to vector<8x8xf32>
    %296 = arith.mulf %293, %295 : vector<8x8xf32>
    %297 = arith.truncf %296 : vector<8x8xf32> to vector<8x8xbf16>
    %cst_119 = arith.constant dense<0.000000e+00> : vector<8x32xf32>
    %298 = tpu.matmul %297, %281, %cst_119 {dimension_numbers = #tpu.dot_dimension_numbers<[1], [0], [0], [1], [0, 0, 1, 1], [], []>} : vector<8x8xbf16>, vector<8x32xbf16>, vector<8x32xf32> -> vector<8x32xf32>
    %299 = vector.extract_strided_slice %206 {offsets = [0, 128], sizes = [8, 32], strides = [1, 1]} : vector<8x768xf32> to vector<8x32xf32>
    %300 = arith.truncf %299 : vector<8x32xf32> to vector<8x32xbf16>
    %301 = vector.extract_strided_slice %206 {offsets = [0, 384], sizes = [8, 32], strides = [1, 1]} : vector<8x768xf32> to vector<8x32xf32>
    %302 = arith.truncf %301 : vector<8x32xf32> to vector<8x32xbf16>
    %303 = vector.extract_strided_slice %206 {offsets = [0, 640], sizes = [8, 32], strides = [1, 1]} : vector<8x768xf32> to vector<8x32xf32>
    %304 = arith.truncf %303 : vector<8x32xf32> to vector<8x32xbf16>
    %cst_120 = arith.constant dense<0.000000e+00> : vector<8x8xf32>
    %305 = tpu.matmul %300, %302, %cst_120 {dimension_numbers = #tpu.dot_dimension_numbers<[1], [1], [0], [0], [0, 0, 1, 0], [], []>} : vector<8x32xbf16>, vector<8x32xbf16>, vector<8x8xf32> -> vector<8x8xf32>
    %cst_121 = arith.constant 0xFF800000 : f32
    %306 = vector.broadcast %cst_121 : f32 to vector<8x8xf32>
    %307 = arith.select %2, %305, %306 : vector<8x8xi1>, vector<8x8xf32>
    %cst_122 = arith.constant dense<0xFF800000> : vector<8xf32>
    %308 = vector.multi_reduction <maximumf>, %307, %cst_122 [1] : vector<8x8xf32> to vector<8xf32>
    %309 = vector.shape_cast %308 : vector<8xf32> to vector<8x1xf32>
    %310 = vector.broadcast %309 : vector<8x1xf32> to vector<8x8xf32>
    %311 = arith.subf %307, %310 : vector<8x8xf32>
    %312 = math.exp %311 : vector<8x8xf32>
    %cst_123 = arith.constant dense<0.000000e+00> : vector<8xf32>
    %313 = vector.multi_reduction <add>, %312, %cst_123 [1] : vector<8x8xf32> to vector<8xf32>
    %314 = vector.shape_cast %313 : vector<8xf32> to vector<8x1xf32>
    %315 = vector.broadcast %314 : vector<8x1xf32> to vector<8x8xf32>
    %316 = arith.divf %312, %315 : vector<8x8xf32>
    %c1_124 = arith.constant 1 : index
    %c4_125 = arith.constant 4 : index
    %c0_126 = arith.constant 0 : index
    %c0_127 = arith.constant 0 : index
    %317 = vector.load %arg5[%c1_124, %c4_125, %c0_126, %c0_127] : memref<2x8x8x8xf32, #tpu.memory_space<vmem>>, vector<1x1x8x8xf32>
    %318 = vector.shape_cast %317 : vector<1x1x8x8xf32> to vector<8x8xf32>
    %319 = arith.mulf %316, %318 : vector<8x8xf32>
    %320 = arith.truncf %319 : vector<8x8xf32> to vector<8x8xbf16>
    %cst_128 = arith.constant dense<0.000000e+00> : vector<8x32xf32>
    %321 = tpu.matmul %320, %304, %cst_128 {dimension_numbers = #tpu.dot_dimension_numbers<[1], [0], [0], [1], [0, 0, 1, 1], [], []>} : vector<8x8xbf16>, vector<8x32xbf16>, vector<8x32xf32> -> vector<8x32xf32>
    %322 = vector.extract_strided_slice %206 {offsets = [0, 160], sizes = [8, 32], strides = [1, 1]} : vector<8x768xf32> to vector<8x32xf32>
    %323 = arith.truncf %322 : vector<8x32xf32> to vector<8x32xbf16>
    %324 = vector.extract_strided_slice %206 {offsets = [0, 416], sizes = [8, 32], strides = [1, 1]} : vector<8x768xf32> to vector<8x32xf32>
    %325 = arith.truncf %324 : vector<8x32xf32> to vector<8x32xbf16>
    %326 = vector.extract_strided_slice %206 {offsets = [0, 672], sizes = [8, 32], strides = [1, 1]} : vector<8x768xf32> to vector<8x32xf32>
    %327 = arith.truncf %326 : vector<8x32xf32> to vector<8x32xbf16>
    %cst_129 = arith.constant dense<0.000000e+00> : vector<8x8xf32>
    %328 = tpu.matmul %323, %325, %cst_129 {dimension_numbers = #tpu.dot_dimension_numbers<[1], [1], [0], [0], [0, 0, 1, 0], [], []>} : vector<8x32xbf16>, vector<8x32xbf16>, vector<8x8xf32> -> vector<8x8xf32>
    %cst_130 = arith.constant 0xFF800000 : f32
    %329 = vector.broadcast %cst_130 : f32 to vector<8x8xf32>
    %330 = arith.select %2, %328, %329 : vector<8x8xi1>, vector<8x8xf32>
    %cst_131 = arith.constant dense<0xFF800000> : vector<8xf32>
    %331 = vector.multi_reduction <maximumf>, %330, %cst_131 [1] : vector<8x8xf32> to vector<8xf32>
    %332 = vector.shape_cast %331 : vector<8xf32> to vector<8x1xf32>
    %333 = vector.broadcast %332 : vector<8x1xf32> to vector<8x8xf32>
    %334 = arith.subf %330, %333 : vector<8x8xf32>
    %335 = math.exp %334 : vector<8x8xf32>
    %cst_132 = arith.constant dense<0.000000e+00> : vector<8xf32>
    %336 = vector.multi_reduction <add>, %335, %cst_132 [1] : vector<8x8xf32> to vector<8xf32>
    %337 = vector.shape_cast %336 : vector<8xf32> to vector<8x1xf32>
    %338 = vector.broadcast %337 : vector<8x1xf32> to vector<8x8xf32>
    %339 = arith.divf %335, %338 : vector<8x8xf32>
    %c1_133 = arith.constant 1 : index
    %c5_134 = arith.constant 5 : index
    %c0_135 = arith.constant 0 : index
    %c0_136 = arith.constant 0 : index
    %340 = vector.load %arg5[%c1_133, %c5_134, %c0_135, %c0_136] : memref<2x8x8x8xf32, #tpu.memory_space<vmem>>, vector<1x1x8x8xf32>
    %341 = vector.shape_cast %340 : vector<1x1x8x8xf32> to vector<8x8xf32>
    %342 = arith.mulf %339, %341 : vector<8x8xf32>
    %343 = arith.truncf %342 : vector<8x8xf32> to vector<8x8xbf16>
    %cst_137 = arith.constant dense<0.000000e+00> : vector<8x32xf32>
    %344 = tpu.matmul %343, %327, %cst_137 {dimension_numbers = #tpu.dot_dimension_numbers<[1], [0], [0], [1], [0, 0, 1, 1], [], []>} : vector<8x8xbf16>, vector<8x32xbf16>, vector<8x32xf32> -> vector<8x32xf32>
    %345 = vector.extract_strided_slice %206 {offsets = [0, 192], sizes = [8, 32], strides = [1, 1]} : vector<8x768xf32> to vector<8x32xf32>
    %346 = arith.truncf %345 : vector<8x32xf32> to vector<8x32xbf16>
    %347 = vector.extract_strided_slice %206 {offsets = [0, 448], sizes = [8, 32], strides = [1, 1]} : vector<8x768xf32> to vector<8x32xf32>
    %348 = arith.truncf %347 : vector<8x32xf32> to vector<8x32xbf16>
    %349 = vector.extract_strided_slice %206 {offsets = [0, 704], sizes = [8, 32], strides = [1, 1]} : vector<8x768xf32> to vector<8x32xf32>
    %350 = arith.truncf %349 : vector<8x32xf32> to vector<8x32xbf16>
    %cst_138 = arith.constant dense<0.000000e+00> : vector<8x8xf32>
    %351 = tpu.matmul %346, %348, %cst_138 {dimension_numbers = #tpu.dot_dimension_numbers<[1], [1], [0], [0], [0, 0, 1, 0], [], []>} : vector<8x32xbf16>, vector<8x32xbf16>, vector<8x8xf32> -> vector<8x8xf32>
    %cst_139 = arith.constant 0xFF800000 : f32
    %352 = vector.broadcast %cst_139 : f32 to vector<8x8xf32>
    %353 = arith.select %2, %351, %352 : vector<8x8xi1>, vector<8x8xf32>
    %cst_140 = arith.constant dense<0xFF800000> : vector<8xf32>
    %354 = vector.multi_reduction <maximumf>, %353, %cst_140 [1] : vector<8x8xf32> to vector<8xf32>
    %355 = vector.shape_cast %354 : vector<8xf32> to vector<8x1xf32>
    %356 = vector.broadcast %355 : vector<8x1xf32> to vector<8x8xf32>
    %357 = arith.subf %353, %356 : vector<8x8xf32>
    %358 = math.exp %357 : vector<8x8xf32>
    %cst_141 = arith.constant dense<0.000000e+00> : vector<8xf32>
    %359 = vector.multi_reduction <add>, %358, %cst_141 [1] : vector<8x8xf32> to vector<8xf32>
    %360 = vector.shape_cast %359 : vector<8xf32> to vector<8x1xf32>
    %361 = vector.broadcast %360 : vector<8x1xf32> to vector<8x8xf32>
    %362 = arith.divf %358, %361 : vector<8x8xf32>
    %c1_142 = arith.constant 1 : index
    %c6_143 = arith.constant 6 : index
    %c0_144 = arith.constant 0 : index
    %c0_145 = arith.constant 0 : index
    %363 = vector.load %arg5[%c1_142, %c6_143, %c0_144, %c0_145] : memref<2x8x8x8xf32, #tpu.memory_space<vmem>>, vector<1x1x8x8xf32>
    %364 = vector.shape_cast %363 : vector<1x1x8x8xf32> to vector<8x8xf32>
    %365 = arith.mulf %362, %364 : vector<8x8xf32>
    %366 = arith.truncf %365 : vector<8x8xf32> to vector<8x8xbf16>
    %cst_146 = arith.constant dense<0.000000e+00> : vector<8x32xf32>
    %367 = tpu.matmul %366, %350, %cst_146 {dimension_numbers = #tpu.dot_dimension_numbers<[1], [0], [0], [1], [0, 0, 1, 1], [], []>} : vector<8x8xbf16>, vector<8x32xbf16>, vector<8x32xf32> -> vector<8x32xf32>
    %368 = vector.extract_strided_slice %206 {offsets = [0, 224], sizes = [8, 32], strides = [1, 1]} : vector<8x768xf32> to vector<8x32xf32>
    %369 = arith.truncf %368 : vector<8x32xf32> to vector<8x32xbf16>
    %370 = vector.extract_strided_slice %206 {offsets = [0, 480], sizes = [8, 32], strides = [1, 1]} : vector<8x768xf32> to vector<8x32xf32>
    %371 = arith.truncf %370 : vector<8x32xf32> to vector<8x32xbf16>
    %372 = vector.extract_strided_slice %206 {offsets = [0, 736], sizes = [8, 32], strides = [1, 1]} : vector<8x768xf32> to vector<8x32xf32>
    %373 = arith.truncf %372 : vector<8x32xf32> to vector<8x32xbf16>
    %cst_147 = arith.constant dense<0.000000e+00> : vector<8x8xf32>
    %374 = tpu.matmul %369, %371, %cst_147 {dimension_numbers = #tpu.dot_dimension_numbers<[1], [1], [0], [0], [0, 0, 1, 0], [], []>} : vector<8x32xbf16>, vector<8x32xbf16>, vector<8x8xf32> -> vector<8x8xf32>
    %cst_148 = arith.constant 0xFF800000 : f32
    %375 = vector.broadcast %cst_148 : f32 to vector<8x8xf32>
    %376 = arith.select %2, %374, %375 : vector<8x8xi1>, vector<8x8xf32>
    %cst_149 = arith.constant dense<0xFF800000> : vector<8xf32>
    %377 = vector.multi_reduction <maximumf>, %376, %cst_149 [1] : vector<8x8xf32> to vector<8xf32>
    %378 = vector.shape_cast %377 : vector<8xf32> to vector<8x1xf32>
    %379 = vector.broadcast %378 : vector<8x1xf32> to vector<8x8xf32>
    %380 = arith.subf %376, %379 : vector<8x8xf32>
    %381 = math.exp %380 : vector<8x8xf32>
    %cst_150 = arith.constant dense<0.000000e+00> : vector<8xf32>
    %382 = vector.multi_reduction <add>, %381, %cst_150 [1] : vector<8x8xf32> to vector<8xf32>
    %383 = vector.shape_cast %382 : vector<8xf32> to vector<8x1xf32>
    %384 = vector.broadcast %383 : vector<8x1xf32> to vector<8x8xf32>
    %385 = arith.divf %381, %384 : vector<8x8xf32>
    %c1_151 = arith.constant 1 : index
    %c7_152 = arith.constant 7 : index
    %c0_153 = arith.constant 0 : index
    %c0_154 = arith.constant 0 : index
    %386 = vector.load %arg5[%c1_151, %c7_152, %c0_153, %c0_154] : memref<2x8x8x8xf32, #tpu.memory_space<vmem>>, vector<1x1x8x8xf32>
    %387 = vector.shape_cast %386 : vector<1x1x8x8xf32> to vector<8x8xf32>
    %388 = arith.mulf %385, %387 : vector<8x8xf32>
    %389 = arith.truncf %388 : vector<8x8xf32> to vector<8x8xbf16>
    %cst_155 = arith.constant dense<0.000000e+00> : vector<8x32xf32>
    %390 = tpu.matmul %389, %373, %cst_155 {dimension_numbers = #tpu.dot_dimension_numbers<[1], [0], [0], [1], [0, 0, 1, 1], [], []>} : vector<8x8xbf16>, vector<8x32xbf16>, vector<8x32xf32> -> vector<8x32xf32>
    %391 = tpu.concatenate %229, %252, %275, %298, %321, %344, %367, %390 in 1 : vector<8x32xf32>, vector<8x32xf32>, vector<8x32xf32>, vector<8x32xf32>, vector<8x32xf32>, vector<8x32xf32>, vector<8x32xf32>, vector<8x32xf32> -> vector<8x256xf32>
    %392 = arith.truncf %391 : vector<8x256xf32> to vector<8x256xbf16>
    %cst_156 = arith.constant dense<0.000000e+00> : vector<8x256xf32>
    %393 = tpu.matmul %392, %4, %cst_156 {dimension_numbers = #tpu.dot_dimension_numbers<[1], [0], [0], [1], [0, 0, 1, 1], [], []>} : vector<8x256xbf16>, vector<256x256xbf16>, vector<8x256xf32> -> vector<8x256xf32>
    %394 = vector.broadcast %5 : vector<1x256xf32> to vector<8x256xf32>
    %395 = arith.addf %393, %394 : vector<8x256xf32>
    %c1_157 = arith.constant 1 : index
    %c0_158 = arith.constant 0 : index
    %c0_159 = arith.constant 0 : index
    %396 = vector.load %arg6[%c1_157, %c0_158, %c0_159] : memref<2x8x256xf32, #tpu.memory_space<vmem>>, vector<1x8x256xf32>
    %397 = vector.shape_cast %396 : vector<1x8x256xf32> to vector<8x256xf32>
    %398 = arith.mulf %395, %397 : vector<8x256xf32>
    %c1_160 = arith.constant 1 : index
    %c0_161 = arith.constant 0 : index
    %c0_162 = arith.constant 0 : index
    %399 = vector.load %arg7[%c1_160, %c0_161, %c0_162] : memref<2x8x256xf32, #tpu.memory_space<vmem>>, vector<1x8x256xf32>
    %400 = vector.shape_cast %399 : vector<1x8x256xf32> to vector<8x256xf32>
    %401 = vector.shape_cast %398 : vector<8x256xf32> to vector<1x8x256xf32>
    tpu.vector_store %arg7[%c1_160, %c0_161, %c0_162], %401 {strides = array<i32>} : memref<2x8x256xf32, #tpu.memory_space<vmem>>, vector<1x8x256xf32>,
    return
  }
  func.func @transform_0(%arg0: i32) -> (i32, i32, i32) {
    %c0_i32 = arith.constant 0 : i32
    %c0_i32_0 = arith.constant 0 : i32
    %c0_i32_1 = arith.constant 0 : i32
    return %arg0, %c0_i32, %c0_i32_0 : i32, i32, i32
  }
  func.func @transform_1(%arg0: i32) -> (i32, i32) {
    %c0_i32 = arith.constant 0 : i32
    %c0_i32_0 = arith.constant 0 : i32
    %c0_i32_1 = arith.constant 0 : i32
    return %c0_i32, %c0_i32_0 : i32, i32
  }
  func.func @transform_2(%arg0: i32) -> (i32, i32) {
    %c0_i32 = arith.constant 0 : i32
    %c0_i32_0 = arith.constant 0 : i32
    %c0_i32_1 = arith.constant 0 : i32
    return %c0_i32, %c0_i32_0 : i32, i32
  }
  func.func @transform_3(%arg0: i32) -> (i32, i32) {
    %c0_i32 = arith.constant 0 : i32
    %c0_i32_0 = arith.constant 0 : i32
    %c0_i32_1 = arith.constant 0 : i32
    return %c0_i32, %c0_i32_0 : i32, i32
  }
  func.func @transform_4(%arg0: i32) -> (i32, i32, i32, i32) {
    %c0_i32 = arith.constant 0 : i32
    %c0_i32_0 = arith.constant 0 : i32
    %c0_i32_1 = arith.constant 0 : i32
    %c0_i32_2 = arith.constant 0 : i32
    return %arg0, %c0_i32, %c0_i32_0, %c0_i32_1 : i32, i32, i32, i32
  }
  func.func @transform_5(%arg0: i32) -> (i32, i32, i32) {
    %c0_i32 = arith.constant 0 : i32
    %c0_i32_0 = arith.constant 0 : i32
    %c0_i32_1 = arith.constant 0 : i32
    return %arg0, %c0_i32, %c0_i32_0 : i32, i32, i32
  }
  func.func @transform_6(%arg0: i32) -> (i32, i32, i32) {
    %c0_i32 = arith.constant 0 : i32
    %c0_i32_0 = arith.constant 0 : i32
    %c0_i32_1 = arith.constant 0 : i32
    return %arg0, %c0_i32, %c0_i32_0 : i32, i32, i32
  }
}

</mosaic_0001>

<bundles_post_ra>
// kernel: tpu_custom_call.1
= control target key start
LH: loop header
LB: loop body
LE: loop exit
PB: predicated region body
PF: predicated region fallthrough
CT: control target
= control target key end

     0   :  { %11 = vsyncpa [#allocation3], 0  ;;  %s4910_s0 = inlined_call_operand.hbm [shape: bf16[2,8,256], index: 0, kind: input, shape index: {}]   ;;  %s4911_s1 = inlined_call_operand.hbm [shape: bf16[256,768], index: 1, kind: input, shape index: {}]   ;;  %s4912_s2 = inlined_call_operand.hbm [shape: bf16[256,256], index: 2, kind: input, shape index: {}]   ;;  %s4913_s3 = inlined_call_operand.vmem [shape: f32[1,256], index: 3, kind: input, shape index: {}]   ;;  %s4914_s4 = inlined_call_operand.hbm [shape: f32[2,8,8,8], index: 4, kind: input, shape index: {}]   ;;  %s4915_s5 = inlined_call_operand.hbm [shape: f32[2,8,256], index: 5, kind: input, shape index: {}]   ;;  %s4916_s6 = inlined_call_operand.hbm [shape: f32[2,8,256], index: 6, kind: output, shape index: {}]  }
   0x1   :  { %12 = vsyncpa [#allocation6], 0 }
   0x2   :  { %13 = vsyncpa [#allocation9], 0 }
   0x3   :  { %14 = vsyncpa [#allocation4], 0  ;;  %s4074_s21 = smov [#allocation5]   ;;  %s3934_s25 = scalar_lea.hbm %s4911_s1, 12288 }
   0x4   :  { %s32_s22 = sshll.u32 %s4074_s21, 4  ;;  %p3935_p0 = scmp.ne.s32.totalorder %s4911_s1, %s3934_s25  ;;  %s33_s22 = int_to_ptr.vmem [resolvable:$true] %s32_s22 }
   0x5   :  { %p3938_p1 = scmp.lt.u32.totalorder %s3934_s25, %s4911_s1 }
   0x7   :  { %p3940_p2 = pnand %p3938_p1, %p3935_p0 }
   0x9   :  { %3943 = shalt.err (!%p3940_p2)
}
   0xa   :  { %s3944_s30 = scalar_lea.vmem %s33_s22, 12288  ;;  %p3949_p4 = scmp.lt.s32.totalorder %s33_s22, %s33_s22 }
   0xb   :  { %p3945_p3 = scmp.ne.s32.totalorder %s33_s22, %s3944_s30  ;;  %p3950_p5 = scmp.lt.s32.totalorder %s3944_s30, %s3944_s30 }
   0xd   :  { %p3951_p6 = por %p3950_p5, %p3949_p4 }
   0xf   :  { %p3952_p7 = pnand %p3951_p6, %p3945_p3 }
  0x11   :  { %3955 = shalt.err (!%p3952_p7)
}
  0x12   :  { %s4075_s7 = smov 384   ;;  %s4076_s8 = smov 24  }
  0x13   :  { %38 = dma.hbm_to_vmem [thread:$0]  %s4911_s1, 12288, %s33_s22, [#allocation6], %s4075_s7, %s4075_s7, %s4076_s8  }
  0x14   :  { %s4077_s11 = smov [#allocation8]   ;;  %s4078_s13 = smov [#allocation2]  }
  0x15   :  { %s58_s12 = sshll.u32 %s4077_s11, 4  ;;  %s20_s14 = sshll.u32 %s4078_s13, 4  ;;  %s59_s12 = int_to_ptr.vmem [resolvable:$true] %s58_s12  ;;  %s21_s14 = int_to_ptr.vmem [resolvable:$true] %s20_s14 }
  0x16   :  { %s3956_s17 = scalar_lea.hbm %s4914_s4, 2048 }
  0x17   :  { %p3957_p8 = scmp.ne.s32.totalorder %s4914_s4, %s3956_s17  ;;  %p3960_p9 = scmp.lt.u32.totalorder %s3956_s17, %s4914_s4 }
  0x19   :  { %p3962_p10 = pnand %p3960_p9, %p3957_p8 }
  0x1b   :  { %3965 = shalt.err (!%p3962_p10)
}
  0x1c   :  { %s3966_s1 = scalar_lea.vmem %s59_s12, 2048  ;;  %p3971_p12 = scmp.lt.s32.totalorder %s59_s12, %s59_s12 }
  0x1d   :  { %p3967_p11 = scmp.ne.s32.totalorder %s59_s12, %s3966_s1  ;;  %p3972_p13 = scmp.lt.s32.totalorder %s3966_s1, %s3966_s1 }
  0x1f   :  { %p3973_p0 = por %p3972_p13, %p3971_p12 }
  0x21   :  { %p3974_p1 = pnand %p3973_p0, %p3967_p11 }
  0x23   :  { %3977 = shalt.err (!%p3974_p1)
}
  0x24   :  { %s4079_s22 = smov 128   ;;  %s4080_s23 = smov 8  }
  0x25   :  { %64 = dma.hbm_to_vmem [thread:$0]  %s4914_s4, 2048, %s59_s12, [#allocation9], %s4079_s22, %s4079_s22, %s4080_s23  }
  0x26   :  { %s3978_s28 = scalar_lea.hbm %s4910_s0, 256 }
  0x27   :  { %p3979_p2 = scmp.ne.s32.totalorder %s4910_s0, %s3978_s28  ;;  %p3982_p3 = scmp.lt.u32.totalorder %s3978_s28, %s4910_s0 }
  0x29   :  { %p3984_p4 = pnand %p3982_p3, %p3979_p2 }
  0x2b   :  { %3987 = shalt.err (!%p3984_p4)
}
  0x2c   :  { %s3988_s9 = scalar_lea.vmem %s21_s14, 256  ;;  %p3993_p6 = scmp.lt.s32.totalorder %s21_s14, %s21_s14 }
  0x2d   :  { %p3989_p5 = scmp.ne.s32.totalorder %s21_s14, %s3988_s9  ;;  %p3994_p7 = scmp.lt.s32.totalorder %s3988_s9, %s3988_s9 }
  0x2f   :  { %p3995_p8 = por %p3994_p7, %p3993_p6 }
  0x31   :  { %p3996_p9 = pnand %p3995_p8, %p3989_p5 }
  0x33   :  { %3999 = shalt.err (!%p3996_p9)
}
  0x34   :  { %26 = dma.hbm_to_vmem [thread:$0]  %s4910_s0, 256, %s21_s14, [#allocation3], %s4079_s22, %s4079_s22, %s4080_s23  }
  0x35   :  { %s4081_s11 = smov [#allocation7]   ;;  %s4082_s13 = smov [#allocation10]  }
  0x36   :  { %s44_s12 = sshll.u32 %s4081_s11, 4  ;;  %s70_s15 = sshll.u32 %s4082_s13, 4  ;;  %s45_s12 = int_to_ptr.vmem [resolvable:$true] %s44_s12  ;;  %s71_s15 = int_to_ptr.vmem [resolvable:$true] %s70_s15 }
  0x37   :  { %s4000_s18 = scalar_lea.hbm %s4912_s2, 4096 }
  0x38   :  { %p4001_p10 = scmp.ne.s32.totalorder %s4912_s2, %s4000_s18  ;;  %p4004_p11 = scmp.lt.u32.totalorder %s4000_s18, %s4912_s2 }
  0x3a   :  { %p4006_p12 = pnand %p4004_p11, %p4001_p10 }
  0x3c   :  { %4009 = shalt.err (!%p4006_p12)
}
  0x3d   :  { %s4010_s0 = scalar_lea.vmem %s45_s12, 4096  ;;  %p4015_p0 = scmp.lt.s32.totalorder %s45_s12, %s45_s12 }
  0x3e   :  { %p4011_p13 = scmp.ne.s32.totalorder %s45_s12, %s4010_s0  ;;  %p4016_p1 = scmp.lt.s32.totalorder %s4010_s0, %s4010_s0 }
  0x40   :  { %p4017_p2 = por %p4016_p1, %p4015_p0 }
  0x42   :  { %p4018_p3 = pnand %p4017_p2, %p4011_p13 }
  0x44   :  { %4021 = shalt.err (!%p4018_p3)
}
  0x45   :  { %50 = dma.hbm_to_vmem [thread:$0]  %s4912_s2, 4096, %s45_s12, [#allocation6], %s4079_s22, %s4079_s22, %s4080_s23  }
  0x46   :  { %s4022_s27 = scalar_lea.hbm %s4915_s5, 512 }
  0x47   :  { %p4023_p4 = scmp.ne.s32.totalorder %s4915_s5, %s4022_s27  ;;  %p4026_p5 = scmp.lt.u32.totalorder %s4022_s27, %s4915_s5 }
  0x49   :  { %p4028_p6 = pnand %p4026_p5, %p4023_p4 }
  0x4b   :  { %4031 = shalt.err (!%p4028_p6)
}
  0x4c   :  { %s4032_s8 = scalar_lea.vmem %s71_s15, 512  ;;  %p4037_p8 = scmp.lt.s32.totalorder %s71_s15, %s71_s15 }
  0x4d   :  { %p4033_p7 = scmp.ne.s32.totalorder %s71_s15, %s4032_s8  ;;  %p4038_p9 = scmp.lt.s32.totalorder %s4032_s8, %s4032_s8 }
  0x4f   :  { %p4039_p10 = por %p4038_p9, %p4037_p8 }
  0x51   :  { %p4040_p11 = pnand %p4039_p10, %p4033_p7 }
  0x53   :  { %4043 = shalt.err (!%p4040_p11)
}
  0x54   :  { %s4083_s2 = smov 256   ;;  %s4084_s22 = smov 16  }
  0x55   :  { %76 = dma.hbm_to_vmem [thread:$0]  %s4915_s5, 512, %s71_s15, [#allocation9], %s4083_s2, %s4083_s2, %s4084_s22  }
  0x56   :  { %4066 = dma.done.wait [#allocation3], 256  }
  0x57   :  { %4067 = vsyncadd [#allocation3], 4294967040 }
  0x58   :  { %4068 = dma.done.wait [#allocation6], 16384  }
  0x59   :  { %4069 = vsyncadd [#allocation6], 4294950912 }
  0x5a   :  { %4070 = dma.done.wait [#allocation9], 2560  }
  0x5b   :  { %4071 = vsyncadd [#allocation9], 4294964736  ;;  %v3615_v0 = vld [vmem:[#allocation5 + $0xc] ss:$24 sps:$4 sm:$0xff]   ;;  %v3617_v1 = vld [vmem:[#allocation5 + $0x8] ss:$24 sps:$4 sm:$0xff]  }
  0x5c   :  { %756 = vmatprep.subr.bf16.mxu1 %v3615_v0  ;;  %v3618_v2 = vld [vmem:[#allocation5 + $0x3c] ss:$24 sps:$4 sm:$0xff]   ;;  %v3622_v4 = vld [vmem:[#allocation5 + $0x38] ss:$24 sps:$4 sm:$0xff]   ;;  %v3624_v6 = vld [vmem:[#allocation5 + $0x6c] ss:$24 sps:$4 sm:$0xff]  }
  0x5d   :  { %757 = vmatpush1.bf16.msra.mxu1 %v3617_v1  ;;  %v3620_v3 = vld [vmem:[#allocation5 + $0x4] ss:$24 sps:$4 sm:$0xff]   ;;  %v3623_v5 = vld [vmem:[#allocation5] ss:$24 sps:$4 sm:$0xff]   ;;  %v3626_v7 = vld [vmem:[#allocation5 + $0x34] ss:$24 sps:$4 sm:$0xff]  }
  0x5e   :  { %758 = vmatprep.subr.bf16.mxu1 %v3618_v2  ;;  %715 = vmatprep.subr.bf16.mxu0 %v3620_v3  ;;  %v3629_v8 = vld [vmem:[#allocation5 + $0x30] ss:$24 sps:$4 sm:$0xff]   ;;  %v3630_v10 = vld [vmem:[#allocation5 + $0x9c] ss:$24 sps:$4 sm:$0xff]   ;;  %v3635_v12 = vld [vmem:[#allocation5 + $0x60] ss:$24 sps:$4 sm:$0xff]  }
  0x5f   :  { %716 = vmatpush1.bf16.msra.mxu0 %v3623_v5  ;;  %v3628_v9 = vld [vmem:[#allocation5 + $0x68] ss:$24 sps:$4 sm:$0xff]   ;;  %v3632_v11 = vld [vmem:[#allocation5 + $0x64] ss:$24 sps:$4 sm:$0xff]   ;;  %v3634_v13 = vld [vmem:[#allocation5 + $0x98] ss:$24 sps:$4 sm:$0xff]  }
  0x60   :  { %717 = vmatprep.subr.bf16.mxu0 %v3626_v7  ;;  %v3638_v14 = vld [vmem:[#allocation5 + $0x94] ss:$24 sps:$4 sm:$0xff]   ;;  %v3640_v16 = vld [vmem:[#allocation5 + $0xc8] ss:$24 sps:$4 sm:$0xff]   ;;  %v3644_v18 = vld [vmem:[#allocation5 + $0xc4] ss:$24 sps:$4 sm:$0xff]  }
  0x61   :  { %759 = vmatpush1.bf16.msra.mxu1 %v3622_v4  ;;  %v3636_v15 = vld [vmem:[#allocation5 + $0xcc] ss:$24 sps:$4 sm:$0xff]   ;;  %v3641_v17 = vld [vmem:[#allocation5 + $0x90] ss:$24 sps:$4 sm:$0xff]   ;;  %v3642_v19 = vld [vmem:[#allocation5 + $0xfc] ss:$24 sps:$4 sm:$0xff]  }
  0x62   :  { %760 = vmatprep.subr.bf16.mxu1 %v3624_v6  ;;  %v3647_v20 = vld [vmem:[#allocation5 + $0xc0] ss:$24 sps:$4 sm:$0xff]   ;;  %v3650_v22 = vld [vmem:[#allocation5 + $0xf4] ss:$24 sps:$4 sm:$0xff]   ;;  %v3653_v25 = vld [vmem:[#allocation5 + $0xf0] ss:$24 sps:$4 sm:$0xff]  }
  0x63   :  { %718 = vmatpush1.bf16.msra.mxu0 %v3629_v8  ;;  %v3646_v21 = vld [vmem:[#allocation5 + $0xf8] ss:$24 sps:$4 sm:$0xff]   ;;  %v3648_v23 = vld [vmem:[#allocation5 + $0x12c] ss:$24 sps:$4 sm:$0xff]   ;;  %v3652_v24 = vld [vmem:[#allocation5 + $0x128] ss:$24 sps:$4 sm:$0xff]  }
  0x64   :  { %719 = vmatprep.subr.bf16.mxu0 %v3632_v11  ;;  %v3656_v26 = vld [vmem:[#allocation5 + $0x124] ss:$24 sps:$4 sm:$0xff]   ;;  %v3659_v28 = vld [vmem:[#allocation5 + $0x120] ss:$24 sps:$4 sm:$0xff]   ;;  %v3662_v30 = vld [vmem:[#allocation5 + $0x154] ss:$24 sps:$4 sm:$0xff]  }
  0x65   :  { %761 = vmatpush1.bf16.msra.mxu1 %v3628_v9  ;;  %v3654_v27 = vld [vmem:[#allocation5 + $0x15c] ss:$24 sps:$4 sm:$0xff]   ;;  %v3658_v29 = vld [vmem:[#allocation5 + $0x158] ss:$24 sps:$4 sm:$0xff]   ;;  %v3660_v31 = vld [vmem:[#allocation5 + $0x18c] ss:$24 sps:$4 sm:$0xff]  }
  0x66   :  { %762 = vmatprep.subr.bf16.mxu1 %v3630_v10  ;;  %v3664_v32 = vld [vmem:[#allocation5 + $0x188] ss:$24 sps:$4 sm:$0xff]   ;;  %v3668_v34 = vld [vmem:[#allocation5 + $0x184] ss:$24 sps:$4 sm:$0xff]   ;;  %v3670_v37 = vld [vmem:[#allocation5 + $0x1b8] ss:$24 sps:$4 sm:$0xff]  }
  0x67   :  { %720 = vmatpush1.bf16.msra.mxu0 %v3635_v12  ;;  %v3665_v33 = vld [vmem:[#allocation5 + $0x150] ss:$24 sps:$4 sm:$0xff]   ;;  %v3666_v35 = vld [vmem:[#allocation5 + $0x1bc] ss:$24 sps:$4 sm:$0xff]   ;;  %v3671_v36 = vld [vmem:[#allocation5 + $0x180] ss:$24 sps:$4 sm:$0xff]  }
  0x68   :  { %721 = vmatprep.subr.bf16.mxu0 %v3638_v14  ;;  %v3674_v38 = vld [vmem:[#allocation5 + $0x1b4] ss:$24 sps:$4 sm:$0xff]   ;;  %v3676_v40 = vld [vmem:[#allocation5 + $0x1e8] ss:$24 sps:$4 sm:$0xff]   ;;  %v3680_v42 = vld [vmem:[#allocation5 + $0x1e4] ss:$24 sps:$4 sm:$0xff]  }
  0x69   :  { %763 = vmatpush1.bf16.msra.mxu1 %v3634_v13  ;;  %v3672_v39 = vld [vmem:[#allocation5 + $0x1ec] ss:$24 sps:$4 sm:$0xff]   ;;  %v3677_v41 = vld [vmem:[#allocation5 + $0x1b0] ss:$24 sps:$4 sm:$0xff]   ;;  %v3678_v43 = vld [vmem:[#allocation5 + $0x21c] ss:$24 sps:$4 sm:$0xff]  }
  0x6a   :  { %764 = vmatprep.subr.bf16.mxu1 %v3636_v15  ;;  %v3682_v44 = vld [vmem:[#allocation5 + $0x218] ss:$24 sps:$4 sm:$0xff]   ;;  %v3684_v47 = vld [vmem:[#allocation5 + $0x24c] ss:$24 sps:$4 sm:$0xff]   ;;  %v3688_v51 = vld [vmem:[#allocation5 + $0x248] ss:$24 sps:$4 sm:$0xff]  }
  0x6b   :  { %722 = vmatpush1.bf16.msra.mxu0 %v3641_v17  ;;  %v3683_v45 = vld [vmem:[#allocation5 + $0x1e0] ss:$24 sps:$4 sm:$0xff]   ;;  %v227_v46 = vld [vmem:[#allocation2] sm:$0xff]  ;;  %v3692_v52 = vld [vmem:[#allocation5 + $0x244] ss:$24 sps:$4 sm:$0xff]   ;;  %v4917_v3 = vmov 0.0  }
  0x6c   :  { %723 = vmatprep.subr.bf16.mxu0 %v3644_v18  ;;  %v3686_v48 = vld [vmem:[#allocation5 + $0x214] ss:$24 sps:$4 sm:$0xff]   ;;  %v3149_v49 = vcombine.high %v227_v46, %v227_v46  ;;  %v3689_v50 = vld [vmem:[#allocation5 + $0x210] ss:$24 sps:$4 sm:$0xff]   ;;  %v3695_v54 = vld [vmem:[#allocation5 + $0x240] ss:$24 sps:$4 sm:$0xff]   ;;  %v4211_v2 = vcombine.low %v227_v46, %v227_v46 }
  0x6d   :  { %765 = vmatpush1.bf16.msra.mxu1 %v3640_v16  ;;  %v3690_v53 = vld [vmem:[#allocation5 + $0x27c] ss:$24 sps:$4 sm:$0xff]   ;;  %v3694_v55 = vld [vmem:[#allocation5 + $0x278] ss:$24 sps:$4 sm:$0xff]   ;;  %v3696_v57 = vld [vmem:[#allocation5 + $0x2ac] ss:$24 sps:$4 sm:$0xff]  }
  0x6e   :  { %766 = vmatprep.subr.bf16.mxu1 %v3642_v19  ;;  %788 = vmatprep.mubr.bf16.mxu1 %v3149_v49  ;;  %v3698_v56 = vld [vmem:[#allocation5 + $0x274] ss:$24 sps:$4 sm:$0xff]   ;;  %v4198_v58 = vld [vmem:[#allocation5 + $0x270] ss:$24 sps:$4 sm:$0xff]   ;;  %v4200_v60 = vld [vmem:[#allocation5 + $0x2a4] ss:$24 sps:$4 sm:$0xff]  }
  0x6f   :  { %724 = vmatpush1.bf16.msra.mxu0 %v3647_v20  ;;  %747 = vmatprep.mubr.bf16.mxu0 %v3149_v49  ;;  %v3700_v59 = vld [vmem:[#allocation5 + $0x2a8] ss:$24 sps:$4 sm:$0xff]   ;;  %v3702_v61 = vld [vmem:[#allocation5 + $0x2dc] ss:$24 sps:$4 sm:$0xff]   ;;  %v3706_v63 = vld [vmem:[#allocation5 + $0x2d8] ss:$24 sps:$4 sm:$0xff]  }
  0x70   :  { %725 = vmatprep.subr.bf16.mxu0 %v3650_v22  ;;  %v4202_v62 = vld [vmem:[#allocation5 + $0x2a0] ss:$24 sps:$4 sm:$0xff]   ;;  %v4204_v0 = vld [vmem:[#allocation5 + $0x2d4] ss:$24 sps:$4 sm:$0xff]   ;;  %v4208_v1 = vld [vmem:[#allocation5 + $0x2d0] ss:$24 sps:$4 sm:$0xff]  }
  0x71   :  { %767 = vmatpush1.bf16.msra.mxu1 %v3646_v21  ;;  %vm4086_vm0 = vmmov 0   ;;  %vm841_vm1 = vcmask 261120   ;;  %s4087_s5 = smov 96   ;;  %v4239_v15 = vld [vmem:[#allocation5 + $0x10] ss:$24 sps:$4 sm:$0xff]   ;;  %vm889_vm3 = vcmask 64512  }
  0x72   :  { %768 = vmatprep.subr.bf16.mxu1 %v3648_v23  ;;  %v4241_v16 = vld [vmem:[#allocation5 + $0x14] ss:$24 sps:$4 sm:$0xff]   ;;  %v4243_v17 = vld [vmem:[#allocation5 + $0x44] ss:$24 sps:$4 sm:$0xff]   ;;  %v4247_v18 = vld [vmem:[#allocation5 + $0x40] ss:$24 sps:$4 sm:$0xff]  }
  0x73   :  { %726 = vmatpush1.bf16.msra.mxu0 %v3653_v25  ;;  %v4250_v19 = vld [vmem:[#allocation5 + $0x74] ss:$24 sps:$4 sm:$0xff]   ;;  %v4253_v20 = vld [vmem:[#allocation5 + $0x70] ss:$24 sps:$4 sm:$0xff]   ;;  %v4256_v21 = vld [vmem:[#allocation5 + $0xa4] ss:$24 sps:$4 sm:$0xff]  }
  0x74   :  { %727 = vmatprep.subr.bf16.mxu0 %v3656_v26  ;;  %v4259_v22 = vld [vmem:[#allocation5 + $0xa0] ss:$24 sps:$4 sm:$0xff]   ;;  %v4262_v23 = vld [vmem:[#allocation5 + $0xd4] ss:$24 sps:$4 sm:$0xff]   ;;  %v4268_v25 = vld [vmem:[#allocation5 + $0x104] ss:$24 sps:$4 sm:$0xff]  }
  0x75   :  { %769 = vmatpush1.bf16.msra.mxu1 %v3652_v24  ;;  %v4265_v24 = vld [vmem:[#allocation5 + $0xd0] ss:$24 sps:$4 sm:$0xff]   ;;  %v4271_v26 = vld [vmem:[#allocation5 + $0x100] ss:$24 sps:$4 sm:$0xff]   ;;  %vm907_vm4 = vcmask 1043456   ;;  %s4088_s4 = smov 64  }
  0x76   :  { %770 = vmatprep.subr.bf16.mxu1 %v3654_v27  ;;  %v4274_v27 = vld [vmem:[#allocation5 + $0x134] ss:$24 sps:$4 sm:$0xff]   ;;  %v4331_v46 = vld [vmem:[#allocation5 + $0x2e0] ss:$24 sps:$4 sm:$0xff]   ;;  %s4089_s10 = smov 32   ;;  %vm1777_vm5 = vcmask 523264  }
  0x77   :  { %728 = vmatpush1.bf16.msra.mxu0 %v3659_v28  ;;  %v4277_v28 = vld [vmem:[#allocation5 + $0x130] ss:$24 sps:$4 sm:$0xff]   ;;  %vm1779_vm6 = vcmask 785408  }
  0x78   :  { %729 = vmatprep.subr.bf16.mxu0 %v3662_v30  ;;  %v4283_v30 = vld [vmem:[#allocation5 + $0x160] ss:$24 sps:$4 sm:$0xff]  }
  0x79   :  { %771 = vmatpush1.bf16.msra.mxu1 %v3658_v29  ;;  %v4280_v29 = vld [vmem:[#allocation5 + $0x164] ss:$24 sps:$4 sm:$0xff]  }
  0x7a   :  { %772 = vmatprep.subr.bf16.mxu1 %v3660_v31  ;;  %v4286_v31 = vld [vmem:[#allocation5 + $0x194] ss:$24 sps:$4 sm:$0xff]  }
  0x7b   :  { %730 = vmatpush1.bf16.msra.mxu0 %v3665_v33  ;;  %v4292_v33 = vld [vmem:[#allocation5 + $0x1c4] ss:$24 sps:$4 sm:$0xff]  }
  0x7c   :  { %731 = vmatprep.subr.bf16.mxu0 %v3668_v34  ;;  %v4295_v34 = vld [vmem:[#allocation5 + $0x1c0] ss:$24 sps:$4 sm:$0xff]  }
  0x7d   :  { %773 = vmatpush1.bf16.msra.mxu1 %v3664_v32  ;;  %v4289_v32 = vld [vmem:[#allocation5 + $0x190] ss:$24 sps:$4 sm:$0xff]  }
  0x7e   :  { %774 = vmatprep.subr.bf16.mxu1 %v3666_v35  ;;  %v4298_v35 = vld [vmem:[#allocation5 + $0x1f4] ss:$24 sps:$4 sm:$0xff]  }
  0x7f   :  { %732 = vmatpush1.bf16.msra.mxu0 %v3671_v36  ;;  %v4301_v36 = vld [vmem:[#allocation5 + $0x1f0] ss:$24 sps:$4 sm:$0xff]  }
  0x80   :  { %733 = vmatprep.subr.bf16.mxu0 %v3674_v38  ;;  %v4307_v38 = vld [vmem:[#allocation5 + $0x220] ss:$24 sps:$4 sm:$0xff]  }
  0x81   :  { %775 = vmatpush1.bf16.msra.mxu1 %v3670_v37  ;;  %v4304_v37 = vld [vmem:[#allocation5 + $0x224] ss:$24 sps:$4 sm:$0xff]  }
  0x82   :  { %776 = vmatprep.subr.bf16.mxu1 %v3672_v39  ;;  %v4310_v39 = vld [vmem:[#allocation5 + $0x254] ss:$24 sps:$4 sm:$0xff]  }
  0x83   :  { %734 = vmatpush1.bf16.msra.mxu0 %v3677_v41  ;;  %v4316_v41 = vld [vmem:[#allocation5 + $0x284] ss:$24 sps:$4 sm:$0xff]  }
  0x84   :  { %735 = vmatprep.subr.bf16.mxu0 %v3680_v42  ;;  %v4319_v42 = vld [vmem:[#allocation5 + $0x280] ss:$24 sps:$4 sm:$0xff]  }
  0x85   :  { %777 = vmatpush1.bf16.msra.mxu1 %v3676_v40  ;;  %v4313_v40 = vld [vmem:[#allocation5 + $0x250] ss:$24 sps:$4 sm:$0xff]  }
  0x86   :  { %778 = vmatprep.subr.bf16.mxu1 %v3678_v43  ;;  %v4322_v43 = vld [vmem:[#allocation5 + $0x2b4] ss:$24 sps:$4 sm:$0xff]  }
  0x87   :  { %736 = vmatpush1.bf16.msra.mxu0 %v3683_v45  ;;  %v4328_v45 = vld [vmem:[#allocation5 + $0x2e4] ss:$24 sps:$4 sm:$0xff]  }
  0x88   :  { %737 = vmatprep.subr.bf16.mxu0 %v3686_v48 }
  0x89   :  { %779 = vmatpush1.bf16.msra.mxu1 %v3682_v44  ;;  %v4325_v44 = vld [vmem:[#allocation5 + $0x2b0] ss:$24 sps:$4 sm:$0xff]  }
  0x8a   :  { %780 = vmatprep.subr.bf16.mxu1 %v3684_v47  ;;  %v93_v47 = vlaneseq }
  0x8b   :  { %738 = vmatpush1.bf16.msra.mxu0 %v3689_v50  ;;  %v4933_v50 = vmov 0 }
  0x8c   :  { %739 = vmatprep.subr.bf16.mxu0 %v3692_v52  ;;  %v4336_v48 = vshrl.u32 %v93_v47, 7 }
  0x8d   :  { %781 = vmatpush1.bf16.msra.mxu1 %v3688_v51 }
  0x8e   :  { %782 = vmatprep.subr.bf16.mxu1 %v3690_v53 }
  0x8f   :  { %740 = vmatpush1.bf16.msra.mxu0 %v3695_v54 }
  0x90   :  { %741 = vmatprep.subr.bf16.mxu0 %v3698_v56 }
  0x91   :  { %783 = vmatpush1.bf16.msra.mxu1 %v3694_v55 }
  0x92   :  { %784 = vmatprep.subr.bf16.mxu1 %v3696_v57 }
  0x93   :  { %742 = vmatpush1.bf16.msra.mxu0 %v4198_v58 }
  0x94   :  { %743 = vmatprep.subr.bf16.mxu0 %v4200_v60 }
  0x95   :  { %785 = vmatpush1.bf16.msra.mxu1 %v3700_v59 }
  0x96   :  { %786 = vmatprep.subr.bf16.mxu1 %v3702_v61 }
  0x97   :  { %744 = vmatpush1.bf16.msra.mxu0 %v4202_v62 }
  0x98   :  { %745 = vmatprep.subr.bf16.mxu0 %v4204_v0 }
  0x99   :  { %787 = vmatpush1.bf16.msra.mxu1 %v3706_v63 }
  0x9a   :  { %3376 = vmatprep.subr.bf16.mxu1 %v4917_v3 }
  0x9b   :  { %746 = vmatpush1.bf16.msra.mxu0 %v4208_v1 }
  0x9c   :  { %789 = vmatmul.mubr.bf16.vlgmr.msra.gmra.mrb[0].mxu1 %v4211_v2  ;;  %797 = vmatprep.subr.bf16.mxu0 %v4241_v16 }
  0x9d   :  { %3378 = vmatprep.mubr.msk.bf16.mxu1 %vm4086_vm0, %v4917_v3 }
  0x9e   :  { %748 = vmatmul.mubr.bf16.vlgmr.msra.gmra.mrb[0].mxu0 %v4211_v2 }
  0x9f   :  { %829 = vmatprep.mubr.bf16.mxu0 %v3149_v49  ;;  %798 = vmatpush1.bf16.msra.mxu0 %v4239_v15  ;;  %v96_v49 = vand.u32 127, %v93_v47 }
  0xa0   :  { %799 = vmatprep.subr.bf16.mxu0 %v4243_v17 }
  0xa1   :  { %vm4339_vm2 = vcmp.le.s32.totalorder %v96_v49, %v4336_v48  ;;  %v901_v49 = vld [vmem:[#allocation8] sm:$0xff] }
  0xa2   :  { %v4934_v50 = vsel %vm4339_vm2, 4294967295, %v4933_v50 }
  0xa3   :  { %800 = vmatpush1.bf16.msra.mxu0 %v4247_v18  ;;  %4935 = vst [vmem:[#allocation16_spill] sm:$0xff] %v4934_v50  ;;  %v4608_v50 = vld [vmem:[#allocation7 + $0xe4] ss:$8 sps:$4 sm:$0xff]  }
  0xa4   :  { %801 = vmatprep.subr.bf16.mxu0 %v4250_v19  ;;  %4946 = vst [vmem:[#allocation27_spill] sm:$0xff] %v4608_v50 }
  0xa7   :  { %802 = vmatpush1.bf16.msra.mxu0 %v4253_v20 }
  0xa8   :  { %803 = vmatprep.subr.bf16.mxu0 %v4256_v21 }
  0xab   :  { %804 = vmatpush1.bf16.msra.mxu0 %v4259_v22 }
  0xac   :  { %805 = vmatprep.subr.bf16.mxu0 %v4262_v23 }
  0xaf   :  { %806 = vmatpush1.bf16.msra.mxu0 %v4265_v24 }
  0xb0   :  { %807 = vmatprep.subr.bf16.mxu0 %v4268_v25 }
  0xb3   :  { %808 = vmatpush1.bf16.msra.mxu0 %v4271_v26 }
  0xb4   :  { %809 = vmatprep.subr.bf16.mxu0 %v4274_v27 }
  0xb7   :  { %810 = vmatpush1.bf16.msra.mxu0 %v4277_v28 }
  0xb8   :  { %811 = vmatprep.subr.bf16.mxu0 %v4280_v29 }
  0xbb   :  { %812 = vmatpush1.bf16.msra.mxu0 %v4283_v30 }
  0xbc   :  { %813 = vmatprep.subr.bf16.mxu0 %v4286_v31 }
  0xbf   :  { %814 = vmatpush1.bf16.msra.mxu0 %v4289_v32 }
  0xc0   :  { %815 = vmatprep.subr.bf16.mxu0 %v4292_v33 }
  0xc3   :  { %816 = vmatpush1.bf16.msra.mxu0 %v4295_v34 }
  0xc4   :  { %817 = vmatprep.subr.bf16.mxu0 %v4298_v35 }
  0xc7   :  { %818 = vmatpush1.bf16.msra.mxu0 %v4301_v36 }
  0xc8   :  { %819 = vmatprep.subr.bf16.mxu0 %v4304_v37 }
  0xcb   :  { %820 = vmatpush1.bf16.msra.mxu0 %v4307_v38 }
  0xcc   :  { %821 = vmatprep.subr.bf16.mxu0 %v4310_v39 }
  0xcf   :  { %822 = vmatpush1.bf16.msra.mxu0 %v4313_v40 }
  0xd0   :  { %823 = vmatprep.subr.bf16.mxu0 %v4316_v41 }
  0xd3   :  { %824 = vmatpush1.bf16.msra.mxu0 %v4319_v42 }
  0xd4   :  { %825 = vmatprep.subr.bf16.mxu0 %v4322_v43 }
  0xd7   :  { %826 = vmatpush1.bf16.msra.mxu0 %v4325_v44 }
  0xd8   :  { %827 = vmatprep.subr.bf16.mxu0 %v4328_v45 }
  0xdb   :  { %828 = vmatpush1.bf16.msra.mxu0 %v4331_v46 }
  0xde   :  { %830 = vmatmul.mubr.bf16.vlgmr.msra.gmra.mrb[4].mxu0 %v4211_v2 }
 0x16f   :  { %v790_v4 = vpop.f32.mrb[0].mxu1 }
 0x170   :  { %v4220_v5 = vpack.c.bf16 %v790_v4, %v790_v4  ;;  %v4222_v6 = vpop.f32.mrb[1].mxu1 }
 0x171   :  { %v794_v7 = vpop.f32.mrb[2].mxu1  ;;  %v749_v10 = vpop.f32.mrb[0].mxu0 }
 0x172   :  { %955 = vrot.lane.b32.xlu1 %v4220_v5, %s4087_s5  ;;  %v795_v8 = vpop.f32.mrb[3].mxu1  ;;  %v846_v9 = vsel %vm841_vm1, %v4220_v5, 0  ;;  %v4228_v11 = vpack.c.bf16 %v749_v10, %v749_v10  ;;  %v4230_v12 = vpop.f32.mrb[1].mxu0 }
 0x173   :  { %3377 = vmatpush3.bf16.xpose.msra.mxu1 %v846_v9  ;;  %v753_v13 = vpop.f32.mrb[2].mxu0 }
 0x174   :  { %3382 = vmatprep.subr.bf16.mxu1 %v4917_v3  ;;  %v754_v14 = vpop.f32.mrb[3].mxu0 }
 0x176   :  { %952 = vrot.lane.b32.xlu1 %v4228_v11, %s4087_s5 }
 0x17a   :  { %3379 = vmatmul.mubr.msk.bf16.vlgmr.msra.gmra.mrb[4].mxu1 %vm841_vm1, %v4228_v11 }
 0x17b   :  { %3384 = vmatprep.mubr.msk.bf16.mxu1 %vm4086_vm0, %v4917_v3 }
 0x1b1   :  { %v831_v4 = vpop.f32.mrb[4].mxu0 }
 0x1b2   :  { %v4347_v7 = vpop.f32.mrb[5].mxu0  ;;  %v4349_v9 = vpack.c.bf16 %v831_v4, %v831_v4 }
 0x1b3   :  { %v835_v8 = vpop.f32.mrb[6].mxu0 }
 0x1b4   :  { %v836_v10 = vpop.f32.mrb[7].mxu0  ;;  %v909_v13 = vsel %vm907_vm4, %v4349_v9, 0 }
 0x1b5   :  { %3383 = vmatpush3.bf16.msra.mxu1 %v909_v13 }
 0x1b6   :  { %3388 = vmatprep.subr.bf16.mxu1 %v4917_v3 }
 0x24d   :  { %v882_v51 = vpop.f32.mrb[4].mxu1 }
 0x24e   :  { %v888_v52 = vsel %vm4339_vm2, %v882_v51, -inf  ;;  %v3380_v53 = vpop.f32.mrb[5].mxu1 }
 0x24f   :  { %v885_v54 = vpop.f32.mrb[6].mxu1  ;;  %v890_v55 = vsel %vm889_vm3, %v888_v52, -inf  ;;  %v956_v53 = vpop.permute.xlu1 %955 }
 0x250   :  { %891 = vmax.xlane.f32.xlu0 %v890_v55  ;;  %v3381_v56 = vpop.f32.mrb[7].mxu1  ;;  %v961_v55 = vsel %vm841_vm1, %v956_v53, 0 }
 0x253   :  { %v953_v56 = vpop.permute.xlu1 %952 }
 0x2dd   :  { %v892_v57 = vpop.xlane.xlu0 %891 }
 0x2de   :  { %v893_v59 = vsub.f32 %v888_v52, %v892_v57 }
 0x2e0   :  { %v894_v61 = vmul.f32 1.442695, %v893_v59 }
 0x2e2   :  { %3811 = vpow2.f32 %v894_v61 }
 0x2ec   :  { %v3812_v63 = vpop.eup %3811 }
 0x2ed   :  { %v896_v2 = vsel %vm889_vm3, %v3812_v63, 0.0 }
 0x2ee   :  { %897 = vadd.xlane.f32.xlu0 %v896_v2 }
 0x37b   :  { %v898_v14 = vpop.xlane.xlu0 %897 }
 0x37c   :  { %3813 = vrcp.f32 %v898_v14 }
 0x386   :  { %v3814_v47 = vpop.eup %3813 }
 0x387   :  { %v900_v51 = vmul.f32 %v3814_v47, %v3812_v63 }
 0x389   :  { %v902_v52 = vmul.f32 %v901_v49, %v900_v51 }
 0x38b   :  { %v903_v54 = vpack.c.bf16 %v902_v52, %v902_v52 }
 0x38d   :  { %3385 = vmatmul.mubr.msk.bf16.vlgmr.msra.gmra.mrb[8].mxu1 %vm889_vm3, %v903_v54 }
 0x38e   :  { %3389 = vmatpush3.bf16.xpose.msra.mxu1 %v961_v55  ;;  %3390 = vmatprep.mubr.msk.bf16.mxu1 %vm4086_vm0, %v4917_v3 }
 0x38f   :  { %3394 = vmatprep.subr.bf16.mxu1 %v4917_v3 }
 0x395   :  { %3391 = vmatmul.mubr.msk.bf16.vlgmr.msra.gmra.mrb[12].mxu1 %vm841_vm1, %v953_v56 }
 0x396   :  { %3396 = vmatprep.mubr.msk.bf16.mxu1 %vm4086_vm0, %v4917_v3 }
 0x460   :  { %v4362_v57 = vpop.f32.mrb[8].mxu1 }
 0x461   :  { %v3386_v59 = vpop.f32.mrb[9].mxu1 }
 0x462   :  { %v948_v61 = vpop.f32.mrb[10].mxu1 }
 0x463   :  { %v3387_v63 = vpop.f32.mrb[11].mxu1  ;;  %v1016_v61 = vld [vmem:[#allocation8 + $0x8] sm:$0xff] }
 0x468   :  { %v997_v2 = vpop.f32.mrb[12].mxu1 }
 0x469   :  { %v1003_v4 = vsel %vm4339_vm2, %v997_v2, -inf  ;;  %v3392_v8 = vpop.f32.mrb[13].mxu1 }
 0x46a   :  { %v1000_v10 = vpop.f32.mrb[14].mxu1  ;;  %v1004_v13 = vsel %vm889_vm3, %v1003_v4, -inf }
 0x46b   :  { %1005 = vmax.xlane.f32.xlu0 %v1004_v13  ;;  %v3393_v14 = vpop.f32.mrb[15].mxu1 }
 0x481   :  { %1020 = vrot.lane.b32.xlu0 %v4349_v9, %s4087_s5 }
 0x485   :  { %1070 = vrot.lane.b32.xlu0 %v4220_v5, %s4088_s4 }
 0x489   :  { %1068 = vrot.lane.b32.xlu0 %v4228_v11, %s4088_s4 }
 0x4f8   :  { %v1006_v47 = vpop.xlane.xlu0 %1005 }
 0x4f9   :  { %v1007_v49 = vsub.f32 %v1003_v4, %v1006_v47 }
 0x4fb   :  { %v1008_v51 = vmul.f32 1.442695, %v1007_v49 }
 0x4fc   :  { %v1021_v52 = vpop.permute.xlu0 %1020 }
 0x4fd   :  { %3815 = vpow2.f32 %v1008_v51  ;;  %v1026_v53 = vsel %vm907_vm4, %v1021_v52, 0 }
 0x4fe   :  { %3395 = vmatpush3.bf16.msra.mxu1 %v1026_v53 }
 0x4ff   :  { %3400 = vmatprep.subr.bf16.mxu1 %v4917_v3 }
 0x500   :  { %v1071_v4 = vpop.permute.xlu0 %1070 }
 0x501   :  { %v1076_v10 = vsel %vm841_vm1, %v1071_v4, 0 }
 0x504   :  { %v1069_v14 = vpop.permute.xlu0 %1068 }
 0x507   :  { %v3816_v54 = vpop.eup %3815 }
 0x508   :  { %v1010_v55 = vsel %vm889_vm3, %v3816_v54, 0.0 }
 0x509   :  { %1011 = vadd.xlane.f32.xlu1 %v1010_v55 }
 0x51a   :  { %1134 = vrot.lane.b32.xlu1 %v4349_v9, %s4088_s4 }
 0x596   :  { %v1012_v56 = vpop.xlane.xlu1 %1011 }
 0x597   :  { %3817 = vrcp.f32 %v1012_v56 }
 0x59a   :  { %v1135_v13 = vpop.permute.xlu1 %1134 }
 0x59b   :  { %v1140_v47 = vsel %vm907_vm4, %v1135_v13, 0 }
 0x5a1   :  { %v3818_v59 = vpop.eup %3817 }
 0x5a2   :  { %v1014_v63 = vmul.f32 %v3818_v59, %v3816_v54 }
 0x5a4   :  { %v1017_v2 = vmul.f32 %v1016_v61, %v1014_v63 }
 0x5a6   :  { %v1018_v8 = vpack.c.bf16 %v1017_v2, %v1017_v2 }
 0x5a8   :  { %3397 = vmatmul.mubr.msk.bf16.vlgmr.msra.gmra.mrb[16].mxu1 %vm889_vm3, %v1018_v8 }
 0x5a9   :  { %3401 = vmatpush3.bf16.xpose.msra.mxu1 %v1076_v10  ;;  %3402 = vmatprep.mubr.msk.bf16.mxu1 %vm4086_vm0, %v4917_v3 }
 0x5aa   :  { %3406 = vmatprep.subr.bf16.mxu1 %v4917_v3 }
 0x5b0   :  { %3403 = vmatmul.mubr.msk.bf16.vlgmr.msra.gmra.mrb[20].mxu1 %vm841_vm1, %v1069_v14 }
 0x5b1   :  { %3407 = vmatpush3.bf16.msra.mxu1 %v1140_v47  ;;  %3408 = vmatprep.mubr.msk.bf16.mxu1 %vm4086_vm0, %v4917_v3 }
 0x5b2   :  { %3412 = vmatprep.subr.bf16.mxu1 %v4917_v3 }
 0x67b   :  { %v4388_v49 = vpop.f32.mrb[16].mxu1 }
 0x67c   :  { %v3398_v51 = vpop.f32.mrb[17].mxu1 }
 0x67d   :  { %v1065_v52 = vpop.f32.mrb[18].mxu1  ;;  %v1131_v51 = vld [vmem:[#allocation8 + $0x10] sm:$0xff] }
 0x67e   :  { %v3399_v53 = vpop.f32.mrb[19].mxu1 }
 0x683   :  { %v1112_v54 = vpop.f32.mrb[20].mxu1 }
 0x684   :  { %v1118_v55 = vsel %vm4339_vm2, %v1112_v54, -inf  ;;  %v3404_v56 = vpop.f32.mrb[21].mxu1 }
 0x685   :  { %v1115_v59 = vpop.f32.mrb[22].mxu1  ;;  %v1119_v61 = vsel %vm889_vm3, %v1118_v55, -inf }
 0x686   :  { %1120 = vmax.xlane.f32.xlu0 %v1119_v61  ;;  %v3405_v63 = vpop.f32.mrb[23].mxu1 }
 0x713   :  { %v1121_v2 = vpop.xlane.xlu0 %1120 }
 0x714   :  { %v1122_v4 = vsub.f32 %v1118_v55, %v1121_v2 }
 0x716   :  { %v1123_v8 = vmul.f32 1.442695, %v1122_v4 }
 0x718   :  { %3819 = vpow2.f32 %v1123_v8 }
 0x722   :  { %v3820_v10 = vpop.eup %3819 }
 0x723   :  { %v1125_v13 = vsel %vm889_vm3, %v3820_v10, 0.0 }
 0x724   :  { %1126 = vadd.xlane.f32.xlu1 %v1125_v13 }
 0x735   :  { %1184 = vrot.lane.b32.xlu1 %v4220_v5, %s4089_s10 }
 0x739   :  { %1182 = vrot.lane.b32.xlu1 %v4228_v11, %s4089_s10 }
 0x7b1   :  { %v1127_v14 = vpop.xlane.xlu1 %1126 }
 0x7b2   :  { %3821 = vrcp.f32 %v1127_v14 }
 0x7b5   :  { %v1185_v54 = vpop.permute.xlu1 %1184 }
 0x7b6   :  { %v1190_v56 = vsel %vm841_vm1, %v1185_v54, 0 }
 0x7b9   :  { %v1183_v5 = vpop.permute.xlu1 %1182 }
 0x7bc   :  { %v3822_v47 = vpop.eup %3821 }
 0x7bd   :  { %v1129_v52 = vmul.f32 %v3822_v47, %v3820_v10 }
 0x7bf   :  { %v1132_v53 = vmul.f32 %v1131_v51, %v1129_v52 }
 0x7c1   :  { %v1133_v55 = vpack.c.bf16 %v1132_v53, %v1132_v53 }
 0x7c3   :  { %3409 = vmatmul.mubr.msk.bf16.vlgmr.msra.gmra.mrb[24].mxu1 %vm889_vm3, %v1133_v55 }
 0x7c4   :  { %3413 = vmatpush3.bf16.xpose.msra.mxu1 %v1190_v56  ;;  %3414 = vmatprep.mubr.msk.bf16.mxu1 %vm4086_vm0, %v4917_v3 }
 0x7c5   :  { %3418 = vmatprep.subr.bf16.mxu1 %v4917_v3 }
 0x7cb   :  { %3415 = vmatmul.mubr.msk.bf16.vlgmr.msra.gmra.mrb[28].mxu1 %vm841_vm1, %v1183_v5 }
 0x7cc   :  { %3420 = vmatprep.mubr.msk.bf16.mxu1 %vm4086_vm0, %v4917_v3 }
 0x896   :  { %v4406_v11 = vpop.f32.mrb[24].mxu1 }
 0x897   :  { %v3410_v59 = vpop.f32.mrb[25].mxu1 }
 0x898   :  { %v1179_v61 = vpop.f32.mrb[26].mxu1 }
 0x899   :  { %v3411_v63 = vpop.f32.mrb[27].mxu1  ;;  %v1245_v61 = vld [vmem:[#allocation8 + $0x18] sm:$0xff] }
 0x89e   :  { %v1226_v2 = vpop.f32.mrb[28].mxu1 }
 0x89f   :  { %v1232_v4 = vsel %vm4339_vm2, %v1226_v2, -inf  ;;  %v3416_v8 = vpop.f32.mrb[29].mxu1 }
 0x8a0   :  { %v1229_v10 = vpop.f32.mrb[30].mxu1  ;;  %v1233_v13 = vsel %vm889_vm3, %v1232_v4, -inf }
 0x8a1   :  { %1234 = vmax.xlane.f32.xlu0 %v1233_v13  ;;  %v3417_v14 = vpop.f32.mrb[31].mxu1  ;;  %v4428_v10 = vpack.c.bf16 %v4347_v7, %v4347_v7 }
 0x8a3   :  { %v1365_v13 = vsel %vm907_vm4, %v4428_v10, 0 }
 0x8b7   :  { %1248 = vrot.lane.b32.xlu0 %v4349_v9, %s4089_s10  ;;  %v4418_v9 = vpack.c.bf16 %v4222_v6, %v4222_v6  ;;  %v4432_v6 = vpack.c.bf16 %v4230_v12, %v4230_v12 }
 0x8b9   :  { %v1303_v8 = vsel %vm841_vm1, %v4418_v9, 0 }
 0x92e   :  { %v1235_v47 = vpop.xlane.xlu0 %1234 }
 0x92f   :  { %v1236_v51 = vsub.f32 %v1232_v4, %v1235_v47 }
 0x931   :  { %v1237_v52 = vmul.f32 1.442695, %v1236_v51 }
 0x932   :  { %v1249_v53 = vpop.permute.xlu0 %1248 }
 0x933   :  { %3823 = vpow2.f32 %v1237_v52  ;;  %v1254_v54 = vsel %vm907_vm4, %v1249_v53, 0 }
 0x934   :  { %3419 = vmatpush3.bf16.msra.mxu1 %v1254_v54 }
 0x935   :  { %3424 = vmatprep.subr.bf16.mxu1 %v4917_v3 }
 0x93d   :  { %v3824_v55 = vpop.eup %3823 }
 0x93e   :  { %v1239_v56 = vsel %vm889_vm3, %v3824_v55, 0.0 }
 0x93f   :  { %1240 = vadd.xlane.f32.xlu1 %v1239_v56 }
 0x9cc   :  { %v1241_v5 = vpop.xlane.xlu1 %1240 }
 0x9cd   :  { %3825 = vrcp.f32 %v1241_v5 }
 0x9d7   :  { %v3826_v59 = vpop.eup %3825 }
 0x9d8   :  { %v1243_v63 = vmul.f32 %v3826_v59, %v3824_v55 }
 0x9da   :  { %v1246_v2 = vmul.f32 %v1245_v61, %v1243_v63 }
 0x9dc   :  { %v1247_v4 = vpack.c.bf16 %v1246_v2, %v1246_v2 }
 0x9de   :  { %3421 = vmatmul.mubr.msk.bf16.vlgmr.msra.gmra.mrb[32].mxu1 %vm889_vm3, %v1247_v4 }
 0x9df   :  { %3425 = vmatpush3.bf16.xpose.msra.mxu1 %v1303_v8  ;;  %3426 = vmatprep.mubr.msk.bf16.mxu1 %vm4086_vm0, %v4917_v3 }
 0x9e0   :  { %3430 = vmatprep.subr.bf16.mxu1 %v4917_v3 }
 0x9e6   :  { %3427 = vmatmul.mubr.msk.bf16.vlgmr.msra.gmra.mrb[36].mxu1 %vm841_vm1, %v4432_v6 }
 0x9e7   :  { %3431 = vmatpush3.bf16.msra.mxu1 %v1365_v13  ;;  %3432 = vmatprep.mubr.msk.bf16.mxu1 %vm4086_vm0, %v4917_v3  ;;  %v1358_v13 = vld [vmem:[#allocation8 + $0x20] sm:$0xff] }
 0x9e8   :  { %3436 = vmatprep.subr.bf16.mxu1 %v4917_v3 }
 0xab1   :  { %v4441_v14 = vpop.f32.mrb[32].mxu1 }
 0xab2   :  { %v3422_v7 = vpop.f32.mrb[33].mxu1 }
 0xab3   :  { %v1293_v47 = vpop.f32.mrb[34].mxu1 }
 0xab4   :  { %v3423_v51 = vpop.f32.mrb[35].mxu1 }
 0xab9   :  { %v1339_v52 = vpop.f32.mrb[36].mxu1 }
 0xaba   :  { %v1345_v12 = vsel %vm4339_vm2, %v1339_v52, -inf  ;;  %v3428_v53 = vpop.f32.mrb[37].mxu1 }
 0xabb   :  { %v1342_v54 = vpop.f32.mrb[38].mxu1  ;;  %v1346_v55 = vsel %vm889_vm3, %v1345_v12, -inf }
 0xabc   :  { %1347 = vmax.xlane.f32.xlu0 %v1346_v55  ;;  %v3429_v56 = vpop.f32.mrb[39].mxu1 }
 0xad2   :  { %1408 = vrot.lane.b32.xlu0 %v4432_v6, %s4087_s5 }
 0xb49   :  { %v1348_v5 = vpop.xlane.xlu0 %1347 }
 0xb4a   :  { %v1349_v59 = vsub.f32 %v1345_v12, %v1348_v5 }
 0xb4c   :  { %v1350_v61 = vmul.f32 1.442695, %v1349_v59 }
 0xb4d   :  { %v1409_v12 = vpop.permute.xlu0 %1408 }
 0xb4e   :  { %3827 = vpow2.f32 %v1350_v61 }
 0xb58   :  { %v3828_v63 = vpop.eup %3827 }
 0xb59   :  { %v1352_v2 = vsel %vm889_vm3, %v3828_v63, 0.0 }
 0xb5a   :  { %1353 = vadd.xlane.f32.xlu1 %v1352_v2 }
 0xb6b   :  { %1411 = vrot.lane.b32.xlu1 %v4418_v9, %s4087_s5 }
 0xbe7   :  { %v1354_v4 = vpop.xlane.xlu1 %1353 }
 0xbe8   :  { %3829 = vrcp.f32 %v1354_v4 }
 0xbeb   :  { %v1412_v51 = vpop.permute.xlu1 %1411 }
 0xbec   :  { %v1417_v53 = vsel %vm841_vm1, %v1412_v51, 0 }
 0xbf2   :  { %v3830_v8 = vpop.eup %3829 }
 0xbf3   :  { %v1356_v7 = vmul.f32 %v3830_v8, %v3828_v63 }
 0xbf5   :  { %v1359_v47 = vmul.f32 %v1358_v13, %v1356_v7 }
 0xbf7   :  { %v1360_v52 = vpack.c.bf16 %v1359_v47, %v1359_v47 }
 0xbf9   :  { %3433 = vmatmul.mubr.msk.bf16.vlgmr.msra.gmra.mrb[40].mxu1 %vm889_vm3, %v1360_v52 }
 0xbfa   :  { %3437 = vmatpush3.bf16.xpose.msra.mxu1 %v1417_v53  ;;  %3438 = vmatprep.mubr.msk.bf16.mxu1 %vm4086_vm0, %v4917_v3 }
 0xbfb   :  { %3442 = vmatprep.subr.bf16.mxu1 %v4917_v3 }
 0xc01   :  { %3439 = vmatmul.mubr.msk.bf16.vlgmr.msra.gmra.mrb[44].mxu1 %vm841_vm1, %v1409_v12 }
 0xc02   :  { %3444 = vmatprep.mubr.msk.bf16.mxu1 %vm4086_vm0, %v4917_v3 }
 0xccc   :  { %v4459_v54 = vpop.f32.mrb[40].mxu1 }
 0xccd   :  { %v3434_v55 = vpop.f32.mrb[41].mxu1 }
 0xcce   :  { %v1404_v56 = vpop.f32.mrb[42].mxu1 }
 0xccf   :  { %v3435_v5 = vpop.f32.mrb[43].mxu1 }
 0xcd0   :  { %v1472_v5 = vld [vmem:[#allocation8 + $0x28] sm:$0xff] }
 0xcd4   :  { %v1453_v59 = vpop.f32.mrb[44].mxu1 }
 0xcd5   :  { %v1459_v61 = vsel %vm4339_vm2, %v1453_v59, -inf  ;;  %v3440_v63 = vpop.f32.mrb[45].mxu1 }
 0xcd6   :  { %v1456_v2 = vpop.f32.mrb[46].mxu1  ;;  %v1460_v4 = vsel %vm889_vm3, %v1459_v61, -inf }
 0xcd7   :  { %1461 = vmax.xlane.f32.xlu1 %v1460_v4  ;;  %v3441_v8 = vpop.f32.mrb[47].mxu1 }
 0xce8   :  { %1476 = vrot.lane.b32.xlu1 %v4428_v10, %s4087_s5 }
 0xcec   :  { %1524 = vrot.lane.b32.xlu1 %v4432_v6, %s4088_s4 }
 0xd64   :  { %v1462_v13 = vpop.xlane.xlu1 %1461 }
 0xd65   :  { %v1463_v7 = vsub.f32 %v1459_v61, %v1462_v13 }
 0xd67   :  { %v1464_v47 = vmul.f32 1.442695, %v1463_v7 }
 0xd68   :  { %v1477_v51 = vpop.permute.xlu1 %1476 }
 0xd69   :  { %3831 = vpow2.f32 %v1464_v47  ;;  %v1482_v52 = vsel %vm907_vm4, %v1477_v51, 0 }
 0xd6a   :  { %3443 = vmatpush3.bf16.msra.mxu1 %v1482_v52 }
 0xd6b   :  { %3448 = vmatprep.subr.bf16.mxu1 %v4917_v3 }
 0xd6c   :  { %v1525_v8 = vpop.permute.xlu1 %1524 }
 0xd73   :  { %v3832_v53 = vpop.eup %3831 }
 0xd74   :  { %v1466_v12 = vsel %vm889_vm3, %v3832_v53, 0.0 }
 0xd75   :  { %1467 = vadd.xlane.f32.xlu0 %v1466_v12 }
 0xd8b   :  { %1526 = vrot.lane.b32.xlu0 %v4418_v9, %s4088_s4 }
 0xe02   :  { %v1468_v55 = vpop.xlane.xlu0 %1467 }
 0xe03   :  { %3833 = vrcp.f32 %v1468_v55 }
 0xe06   :  { %v1527_v63 = vpop.permute.xlu0 %1526 }
 0xe07   :  { %v1532_v4 = vsel %vm841_vm1, %v1527_v63, 0 }
 0xe0d   :  { %v3834_v56 = vpop.eup %3833 }
 0xe0e   :  { %v1470_v59 = vmul.f32 %v3834_v56, %v3832_v53 }
 0xe10   :  { %v1473_v61 = vmul.f32 %v1472_v5, %v1470_v59 }
 0xe12   :  { %v1474_v2 = vpack.c.bf16 %v1473_v61, %v1473_v61 }
 0xe14   :  { %3445 = vmatmul.mubr.msk.bf16.vlgmr.msra.gmra.mrb[48].mxu1 %vm889_vm3, %v1474_v2 }
 0xe15   :  { %3449 = vmatpush3.bf16.xpose.msra.mxu1 %v1532_v4  ;;  %3450 = vmatprep.mubr.msk.bf16.mxu1 %vm4086_vm0, %v4917_v3 }
 0xe16   :  { %3454 = vmatprep.subr.bf16.mxu1 %v4917_v3 }
 0xe1c   :  { %3451 = vmatmul.mubr.msk.bf16.vlgmr.msra.gmra.mrb[52].mxu1 %vm841_vm1, %v1525_v8 }
 0xe1d   :  { %3456 = vmatprep.mubr.msk.bf16.mxu1 %vm4086_vm0, %v4917_v3 }
 0xee7   :  { %v4481_v13 = vpop.f32.mrb[48].mxu1 }
 0xee8   :  { %v3585_v7 = vpack.i.bf16 %v4388_v49, %v4481_v13  ;;  %v3446_v47 = vpop.f32.mrb[49].mxu1  ;;  %v3881_v49 = vld [vmem:[#allocation5 + $0x94] ss:$24 sps:$4 sm:$0xff]   ;;  %v3882_v13 = vld [vmem:[#allocation5 + $0x90] ss:$24 sps:$4 sm:$0xff]  }
 0xee9   :  { %v1521_v51 = vpop.f32.mrb[50].mxu1 }
 0xeea   :  { %v3447_v52 = vpop.f32.mrb[51].mxu1 }
 0xeef   :  { %v1568_v53 = vpop.f32.mrb[52].mxu1 }
 0xef0   :  { %v1574_v12 = vsel %vm4339_vm2, %v1568_v53, -inf  ;;  %v3452_v55 = vpop.f32.mrb[53].mxu1  ;;  %v1587_v53 = vld [vmem:[#allocation8 + $0x30] sm:$0xff] }
 0xef1   :  { %v1571_v56 = vpop.f32.mrb[54].mxu1  ;;  %v1575_v5 = vsel %vm889_vm3, %v1574_v12, -inf }
 0xef2   :  { %1576 = vmax.xlane.f32.xlu1 %v1575_v5  ;;  %v3453_v59 = vpop.f32.mrb[55].mxu1 }
 0xf03   :  { %1590 = vrot.lane.b32.xlu1 %v4428_v10, %s4088_s4 }
 0xf07   :  { %1638 = vrot.lane.b32.xlu1 %v4432_v6, %s4089_s10 }
 0xf7f   :  { %v1577_v61 = vpop.xlane.xlu1 %1576 }
 0xf80   :  { %v1578_v63 = vsub.f32 %v1574_v12, %v1577_v61 }
 0xf82   :  { %v1579_v2 = vmul.f32 1.442695, %v1578_v63 }
 0xf83   :  { %v1591_v4 = vpop.permute.xlu1 %1590 }
 0xf84   :  { %3835 = vpow2.f32 %v1579_v2  ;;  %v1596_v8 = vsel %vm907_vm4, %v1591_v4, 0 }
 0xf85   :  { %3455 = vmatpush3.bf16.msra.mxu1 %v1596_v8 }
 0xf86   :  { %3460 = vmatprep.subr.bf16.mxu1 %v4917_v3 }
 0xf87   :  { %v1639_v61 = vpop.permute.xlu1 %1638 }
 0xf8e   :  { %v3836_v47 = vpop.eup %3835 }
 0xf8f   :  { %v1581_v51 = vsel %vm889_vm3, %v3836_v47, 0.0 }
 0xf90   :  { %1582 = vadd.xlane.f32.xlu0 %v1581_v51 }
 0xfa6   :  { %1640 = vrot.lane.b32.xlu0 %v4418_v9, %s4089_s10 }
0x101d   :  { %v1583_v52 = vpop.xlane.xlu0 %1582 }
0x101e   :  { %3837 = vrcp.f32 %v1583_v52 }
0x1021   :  { %v1641_v56 = vpop.permute.xlu0 %1640 }
0x1022   :  { %v1646_v59 = vsel %vm841_vm1, %v1641_v56, 0 }
0x1028   :  { %v3838_v6 = vpop.eup %3837 }
0x1029   :  { %v1585_v12 = vmul.f32 %v3838_v6, %v3836_v47 }
0x102b   :  { %v1588_v55 = vmul.f32 %v1587_v53, %v1585_v12 }
0x102d   :  { %v1589_v5 = vpack.c.bf16 %v1588_v55, %v1588_v55 }
0x102f   :  { %3457 = vmatmul.mubr.msk.bf16.vlgmr.msra.gmra.mrb[56].mxu1 %vm889_vm3, %v1589_v5 }
0x1030   :  { %3461 = vmatpush3.bf16.xpose.msra.mxu1 %v1646_v59  ;;  %3462 = vmatprep.mubr.msk.bf16.mxu1 %vm4086_vm0, %v4917_v3 }
0x1031   :  { %3466 = vmatprep.subr.bf16.mxu1 %v4917_v3 }
0x1037   :  { %3463 = vmatmul.mubr.msk.bf16.vlgmr.msra.gmra.mrb[60].mxu1 %vm841_vm1, %v1639_v61  ;;  %v3875_v61 = vld [vmem:[#allocation5 + $0x4] ss:$24 sps:$4 sm:$0xff]  }
0x1038   :  { %3468 = vmatprep.mubr.msk.bf16.mxu1 %vm4086_vm0, %v4917_v3  ;;  %v4605_v3 = vld [vmem:[#allocation7 + $0xd0] ss:$8 sps:$4 sm:$0xff]  }
0x1039   :  { %4945 = vst [vmem:[#allocation26_spill] sm:$0xff] %v4605_v3 }
0x1102   :  { %v1632_v9 = vpop.f32.mrb[56].mxu1 }
0x1103   :  { %v3590_v63 = vpack.i.bf16 %v4406_v11, %v1632_v9  ;;  %v3458_v2 = vpop.f32.mrb[57].mxu1 }
0x1104   :  { %v1635_v4 = vpop.f32.mrb[58].mxu1 }
0x1105   :  { %v3459_v8 = vpop.f32.mrb[59].mxu1  ;;  %v1701_v4 = vld [vmem:[#allocation8 + $0x38] sm:$0xff] }
0x110a   :  { %v1682_v47 = vpop.f32.mrb[60].mxu1 }
0x110b   :  { %v1688_v51 = vsel %vm4339_vm2, %v1682_v47, -inf  ;;  %v3464_v52 = vpop.f32.mrb[61].mxu1 }
0x110c   :  { %v1685_v6 = vpop.f32.mrb[62].mxu1  ;;  %v1689_v53 = vsel %vm889_vm3, %v1688_v51, -inf  ;;  %v3876_v52 = vld [vmem:[#allocation5] ss:$24 sps:$4 sm:$0xff]  }
0x110d   :  { %1690 = vmax.xlane.f32.xlu1 %v1689_v53  ;;  %v3465_v12 = vpop.f32.mrb[63].mxu1  ;;  %v3877_v6 = vld [vmem:[#allocation5 + $0x34] ss:$24 sps:$4 sm:$0xff]   ;;  %v3878_v53 = vld [vmem:[#allocation5 + $0x30] ss:$24 sps:$4 sm:$0xff]  }
0x110e   :  { %v3879_v12 = vld [vmem:[#allocation5 + $0x64] ss:$24 sps:$4 sm:$0xff]  }
0x111e   :  { %1704 = vrot.lane.b32.xlu1 %v4428_v10, %s4089_s10 }
0x1122   :  { %3591 = vrot.lane.b32.xlu1 %v3590_v63, %s4088_s4 }
0x119a   :  { %v1691_v55 = vpop.xlane.xlu1 %1690 }
0x119b   :  { %v1692_v11 = vsub.f32 %v1688_v51, %v1691_v55  ;;  %v3880_v55 = vld [vmem:[#allocation5 + $0x60] ss:$24 sps:$4 sm:$0xff]  }
0x119d   :  { %v1693_v56 = vmul.f32 1.442695, %v1692_v11  ;;  %v3884_v11 = vld [vmem:[#allocation5 + $0xc0] ss:$24 sps:$4 sm:$0xff]  }
0x119e   :  { %v1705_v5 = vpop.permute.xlu1 %1704 }
0x119f   :  { %3839 = vpow2.f32 %v1693_v56  ;;  %v1710_v59 = vsel %vm907_vm4, %v1705_v5, 0  ;;  %v3885_v56 = vld [vmem:[#allocation5 + $0xf4] ss:$24 sps:$4 sm:$0xff]   ;;  %v3886_v5 = vld [vmem:[#allocation5 + $0xf0] ss:$24 sps:$4 sm:$0xff]  }
0x11a0   :  { %3467 = vmatpush3.bf16.msra.mxu1 %v1710_v59  ;;  %v3887_v59 = vld [vmem:[#allocation5 + $0x124] ss:$24 sps:$4 sm:$0xff]  }
0x11a1   :  { %2013 = vmatprep.subr.bf16.mxu1 %v3875_v61  ;;  %v3888_v61 = vld [vmem:[#allocation5 + $0x120] ss:$24 sps:$4 sm:$0xff]  }
0x11a9   :  { %v3840_v9 = vpop.eup %3839 }
0x11aa   :  { %v1695_v2 = vsel %vm889_vm3, %v3840_v9, 0.0 }
0x11ab   :  { %1696 = vadd.xlane.f32.xlu0 %v1695_v2  ;;  %v3890_v2 = vld [vmem:[#allocation5 + $0x150] ss:$24 sps:$4 sm:$0xff]  }
0x11c1   :  { %3586 = vrot.lane.b32.xlu0 %v3585_v7, %s4089_s10  ;;  %v3883_v7 = vld [vmem:[#allocation5 + $0xc4] ss:$24 sps:$4 sm:$0xff]  }
0x1238   :  { %v1697_v10 = vpop.xlane.xlu0 %1696 }
0x1239   :  { %3841 = vrcp.f32 %v1697_v10  ;;  %v3891_v10 = vld [vmem:[#allocation5 + $0x184] ss:$24 sps:$4 sm:$0xff]  }
0x1243   :  { %v3842_v63 = vpop.eup %3841 }
0x1244   :  { %v1699_v8 = vmul.f32 %v3842_v63, %v3840_v9  ;;  %v3889_v9 = vld [vmem:[#allocation5 + $0x154] ss:$24 sps:$4 sm:$0xff]   ;;  %v3892_v63 = vld [vmem:[#allocation5 + $0x180] ss:$24 sps:$4 sm:$0xff]  }
0x1246   :  { %v1702_v47 = vmul.f32 %v1701_v4, %v1699_v8  ;;  %v3893_v4 = vld [vmem:[#allocation5 + $0x1b4] ss:$24 sps:$4 sm:$0xff]   ;;  %v3894_v8 = vld [vmem:[#allocation5 + $0x1b0] ss:$24 sps:$4 sm:$0xff]  }
0x1248   :  { %v1703_v51 = vpack.c.bf16 %v1702_v47, %v1702_v47  ;;  %v3895_v47 = vld [vmem:[#allocation5 + $0x1e4] ss:$24 sps:$4 sm:$0xff]  }
0x124a   :  { %3469 = vmatmul.mubr.msk.bf16.vlgmr.msra.gmra.mrb[64].mxu1 %vm889_vm3, %v1703_v51  ;;  %v3896_v51 = vld [vmem:[#allocation5 + $0x1e0] ss:$24 sps:$4 sm:$0xff]  }
0x124b   :  { %2014 = vmatpush1.bf16.msra.mxu1 %v3876_v52  ;;  %v3897_v52 = vld [vmem:[#allocation5 + $0x214] ss:$24 sps:$4 sm:$0xff]  }
0x124c   :  { %2015 = vmatprep.subr.bf16.mxu1 %v3877_v6  ;;  %v3898_v6 = vld [vmem:[#allocation5 + $0x210] ss:$24 sps:$4 sm:$0xff]  }
0x124f   :  { %2016 = vmatpush1.bf16.msra.mxu1 %v3878_v53  ;;  %v3899_v53 = vld [vmem:[#allocation5 + $0x244] ss:$24 sps:$4 sm:$0xff]  }
0x1250   :  { %2017 = vmatprep.subr.bf16.mxu1 %v3879_v12  ;;  %v3900_v12 = vld [vmem:[#allocation5 + $0x240] ss:$24 sps:$4 sm:$0xff]  }
0x1253   :  { %2018 = vmatpush1.bf16.msra.mxu1 %v3880_v55  ;;  %v3901_v55 = vld [vmem:[#allocation5 + $0x274] ss:$24 sps:$4 sm:$0xff]  }
0x1254   :  { %2019 = vmatprep.subr.bf16.mxu1 %v3881_v49  ;;  %v4525_v49 = vld [vmem:[#allocation7] ss:$8 sps:$4 sm:$0xff]  }
0x1257   :  { %2020 = vmatpush1.bf16.msra.mxu1 %v3882_v13  ;;  %v4527_v13 = vld [vmem:[#allocation7 + $0x4] ss:$8 sps:$4 sm:$0xff]  }
0x1258   :  { %2021 = vmatprep.subr.bf16.mxu1 %v3883_v7  ;;  %v4529_v7 = vld [vmem:[#allocation7 + $0x14] ss:$8 sps:$4 sm:$0xff]   ;;  %1957 = vmatprep.subr.bf16.mxu0 %v4527_v13 }
0x1259   :  { %1958 = vmatpush1.bf16.msra.mxu0 %v4525_v49 }
0x125a   :  { %1959 = vmatprep.subr.bf16.mxu0 %v4529_v7 }
0x125b   :  { %2022 = vmatpush1.bf16.msra.mxu1 %v3884_v11  ;;  %v4551_v11 = vld [vmem:[#allocation7 + $0x40] ss:$8 sps:$4 sm:$0xff]  }
0x125c   :  { %2023 = vmatprep.subr.bf16.mxu1 %v3885_v56  ;;  %v4554_v56 = vld [vmem:[#allocation7 + $0x54] ss:$8 sps:$4 sm:$0xff]  }
0x125f   :  { %2024 = vmatpush1.bf16.msra.mxu1 %v3886_v5  ;;  %v4557_v5 = vld [vmem:[#allocation7 + $0x50] ss:$8 sps:$4 sm:$0xff]  }
0x1260   :  { %2025 = vmatprep.subr.bf16.mxu1 %v3887_v59  ;;  %v4560_v59 = vld [vmem:[#allocation7 + $0x64] ss:$8 sps:$4 sm:$0xff]  }
0x1263   :  { %2026 = vmatpush1.bf16.msra.mxu1 %v3888_v61  ;;  %v4563_v61 = vld [vmem:[#allocation7 + $0x60] ss:$8 sps:$4 sm:$0xff]  }
0x1264   :  { %2027 = vmatprep.subr.bf16.mxu1 %v3889_v9  ;;  %v4566_v9 = vld [vmem:[#allocation7 + $0x74] ss:$8 sps:$4 sm:$0xff]  }
0x1267   :  { %2028 = vmatpush1.bf16.msra.mxu1 %v3890_v2  ;;  %v4569_v2 = vld [vmem:[#allocation7 + $0x70] ss:$8 sps:$4 sm:$0xff]  }
0x1268   :  { %2029 = vmatprep.subr.bf16.mxu1 %v3891_v10  ;;  %v4572_v10 = vld [vmem:[#allocation7 + $0x84] ss:$8 sps:$4 sm:$0xff]  }
0x126b   :  { %2030 = vmatpush1.bf16.msra.mxu1 %v3892_v63  ;;  %v4575_v63 = vld [vmem:[#allocation7 + $0x80] ss:$8 sps:$4 sm:$0xff]  }
0x126c   :  { %2031 = vmatprep.subr.bf16.mxu1 %v3893_v4  ;;  %v4578_v4 = vld [vmem:[#allocation7 + $0x94] ss:$8 sps:$4 sm:$0xff]  }
0x126d   :  { %4936 = vst [vmem:[#allocation17_spill] sm:$0xff] %v4578_v4 }
0x126f   :  { %2032 = vmatpush1.bf16.msra.mxu1 %v3894_v8  ;;  %v4581_v8 = vld [vmem:[#allocation7 + $0x90] ss:$8 sps:$4 sm:$0xff]  }
0x1270   :  { %2033 = vmatprep.subr.bf16.mxu1 %v3895_v47  ;;  %4937 = vst [vmem:[#allocation18_spill] sm:$0xff] %v4581_v8  ;;  %v4584_v47 = vld [vmem:[#allocation7 + $0xa4] ss:$8 sps:$4 sm:$0xff]  }
0x1271   :  { %4938 = vst [vmem:[#allocation19_spill] sm:$0xff] %v4584_v47 }
0x1273   :  { %2034 = vmatpush1.bf16.msra.mxu1 %v3896_v51  ;;  %v4587_v51 = vld [vmem:[#allocation7 + $0xa0] ss:$8 sps:$4 sm:$0xff]  }
0x1274   :  { %2035 = vmatprep.subr.bf16.mxu1 %v3897_v52  ;;  %4939 = vst [vmem:[#allocation20_spill] sm:$0xff] %v4587_v51  ;;  %v4590_v52 = vld [vmem:[#allocation7 + $0xb4] ss:$8 sps:$4 sm:$0xff]  }
0x1275   :  { %4940 = vst [vmem:[#allocation21_spill] sm:$0xff] %v4590_v52 }
0x1277   :  { %2036 = vmatpush1.bf16.msra.mxu1 %v3898_v6  ;;  %v4593_v6 = vld [vmem:[#allocation7 + $0xb0] ss:$8 sps:$4 sm:$0xff]  }
0x1278   :  { %2037 = vmatprep.subr.bf16.mxu1 %v3899_v53  ;;  %4941 = vst [vmem:[#allocation22_spill] sm:$0xff] %v4593_v6  ;;  %v4596_v53 = vld [vmem:[#allocation7 + $0xc4] ss:$8 sps:$4 sm:$0xff]  }
0x1279   :  { %4942 = vst [vmem:[#allocation23_spill] sm:$0xff] %v4596_v53 }
0x127b   :  { %2038 = vmatpush1.bf16.msra.mxu1 %v3900_v12  ;;  %v4599_v12 = vld [vmem:[#allocation7 + $0xc0] ss:$8 sps:$4 sm:$0xff]  }
0x127c   :  { %2039 = vmatprep.subr.bf16.mxu1 %v3901_v55  ;;  %4943 = vst [vmem:[#allocation24_spill] sm:$0xff] %v4599_v12  ;;  %v4602_v55 = vld [vmem:[#allocation7 + $0xd4] ss:$8 sps:$4 sm:$0xff]  }
0x127d   :  { %4944 = vst [vmem:[#allocation25_spill] sm:$0xff] %v4602_v55 }
0x127f   :  { %2040 = vmatpush1.bf16.msra.mxu1 %v4198_v58  ;;  %v4533_v58 = vld [vmem:[#allocation7 + $0x10] ss:$8 sps:$4 sm:$0xff]  }
0x1280   :  { %2041 = vmatprep.subr.bf16.mxu1 %v4200_v60  ;;  %v4536_v60 = vld [vmem:[#allocation7 + $0x24] ss:$8 sps:$4 sm:$0xff]   ;;  %1960 = vmatpush1.bf16.msra.mxu0 %v4533_v58 }
0x1281   :  { %1961 = vmatprep.subr.bf16.mxu0 %v4536_v60 }
0x1283   :  { %2042 = vmatpush1.bf16.msra.mxu1 %v4202_v62  ;;  %v4539_v62 = vld [vmem:[#allocation7 + $0x20] ss:$8 sps:$4 sm:$0xff]  }
0x1284   :  { %2043 = vmatprep.subr.bf16.mxu1 %v4204_v0  ;;  %v4542_v0 = vld [vmem:[#allocation7 + $0x34] ss:$8 sps:$4 sm:$0xff]   ;;  %1962 = vmatpush1.bf16.msra.mxu0 %v4539_v62 }
0x1285   :  { %1963 = vmatprep.subr.bf16.mxu0 %v4542_v0 }
0x1287   :  { %2044 = vmatpush1.bf16.msra.mxu1 %v4208_v1  ;;  %v4545_v1 = vld [vmem:[#allocation7 + $0x30] ss:$8 sps:$4 sm:$0xff]  }
0x1288   :  { %2095 = vmatprep.subr.bf16.mxu1 %v4241_v16  ;;  %v4548_v16 = vld [vmem:[#allocation7 + $0x44] ss:$8 sps:$4 sm:$0xff]   ;;  %1964 = vmatpush1.bf16.msra.mxu0 %v4545_v1 }
0x1289   :  { %1965 = vmatprep.subr.bf16.mxu0 %v4548_v16 }
0x128c   :  { %1966 = vmatpush1.bf16.msra.mxu0 %v4551_v11 }
0x128d   :  { %1967 = vmatprep.subr.bf16.mxu0 %v4554_v56 }
0x1290   :  { %1968 = vmatpush1.bf16.msra.mxu0 %v4557_v5 }
0x1291   :  { %1969 = vmatprep.subr.bf16.mxu0 %v4560_v59 }
0x1294   :  { %1970 = vmatpush1.bf16.msra.mxu0 %v4563_v61 }
0x1295   :  { %1971 = vmatprep.subr.bf16.mxu0 %v4566_v9 }
0x1298   :  { %1972 = vmatpush1.bf16.msra.mxu0 %v4569_v2 }
0x1299   :  { %1973 = vmatprep.subr.bf16.mxu0 %v4572_v10 }
0x129c   :  { %1974 = vmatpush1.bf16.msra.mxu0 %v4575_v63 }
0x129d   :  { %1975 = vmatprep.subr.bf16.mxu0 %v4578_v4 }
0x12a0   :  { %1976 = vmatpush1.bf16.msra.mxu0 %v4581_v8  ;;  %v2005_v8 = vld [vmem:[#allocation2 + $0x8] sm:$0xff] }
0x12a1   :  { %1977 = vmatprep.subr.bf16.mxu0 %v4584_v47  ;;  %v4623_v4 = vcombine.low %v2005_v8, %v2005_v8 }
0x12a4   :  { %1978 = vmatpush1.bf16.msra.mxu0 %v4587_v51 }
0x12a5   :  { %1979 = vmatprep.subr.bf16.mxu0 %v4590_v52  ;;  %v4611_v52 = vld [vmem:[#allocation7 + $0xe0] ss:$8 sps:$4 sm:$0xff]  }
0x12a6   :  { %4947 = vst [vmem:[#allocation28_spill] sm:$0xff] %v4611_v52 }
0x12a8   :  { %1980 = vmatpush1.bf16.msra.mxu0 %v4593_v6  ;;  %v4615_v6 = vld [vmem:[#allocation7 + $0xf4] ss:$8 sps:$4 sm:$0xff]  }
0x12a9   :  { %1981 = vmatprep.subr.bf16.mxu0 %v4596_v53  ;;  %v4617_v53 = vld [vmem:[#allocation7 + $0xf0] ss:$8 sps:$4 sm:$0xff]  }
0x12ac   :  { %1982 = vmatpush1.bf16.msra.mxu0 %v4599_v12  ;;  %v3902_v12 = vld [vmem:[#allocation5 + $0xc] ss:$24 sps:$4 sm:$0xff]  }
0x12ad   :  { %1983 = vmatprep.subr.bf16.mxu0 %v4602_v55 }
0x12b0   :  { %1984 = vmatpush1.bf16.msra.mxu0 %v4605_v3 }
0x12b1   :  { %1985 = vmatprep.subr.bf16.mxu0 %v4608_v50 }
0x12b4   :  { %1986 = vmatpush1.bf16.msra.mxu0 %v4611_v52  ;;  %v3295_v52 = vcombine.high %v2005_v8, %v2005_v8  ;;  %v3921_v8 = vld [vmem:[#allocation5 + $0x1b8] ss:$24 sps:$4 sm:$0xff]  }
0x12b5   :  { %1987 = vmatprep.subr.bf16.mxu0 %v4615_v6 }
0x12b6   :  { %2045 = vmatprep.mubr.bf16.mxu1 %v3295_v52 }
0x12b7   :  { %2046 = vmatmul.mubr.bf16.vlgmr.msra.gmra.mrb[68].mxu1 %v4623_v4 }
0x12b8   :  { %1988 = vmatpush1.bf16.msra.mxu0 %v4617_v53  ;;  %2096 = vmatpush1.bf16.msra.mxu1 %v4239_v15 }
0x12b9   :  { %2054 = vmatprep.subr.bf16.mxu0 %v3902_v12  ;;  %2127 = vmatprep.mubr.bf16.mxu1 %v3295_v52  ;;  %v3925_v12 = vld [vmem:[#allocation5 + $0x218] ss:$24 sps:$4 sm:$0xff]  }
0x12ba   :  { %2097 = vmatprep.subr.bf16.mxu1 %v4243_v17 }
0x12bc   :  { %2098 = vmatpush1.bf16.msra.mxu1 %v4247_v18  ;;  %v3592_v18 = vpop.permute.xlu1 %3591 }
0x12bd   :  { %2099 = vmatprep.subr.bf16.mxu1 %v4250_v19 }
0x12c0   :  { %2100 = vmatpush1.bf16.msra.mxu1 %v4253_v20 }
0x12c1   :  { %2101 = vmatprep.subr.bf16.mxu1 %v4256_v21  ;;  %v3594_v21 = vunpack.i.h.bf16 %v3592_v18 }
0x12c4   :  { %2102 = vmatpush1.bf16.msra.mxu1 %v4259_v22  ;;  %v3593_v22 = vunpack.i.l.bf16 %v3592_v18  ;;  %v3930_v18 = vld [vmem:[#allocation5 + $0x2ac] ss:$24 sps:$4 sm:$0xff]  }
0x12c5   :  { %2103 = vmatprep.subr.bf16.mxu1 %v4262_v23 }
0x12c8   :  { %2104 = vmatpush1.bf16.msra.mxu1 %v4265_v24 }
0x12c9   :  { %2105 = vmatprep.subr.bf16.mxu1 %v4268_v25 }
0x12cc   :  { %2106 = vmatpush1.bf16.msra.mxu1 %v4271_v26 }
0x12cd   :  { %2107 = vmatprep.subr.bf16.mxu1 %v4274_v27 }
0x12d0   :  { %2108 = vmatpush1.bf16.msra.mxu1 %v4277_v28 }
0x12d1   :  { %2109 = vmatprep.subr.bf16.mxu1 %v4280_v29 }
0x12d4   :  { %2110 = vmatpush1.bf16.msra.mxu1 %v4283_v30 }
0x12d5   :  { %2111 = vmatprep.subr.bf16.mxu1 %v4286_v31 }
0x12d8   :  { %2112 = vmatpush1.bf16.msra.mxu1 %v4289_v32  ;;  %v4948_v32 = vmov 0.0  }
0x12d9   :  { %2113 = vmatprep.subr.bf16.mxu1 %v4292_v33  ;;  %v3903_v33 = vld [vmem:[#allocation5 + $0x8] ss:$24 sps:$4 sm:$0xff]  }
0x12dc   :  { %2114 = vmatpush1.bf16.msra.mxu1 %v4295_v34  ;;  %v3904_v34 = vld [vmem:[#allocation5 + $0x3c] ss:$24 sps:$4 sm:$0xff]  }
0x12dd   :  { %2115 = vmatprep.subr.bf16.mxu1 %v4298_v35  ;;  %v3905_v35 = vld [vmem:[#allocation5 + $0x38] ss:$24 sps:$4 sm:$0xff]  }
0x12e0   :  { %2116 = vmatpush1.bf16.msra.mxu1 %v4301_v36  ;;  %v3906_v36 = vld [vmem:[#allocation5 + $0x6c] ss:$24 sps:$4 sm:$0xff]  }
0x12e1   :  { %2117 = vmatprep.subr.bf16.mxu1 %v4304_v37  ;;  %v3907_v37 = vld [vmem:[#allocation5 + $0x68] ss:$24 sps:$4 sm:$0xff]  }
0x12e4   :  { %2118 = vmatpush1.bf16.msra.mxu1 %v4307_v38  ;;  %v3908_v38 = vld [vmem:[#allocation5 + $0x9c] ss:$24 sps:$4 sm:$0xff]  }
0x12e5   :  { %2119 = vmatprep.subr.bf16.mxu1 %v4310_v39  ;;  %v3909_v39 = vld [vmem:[#allocation5 + $0x98] ss:$24 sps:$4 sm:$0xff]  }
0x12e8   :  { %2120 = vmatpush1.bf16.msra.mxu1 %v4313_v40  ;;  %v3910_v40 = vld [vmem:[#allocation5 + $0xcc] ss:$24 sps:$4 sm:$0xff]  }
0x12e9   :  { %2121 = vmatprep.subr.bf16.mxu1 %v4316_v41  ;;  %v3911_v41 = vld [vmem:[#allocation5 + $0xc8] ss:$24 sps:$4 sm:$0xff]  }
0x12ec   :  { %2122 = vmatpush1.bf16.msra.mxu1 %v4319_v42  ;;  %v3912_v42 = vld [vmem:[#allocation5 + $0xfc] ss:$24 sps:$4 sm:$0xff]  }
0x12ed   :  { %2123 = vmatprep.subr.bf16.mxu1 %v4322_v43  ;;  %v3913_v43 = vld [vmem:[#allocation5 + $0xf8] ss:$24 sps:$4 sm:$0xff]  }
0x12f0   :  { %2124 = vmatpush1.bf16.msra.mxu1 %v4325_v44  ;;  %v3914_v44 = vld [vmem:[#allocation5 + $0x12c] ss:$24 sps:$4 sm:$0xff]  }
0x12f1   :  { %2125 = vmatprep.subr.bf16.mxu1 %v4328_v45  ;;  %v3915_v45 = vld [vmem:[#allocation5 + $0x128] ss:$24 sps:$4 sm:$0xff]  }
0x12f4   :  { %2126 = vmatpush1.bf16.msra.mxu1 %v4331_v46  ;;  %v3916_v46 = vld [vmem:[#allocation5 + $0x15c] ss:$24 sps:$4 sm:$0xff]  }
0x12f5   :  { %3478 = vmatprep.subr.bf16.mxu1 %v4948_v32 }
0x12f7   :  { %2128 = vmatmul.mubr.bf16.vlgmr.msra.gmra.mrb[72].mxu1 %v4623_v4 }
0x12f8   :  { %3480 = vmatprep.mubr.msk.bf16.mxu1 %vm4086_vm0, %v4948_v32 }
0x131d   :  { %v1746_v55 = vpop.f32.mrb[64].mxu1 }
0x131e   :  { %v3595_v51 = vpack.i.bf16 %v4441_v14, %v1746_v55  ;;  %v3470_v3 = vpop.f32.mrb[65].mxu1  ;;  %v3919_v14 = vld [vmem:[#allocation5 + $0x188] ss:$24 sps:$4 sm:$0xff]   ;;  %v3926_v55 = vld [vmem:[#allocation5 + $0x24c] ss:$24 sps:$4 sm:$0xff]  }
0x131f   :  { %v1749_v47 = vpop.f32.mrb[66].mxu1  ;;  %v3587_v3 = vpop.permute.xlu0 %3586 }
0x1320   :  { %3596 = vrot.lane.b32.xlu1 %v3595_v51, %s4087_s5  ;;  %v3471_v50 = vpop.f32.mrb[67].mxu1  ;;  %v3589_v15 = vunpack.i.h.bf16 %v3587_v3  ;;  %v3588_v17 = vunpack.i.l.bf16 %v3587_v3  ;;  %v3922_v47 = vld [vmem:[#allocation5 + $0x1ec] ss:$24 sps:$4 sm:$0xff]   ;;  %v3923_v51 = vld [vmem:[#allocation5 + $0x1e8] ss:$24 sps:$4 sm:$0xff]  }
0x1321   :  { %v3917_v50 = vld [vmem:[#allocation5 + $0x158] ss:$24 sps:$4 sm:$0xff]   ;;  %v3927_v3 = vld [vmem:[#allocation5 + $0x248] ss:$24 sps:$4 sm:$0xff]  }
0x1322   :  { %v1776_v19 = vsel %vm841_vm1, %v4362_v57, %v3589_v15  ;;  %v1781_v20 = vsel %vm841_vm1, %v4459_v54, %v3588_v17  ;;  %v3918_v57 = vld [vmem:[#allocation5 + $0x18c] ss:$24 sps:$4 sm:$0xff]   ;;  %v3920_v54 = vld [vmem:[#allocation5 + $0x1bc] ss:$24 sps:$4 sm:$0xff]   ;;  %v3929_v17 = vld [vmem:[#allocation5 + $0x278] ss:$24 sps:$4 sm:$0xff]  }
0x1323   :  { %v1778_v26 = vsel %vm1777_vm5, %v1776_v19, %v3594_v21  ;;  %v1782_v27 = vsel %vm1777_vm5, %v1781_v20, %v3593_v22  ;;  %v3928_v15 = vld [vmem:[#allocation5 + $0x27c] ss:$24 sps:$4 sm:$0xff]   ;;  %v3931_v19 = vld [vmem:[#allocation5 + $0x2a8] ss:$24 sps:$4 sm:$0xff]   ;;  %v3933_v21 = vld [vmem:[#allocation5 + $0x2d8] ss:$24 sps:$4 sm:$0xff]  }
0x1324   :  { %v3932_v20 = vld [vmem:[#allocation5 + $0x2dc] ss:$24 sps:$4 sm:$0xff]  }
0x138a   :  { %v2047_v22 = vpop.f32.mrb[68].mxu1 }
0x1392   :  { %v3597_v23 = vpop.permute.xlu1 %3596 }
0x1393   :  { %v3599_v24 = vunpack.i.h.bf16 %v3597_v23  ;;  %v3598_v25 = vunpack.i.l.bf16 %v3597_v23  ;;  %v2049_v23 = vpop.f32.mrb[69].mxu1 }
0x1395   :  { %v1780_v28 = vsel %vm1779_vm6, %v1778_v26, %v3599_v24  ;;  %v1783_v29 = vsel %vm1779_vm6, %v1782_v27, %v3598_v25  ;;  %v2051_v24 = vpop.f32.mrb[70].mxu1  ;;  %v1789_v26 = vsub.s32 0, %v4336_v48  ;;  %v226_v27 = vld [vmem:[%s4913_s3] sm:$0x3]  ;;  %s4090_s3 = smov [#allocation11]  }
0x1396   :  { %v1784_v30 = vpack.c.bf16 %v1780_v28, %v1780_v28  ;;  %v1785_v31 = vpack.c.bf16 %v1783_v29, %v1783_v29  ;;  %v2052_v25 = vpop.f32.mrb[71].mxu1  ;;  %v1793_v28 = vsub.s32 1, %v4336_v48  ;;  %s3134_s13 = sshll.u32 %s4090_s3, 4  ;;  %s3135_s13 = int_to_ptr.vmem [resolvable:$true] %s3134_s13 }
0x1397   :  { %v4678_v29 = vrot.slane %v226_v27, %v1789_v26  ;;  %v4961_v26 = vld [vmem:[#allocation28_spill] sm:$0xff]  ;;  %s4044_s15 = scalar_lea.vmem %s3135_s13, 512  ;;  %p4049_p13 = scmp.lt.s32.totalorder %s3135_s13, %s3135_s13 }
0x1398   :  { %1989 = vmatprep.mubr.bf16.mxu0 %v1785_v31  ;;  %v1998_v31 = vld [vmem:[#allocation10] sm:$0xff]  ;;  %p4045_p12 = scmp.ne.s32.totalorder %s3135_s13, %s4044_s15  ;;  %p4050_p0 = scmp.lt.s32.totalorder %s4044_s15, %s4044_s15 }
0x1399   :  { %1990 = vmatmul.mubr.bf16.vlgmr.msra.gmra.mrb[8].mxu0 %v1784_v30  ;;  %v4680_v30 = vrot.slane %v226_v27, %v1793_v28 }
0x139a   :  { %2055 = vmatpush1.bf16.msra.mxu0 %v3903_v33  ;;  %2086 = vmatprep.mubr.bf16.mxu0 %v3295_v52  ;;  %v3924_v52 = vld [vmem:[#allocation5 + $0x21c] ss:$24 sps:$4 sm:$0xff]   ;;  %p4051_p1 = por %p4050_p0, %p4049_p13 }
0x139b   :  { %2056 = vmatprep.subr.bf16.mxu0 %v3904_v34 }
0x139c   :  { %p4052_p2 = pnand %p4051_p1, %p4045_p12 }
0x139e   :  { %2057 = vmatpush1.bf16.msra.mxu0 %v3905_v35  ;;  %v1999_v35 = vld [vmem:[#allocation10 + $0x8] sm:$0xff] }
0x139f   :  { %2058 = vmatprep.subr.bf16.mxu0 %v3906_v36 }
0x13a2   :  { %2059 = vmatpush1.bf16.msra.mxu0 %v3907_v37 }
0x13a3   :  { %2060 = vmatprep.subr.bf16.mxu0 %v3908_v38 }
0x13a6   :  { %2061 = vmatpush1.bf16.msra.mxu0 %v3909_v39 }
0x13a7   :  { %2062 = vmatprep.subr.bf16.mxu0 %v3910_v40 }
0x13aa   :  { %2063 = vmatpush1.bf16.msra.mxu0 %v3911_v41 }
0x13ab   :  { %2064 = vmatprep.subr.bf16.mxu0 %v3912_v42 }
0x13ae   :  { %2065 = vmatpush1.bf16.msra.mxu0 %v3913_v43 }
0x13af   :  { %2066 = vmatprep.subr.bf16.mxu0 %v3914_v44 }
0x13b2   :  { %2067 = vmatpush1.bf16.msra.mxu0 %v3915_v45  ;;  %v2136_v45 = vpack.c.bf16 %v2047_v22, %v2047_v22 }
0x13b3   :  { %2068 = vmatprep.subr.bf16.mxu0 %v3916_v46 }
0x13b6   :  { %2069 = vmatpush1.bf16.msra.mxu0 %v3917_v50 }
0x13b7   :  { %2070 = vmatprep.subr.bf16.mxu0 %v3918_v57  ;;  %v2592_v57 = vpack.c.bf16 %v2049_v23, %v2049_v23 }
0x13ba   :  { %2071 = vmatpush1.bf16.msra.mxu0 %v3919_v14 }
0x13bb   :  { %2072 = vmatprep.subr.bf16.mxu0 %v3920_v54 }
0x13be   :  { %2073 = vmatpush1.bf16.msra.mxu0 %v3921_v8 }
0x13bf   :  { %2074 = vmatprep.subr.bf16.mxu0 %v3922_v47 }
0x13c2   :  { %2075 = vmatpush1.bf16.msra.mxu0 %v3923_v51 }
0x13c3   :  { %2076 = vmatprep.subr.bf16.mxu0 %v3924_v52 }
0x13c6   :  { %2077 = vmatpush1.bf16.msra.mxu0 %v3925_v12 }
0x13c7   :  { %2078 = vmatprep.subr.bf16.mxu0 %v3926_v55 }
0x13ca   :  { %2079 = vmatpush1.bf16.msra.mxu0 %v3927_v3 }
0x13cb   :  { %2080 = vmatprep.subr.bf16.mxu0 %v3928_v15 }
0x13ce   :  { %2081 = vmatpush1.bf16.msra.mxu0 %v3929_v17 }
0x13cf   :  { %2082 = vmatprep.subr.bf16.mxu0 %v3930_v18 }
0x13d2   :  { %2083 = vmatpush1.bf16.msra.mxu0 %v3931_v19 }
0x13d3   :  { %2084 = vmatprep.subr.bf16.mxu0 %v3932_v20 }
0x13d6   :  { %2085 = vmatpush1.bf16.msra.mxu0 %v3933_v21 }
0x13d7   :  { %3472 = vmatprep.subr.bf16.mxu0 %v4948_v32 }
0x13d9   :  { %2087 = vmatmul.mubr.bf16.vlgmr.msra.gmra.mrb[12].mxu0 %v4623_v4 }
0x13da   :  { %3474 = vmatprep.mubr.msk.bf16.mxu0 %vm4086_vm0, %v4948_v32 }
0x146c   :  { %v1991_v4 = vpop.f32.mrb[8].mxu0 }
0x146d   :  { %v1992_v33 = vadd.f32 %v1991_v4, %v4678_v29  ;;  %v1993_v34 = vpop.f32.mrb[9].mxu0 }
0x146e   :  { %v1994_v36 = vadd.f32 %v1993_v34, %v4680_v30  ;;  %v1995_v37 = vpop.f32.mrb[10].mxu0 }
0x146f   :  { %v2000_v38 = vmul.f32 %v1998_v31, %v1992_v33  ;;  %v1996_v39 = vpop.f32.mrb[11].mxu0 }
0x1470   :  { %v2001_v40 = vmul.f32 %v1999_v35, %v1994_v36 }
0x1471   :  { %2002 = vst [vmem:[#allocation11] sm:$0xff] %v2000_v38 }
0x1472   :  { %2003 = vst [vmem:[#allocation11 + $0x8] sm:$0xff] %v2001_v40 }
0x14ac   :  { %v2088_v41 = vpop.f32.mrb[12].mxu0 }
0x14ad   :  { %v2137_v48 = vpack.c.bf16 %v2088_v41, %v2088_v41  ;;  %v2090_v42 = vpop.f32.mrb[13].mxu0 }
0x14ae   :  { %v2092_v43 = vpop.f32.mrb[14].mxu0  ;;  %v2593_v50 = vpack.c.bf16 %v2090_v42, %v2090_v42 }
0x14af   :  { %2366 = vrot.lane.b32.xlu0 %v2137_v48, %s4088_s4  ;;  %2251 = vrot.lane.b32.xlu1 %v2137_v48, %s4087_s5  ;;  %v2093_v44 = vpop.f32.mrb[15].mxu0  ;;  %v2143_v46 = vsel %vm841_vm1, %v2137_v48, 0 }
0x14b0   :  { %3473 = vmatpush3.bf16.xpose.msra.mxu0 %v2143_v46  ;;  %v2599_v15 = vsel %vm841_vm1, %v2593_v50, 0 }
0x14b1   :  { %3484 = vmatprep.subr.bf16.mxu0 %v4948_v32 }
0x14b3   :  { %2480 = vrot.lane.b32.xlu0 %v2137_v48, %s4089_s10  ;;  %2248 = vrot.lane.b32.xlu1 %v2136_v45, %s4087_s5 }
0x14b7   :  { %2364 = vrot.lane.b32.xlu1 %v2136_v45, %s4088_s4  ;;  %3475 = vmatmul.mubr.msk.bf16.vlgmr.msra.gmra.mrb[16].mxu0 %vm841_vm1, %v2136_v45 }
0x14b8   :  { %2707 = vrot.lane.b32.xlu0 %v2593_v50, %s4087_s5  ;;  %3486 = vmatprep.mubr.msk.bf16.mxu0 %vm4086_vm0, %v4948_v32 }
0x14bb   :  { %2478 = vrot.lane.b32.xlu1 %v2136_v45, %s4089_s10 }
0x14bc   :  { %2822 = vrot.lane.b32.xlu0 %v2593_v50, %s4088_s4 }
0x14bf   :  { %2704 = vrot.lane.b32.xlu1 %v2592_v57, %s4087_s5 }
0x14c0   :  { %2936 = vrot.lane.b32.xlu0 %v2593_v50, %s4089_s10 }
0x14c3   :  { %2820 = vrot.lane.b32.xlu1 %v2592_v57, %s4088_s4 }
0x14c7   :  { %2934 = vrot.lane.b32.xlu1 %v2592_v57, %s4089_s10 }
0x1521   :  { %v2252_v14 = vpop.permute.xlu1 %2251  ;;  %v2367_v8 = vpop.permute.xlu0 %2366 }
0x1522   :  { %v2257_v54 = vsel %vm841_vm1, %v2252_v14, 0  ;;  %v2372_v51 = vsel %vm841_vm1, %v2367_v8, 0 }
0x1523   :  { %3485 = vmatpush3.bf16.xpose.msra.mxu0 %v2257_v54 }
0x1524   :  { %3496 = vmatprep.subr.bf16.mxu0 %v4948_v32 }
0x1525   :  { %v2249_v47 = vpop.permute.xlu1 %2248  ;;  %v2481_v52 = vpop.permute.xlu0 %2480 }
0x1526   :  { %v2486_v55 = vsel %vm841_vm1, %v2481_v52, 0 }
0x1529   :  { %v2365_v12 = vpop.permute.xlu1 %2364 }
0x152a   :  { %3487 = vmatmul.mubr.msk.bf16.vlgmr.msra.gmra.mrb[20].mxu0 %vm841_vm1, %v2249_v47  ;;  %v2708_v17 = vpop.permute.xlu0 %2707 }
0x152b   :  { %3497 = vmatpush3.bf16.xpose.msra.mxu0 %v2372_v51  ;;  %3498 = vmatprep.mubr.msk.bf16.mxu0 %vm4086_vm0, %v4948_v32  ;;  %v2713_v18 = vsel %vm841_vm1, %v2708_v17, 0 }
0x152c   :  { %3508 = vmatprep.subr.bf16.mxu0 %v4948_v32 }
0x152d   :  { %v2479_v3 = vpop.permute.xlu1 %2478 }
0x152e   :  { %v2823_v19 = vpop.permute.xlu0 %2822 }
0x152f   :  { %v2828_v21 = vsel %vm841_vm1, %v2823_v19, 0 }
0x1531   :  { %v2705_v20 = vpop.permute.xlu1 %2704 }
0x1532   :  { %3499 = vmatmul.mubr.msk.bf16.vlgmr.msra.gmra.mrb[24].mxu0 %vm841_vm1, %v2365_v12  ;;  %v2937_v22 = vpop.permute.xlu0 %2936 }
0x1533   :  { %3509 = vmatpush3.bf16.xpose.msra.mxu0 %v2486_v55  ;;  %3510 = vmatprep.mubr.msk.bf16.mxu0 %vm4086_vm0, %v4948_v32  ;;  %v2942_v24 = vsel %vm841_vm1, %v2937_v22, 0 }
0x1534   :  { %3520 = vmatprep.subr.bf16.mxu0 %v4948_v32 }
0x1535   :  { %v2821_v23 = vpop.permute.xlu1 %2820 }
0x1539   :  { %v2935_v25 = vpop.permute.xlu1 %2934 }
0x153a   :  { %3511 = vmatmul.mubr.msk.bf16.vlgmr.msra.gmra.mrb[28].mxu0 %vm841_vm1, %v2479_v3 }
0x153b   :  { %3521 = vmatpush3.bf16.xpose.msra.mxu0 %v2599_v15  ;;  %3522 = vmatprep.mubr.msk.bf16.mxu0 %vm4086_vm0, %v4948_v32 }
0x153c   :  { %3532 = vmatprep.subr.bf16.mxu0 %v4948_v32 }
0x1542   :  { %3523 = vmatmul.mubr.msk.bf16.vlgmr.msra.gmra.mrb[32].mxu0 %vm841_vm1, %v2592_v57 }
0x1543   :  { %3533 = vmatpush3.bf16.xpose.msra.mxu0 %v2713_v18  ;;  %3534 = vmatprep.mubr.msk.bf16.mxu0 %vm4086_vm0, %v4948_v32 }
0x1544   :  { %3544 = vmatprep.subr.bf16.mxu0 %v4948_v32 }
0x154a   :  { %3535 = vmatmul.mubr.msk.bf16.vlgmr.msra.gmra.mrb[36].mxu0 %vm841_vm1, %v2705_v20 }
0x154b   :  { %3545 = vmatpush3.bf16.xpose.msra.mxu0 %v2828_v21  ;;  %3546 = vmatprep.mubr.msk.bf16.mxu0 %vm4086_vm0, %v4948_v32 }
0x154c   :  { %3556 = vmatprep.subr.bf16.mxu0 %v4948_v32 }
0x1552   :  { %3547 = vmatmul.mubr.msk.bf16.vlgmr.msra.gmra.mrb[40].mxu0 %vm841_vm1, %v2821_v23 }
0x1553   :  { %3557 = vmatpush3.bf16.xpose.msra.mxu0 %v2942_v24  ;;  %3558 = vmatprep.mubr.msk.bf16.mxu0 %vm4086_vm0, %v4948_v32 }
0x1554   :  { %3080 = vmatprep.subr.bf16.mxu0 %v4527_v13  ;;  %v4950_v13 = vld [vmem:[#allocation18_spill] sm:$0xff] }
0x155a   :  { %3559 = vmatmul.mubr.msk.bf16.vlgmr.msra.gmra.mrb[44].mxu0 %vm841_vm1, %v2935_v25 }
0x155b   :  { %3081 = vmatpush1.bf16.msra.mxu0 %v4525_v49  ;;  %v4949_v49 = vld [vmem:[#allocation17_spill] sm:$0xff] }
0x155c   :  { %3082 = vmatprep.subr.bf16.mxu0 %v4529_v7  ;;  %v4951_v7 = vld [vmem:[#allocation19_spill] sm:$0xff] }
0x155f   :  { %3083 = vmatpush1.bf16.msra.mxu0 %v4533_v58  ;;  %v4952_v58 = vld [vmem:[#allocation20_spill] sm:$0xff] }
0x1560   :  { %3084 = vmatprep.subr.bf16.mxu0 %v4536_v60  ;;  %v4953_v60 = vld [vmem:[#allocation21_spill] sm:$0xff] }
0x1563   :  { %3085 = vmatpush1.bf16.msra.mxu0 %v4539_v62  ;;  %v4954_v62 = vld [vmem:[#allocation22_spill] sm:$0xff] }
0x1564   :  { %3086 = vmatprep.subr.bf16.mxu0 %v4542_v0  ;;  %v4955_v0 = vld [vmem:[#allocation23_spill] sm:$0xff] }
0x1567   :  { %3087 = vmatpush1.bf16.msra.mxu0 %v4545_v1 }
0x1568   :  { %3088 = vmatprep.subr.bf16.mxu0 %v4548_v16 }
0x156b   :  { %3089 = vmatpush1.bf16.msra.mxu0 %v4551_v11 }
0x156c   :  { %3090 = vmatprep.subr.bf16.mxu0 %v4554_v56 }
0x156f   :  { %3091 = vmatpush1.bf16.msra.mxu0 %v4557_v5  ;;  %v4957_v5 = vld [vmem:[#allocation24_spill] sm:$0xff] }
0x1570   :  { %3092 = vmatprep.subr.bf16.mxu0 %v4560_v59 }
0x1573   :  { %3093 = vmatpush1.bf16.msra.mxu0 %v4563_v61 }
0x1574   :  { %3094 = vmatprep.subr.bf16.mxu0 %v4566_v9  ;;  %v4958_v9 = vld [vmem:[#allocation25_spill] sm:$0xff] }
0x1577   :  { %3095 = vmatpush1.bf16.msra.mxu0 %v4569_v2 }
0x1578   :  { %3096 = vmatprep.subr.bf16.mxu0 %v4572_v10  ;;  %v4959_v10 = vld [vmem:[#allocation26_spill] sm:$0xff] }
0x157b   :  { %3097 = vmatpush1.bf16.msra.mxu0 %v4575_v63  ;;  %v4960_v63 = vld [vmem:[#allocation27_spill] sm:$0xff] }
0x157c   :  { %3098 = vmatprep.subr.bf16.mxu0 %v4949_v49 }
0x157f   :  { %3099 = vmatpush1.bf16.msra.mxu0 %v4950_v13 }
0x1580   :  { %3100 = vmatprep.subr.bf16.mxu0 %v4951_v7 }
0x1583   :  { %3101 = vmatpush1.bf16.msra.mxu0 %v4952_v58 }
0x1584   :  { %3102 = vmatprep.subr.bf16.mxu0 %v4953_v60 }
0x1587   :  { %3103 = vmatpush1.bf16.msra.mxu0 %v4954_v62  ;;  %v2129_v62 = vpop.f32.mrb[72].mxu1 }
0x1588   :  { %3104 = vmatprep.subr.bf16.mxu0 %v4955_v0  ;;  %v4802_v0 = vpop.f32.mrb[73].mxu1 }
0x158a   :  { %v2179_v1 = vpop.f32.mrb[16].mxu0 }
0x158b   :  { %v2185_v11 = vsel %vm4339_vm2, %v2179_v1, -inf  ;;  %v3476_v56 = vpop.f32.mrb[17].mxu0  ;;  %3105 = vmatpush1.bf16.msra.mxu0 %v4957_v5  ;;  %v2138_v1 = vpack.c.bf16 %v2129_v62, %v2129_v62  ;;  %v2427_v62 = vld [vmem:[#allocation8 + $0x50] sm:$0xff] }
0x158c   :  { %v2182_v59 = vpop.f32.mrb[18].mxu0  ;;  %v2186_v61 = vsel %vm889_vm3, %v2185_v11, -inf  ;;  %3106 = vmatprep.subr.bf16.mxu0 %v4958_v9 }
0x158d   :  { %2187 = vmax.xlane.f32.xlu0 %v2186_v61  ;;  %v3477_v2 = vpop.f32.mrb[19].mxu0  ;;  %v2205_v5 = vsel %vm907_vm4, %v2138_v1, 0 }
0x158e   :  { %3479 = vmatpush3.bf16.msra.mxu1 %v2205_v5 }
0x158f   :  { %3107 = vmatpush1.bf16.msra.mxu0 %v4959_v10  ;;  %3490 = vmatprep.subr.bf16.mxu1 %v4948_v32 }
0x1590   :  { %3108 = vmatprep.subr.bf16.mxu0 %v4960_v63 }
0x1593   :  { %3109 = vmatpush1.bf16.msra.mxu0 %v4961_v26 }
0x1594   :  { %3110 = vmatprep.subr.bf16.mxu0 %v4615_v6 }
0x1597   :  { %3111 = vmatpush1.bf16.msra.mxu0 %v4617_v53 }
0x15fd   :  { %v2293_v27 = vpop.f32.mrb[20].mxu0 }
0x15fe   :  { %v4770_v28 = vsel %vm4339_vm2, %v2293_v27, -inf  ;;  %v3488_v4 = vpop.f32.mrb[21].mxu0 }
0x15ff   :  { %v2296_v31 = vpop.f32.mrb[22].mxu0  ;;  %v2300_v33 = vsel %vm889_vm3, %v4770_v28, -inf }
0x1600   :  { %2301 = vmax.xlane.f32.xlu1 %v2300_v33  ;;  %v3489_v34 = vpop.f32.mrb[23].mxu0 }
0x1605   :  { %v2408_v35 = vpop.f32.mrb[24].mxu0 }
0x1606   :  { %v2414_v36 = vsel %vm4339_vm2, %v2408_v35, -inf  ;;  %v3500_v37 = vpop.f32.mrb[25].mxu0 }
0x1607   :  { %v2411_v6 = vpop.f32.mrb[26].mxu0  ;;  %v2415_v53 = vsel %vm889_vm3, %v2414_v36, -inf }
0x1608   :  { %2416 = vmax.xlane.f32.xlu0 %v2415_v53  ;;  %v3501_v38 = vpop.f32.mrb[27].mxu0 }
0x1609   :  { %v2198_v38 = vld [vmem:[#allocation8 + $0x40] sm:$0xff] }
0x160d   :  { %v2522_v39 = vpop.f32.mrb[28].mxu0 }
0x160e   :  { %v2528_v40 = vsel %vm4339_vm2, %v2522_v39, -inf  ;;  %v3512_v41 = vpop.f32.mrb[29].mxu0 }
0x160f   :  { %v2525_v48 = vpop.f32.mrb[30].mxu0  ;;  %v2529_v42 = vsel %vm889_vm3, %v2528_v40, -inf }
0x1610   :  { %2530 = vmax.xlane.f32.xlu0 %v2529_v42  ;;  %v3513_v43 = vpop.f32.mrb[31].mxu0 }
0x1615   :  { %v2635_v44 = vpop.f32.mrb[32].mxu0 }
0x1616   :  { %v4782_v45 = vsel %vm4339_vm2, %v2635_v44, -inf  ;;  %v3524_v46 = vpop.f32.mrb[33].mxu0 }
0x1617   :  { %v2638_v50 = vpop.f32.mrb[34].mxu0  ;;  %v2642_v57 = vsel %vm889_vm3, %v4782_v45, -inf }
0x1618   :  { %2643 = vmax.xlane.f32.xlu1 %v2642_v57  ;;  %v3525_v14 = vpop.f32.mrb[35].mxu0 }
0x161a   :  { %v2188_v54 = vpop.xlane.xlu0 %2187 }
0x161b   :  { %v2189_v8 = vsub.f32 %v2185_v11, %v2188_v54  ;;  %v2133_v11 = vpop.f32.mrb[74].mxu1 }
0x161c   :  { %v2134_v56 = vpop.f32.mrb[75].mxu1 }
0x161d   :  { %v2190_v47 = vmul.f32 1.442695, %v2189_v8  ;;  %v2749_v51 = vpop.f32.mrb[36].mxu0 }
0x161e   :  { %v4788_v52 = vsel %vm4339_vm2, %v2749_v51, -inf  ;;  %v3536_v12 = vpop.f32.mrb[37].mxu0 }
0x161f   :  { %3843 = vpow2.f32 %v2190_v47  ;;  %v2752_v55 = vpop.f32.mrb[38].mxu0  ;;  %v2756_v3 = vsel %vm889_vm3, %v4788_v52, -inf }
0x1620   :  { %2757 = vmax.xlane.f32.xlu0 %v2756_v3  ;;  %v3537_v15 = vpop.f32.mrb[39].mxu0 }
0x1625   :  { %v2864_v17 = vpop.f32.mrb[40].mxu0 }
0x1626   :  { %v4794_v18 = vsel %vm4339_vm2, %v2864_v17, -inf  ;;  %v3548_v19 = vpop.f32.mrb[41].mxu0  ;;  %v2594_v17 = vpack.c.bf16 %v4802_v0, %v4802_v0 }
0x1627   :  { %v2867_v20 = vpop.f32.mrb[42].mxu0  ;;  %v2871_v21 = vsel %vm889_vm3, %v4794_v18, -inf }
0x1628   :  { %2872 = vmax.xlane.f32.xlu1 %v2871_v21  ;;  %v3549_v22 = vpop.f32.mrb[43].mxu0 }
0x1629   :  { %v3844_v23 = vpop.eup %3843 }
0x162a   :  { %v2192_v24 = vsel %vm889_vm3, %v3844_v23, 0.0 }
0x162c   :  { %2193 = vadd.xlane.f32.xlu1 %v2192_v24 }
0x162d   :  { %v2978_v25 = vpop.f32.mrb[44].mxu0 }
0x162e   :  { %v2984_v49 = vsel %vm4339_vm2, %v2978_v25, -inf  ;;  %v3560_v13 = vpop.f32.mrb[45].mxu0 }
0x162f   :  { %v2981_v7 = vpop.f32.mrb[46].mxu0  ;;  %v2985_v58 = vsel %vm889_vm3, %v2984_v49, -inf }
0x1630   :  { %2986 = vmax.xlane.f32.xlu0 %v2985_v58  ;;  %v3561_v60 = vpop.f32.mrb[47].mxu0 }
0x168d   :  { %v2302_v59 = vpop.xlane.xlu1 %2301 }
0x168e   :  { %v2303_v16 = vsub.f32 %v4770_v28, %v2302_v59 }
0x1690   :  { %v2304_v61 = vmul.f32 1.442695, %v2303_v16  ;;  %v2541_v16 = vld [vmem:[#allocation8 + $0x58] sm:$0xff] }
0x1692   :  { %3845 = vpow2.f32 %v2304_v61 }
0x1695   :  { %v2417_v9 = vpop.xlane.xlu0 %2416 }
0x1696   :  { %v2418_v2 = vsub.f32 %v2414_v36, %v2417_v9 }
0x1698   :  { %v2419_v10 = vmul.f32 1.442695, %v2418_v2 }
0x169a   :  { %3847 = vpow2.f32 %v2419_v10  ;;  %v2661_v10 = vsel %vm907_vm4, %v2594_v17, 0 }
0x169c   :  { %v3846_v63 = vpop.eup %3845 }
0x169d   :  { %v2531_v26 = vpop.xlane.xlu0 %2530  ;;  %v2306_v27 = vsel %vm889_vm3, %v3846_v63, 0.0 }
0x169e   :  { %v2532_v4 = vsub.f32 %v2528_v40, %v2531_v26  ;;  %2307 = vadd.xlane.f32.xlu0 %v2306_v27 }
0x16a0   :  { %v2533_v31 = vmul.f32 1.442695, %v2532_v4 }
0x16a2   :  { %3849 = vpow2.f32 %v2533_v31  ;;  %v2654_v31 = vld [vmem:[#allocation8 + $0x60] sm:$0xff] }
0x16a4   :  { %v4808_v33 = vpop.eup %3847 }
0x16a5   :  { %v2421_v34 = vsel %vm889_vm3, %v4808_v33, 0.0  ;;  %v2644_v36 = vpop.xlane.xlu1 %2643 }
0x16a6   :  { %2422 = vadd.xlane.f32.xlu1 %v2421_v34  ;;  %v2645_v41 = vsub.f32 %v4782_v45, %v2644_v36 }
0x16a8   :  { %v2646_v44 = vmul.f32 1.442695, %v2645_v41 }
0x16ac   :  { %v4812_v28 = vpop.eup %3849 }
0x16ad   :  { %v2535_v35 = vsel %vm889_vm3, %v4812_v28, 0.0  ;;  %v2758_v48 = vpop.xlane.xlu0 %2757 }
0x16ae   :  { %2536 = vadd.xlane.f32.xlu0 %v2535_v35  ;;  %v2759_v43 = vsub.f32 %v4788_v52, %v2758_v48 }
0x16b0   :  { %v2760_v57 = vmul.f32 1.442695, %v2759_v43  ;;  %v2883_v43 = vld [vmem:[#allocation8 + $0x70] sm:$0xff] }
0x16b5   :  { %v2873_v37 = vpop.xlane.xlu1 %2872 }
0x16b6   :  { %v2874_v46 = vsub.f32 %v4794_v18, %v2873_v37 }
0x16b7   :  { %2430 = vrot.lane.b32.xlu1 %v2138_v1, %s4088_s4 }
0x16b8   :  { %v2875_v14 = vmul.f32 1.442695, %v2874_v46 }
0x16b9   :  { %v2194_v6 = vpop.xlane.xlu1 %2193 }
0x16ba   :  { %3851 = vrcp.f32 %v2194_v6 }
0x16bb   :  { %2544 = vrot.lane.b32.xlu1 %v2138_v1, %s4089_s10  ;;  %3853 = vpow2.f32 %v2646_v44 }
0x16bc   :  { %3855 = vpow2.f32 %v2760_v57 }
0x16bd   :  { %v2987_v50 = vpop.xlane.xlu0 %2986  ;;  %3857 = vpow2.f32 %v2875_v14 }
0x16be   :  { %v2988_v54 = vsub.f32 %v2984_v49, %v2987_v50 }
0x16c0   :  { %v2989_v45 = vmul.f32 1.442695, %v2988_v54 }
0x16c2   :  { %3859 = vpow2.f32 %v2989_v45  ;;  %v2997_v45 = vld [vmem:[#allocation8 + $0x78] sm:$0xff] }
0x16c4   :  { %2316 = vrot.lane.b32.xlu0 %v2138_v1, %s4087_s5  ;;  %v3852_v53 = vpop.eup %3851 }
0x16c5   :  { %v2196_v39 = vmul.f32 %v3852_v53, %v3844_v23  ;;  %v4825_v8 = vpop.eup %3853  ;;  %v2312_v23 = vld [vmem:[#allocation8 + $0x48] sm:$0xff] }
0x16c6   :  { %v4827_v47 = vpop.eup %3855  ;;  %v2648_v51 = vsel %vm889_vm3, %v4825_v8, 0.0  ;;  %v2768_v53 = vld [vmem:[#allocation8 + $0x68] sm:$0xff] }
0x16c7   :  { %v2199_v40 = vmul.f32 %v2198_v38, %v2196_v39  ;;  %v4831_v52 = vpop.eup %3857  ;;  %v2762_v12 = vsel %vm889_vm3, %v4827_v47, 0.0 }
0x16c8   :  { %v2877_v55 = vsel %vm889_vm3, %v4831_v52, 0.0 }
0x16c9   :  { %v2200_v42 = vpack.c.bf16 %v2199_v40, %v2199_v40 }
0x16cb   :  { %3481 = vmatmul.mubr.msk.bf16.vlgmr.msra.gmra.mrb[76].mxu1 %vm889_vm3, %v2200_v42 }
0x16cc   :  { %3492 = vmatprep.mubr.msk.bf16.mxu1 %vm4086_vm0, %v4948_v32  ;;  %v4837_v3 = vpop.eup %3859 }
0x16cd   :  { %v2991_v15 = vsel %vm889_vm3, %v4837_v3, 0.0 }
0x16df   :  { %2649 = vadd.xlane.f32.xlu1 %v2648_v51 }
0x16e3   :  { %2763 = vadd.xlane.f32.xlu1 %v2762_v12  ;;  %2878 = vadd.xlane.f32.xlu0 %v2877_v55 }
0x16e7   :  { %2992 = vadd.xlane.f32.xlu1 %v2991_v15 }
0x16f8   :  { %2886 = vrot.lane.b32.xlu1 %v2594_v17, %s4088_s4 }
0x16f9   :  { %2772 = vrot.lane.b32.xlu0 %v2594_v17, %s4087_s5 }
0x16fd   :  { %3000 = vrot.lane.b32.xlu0 %v2594_v17, %s4089_s10 }
0x172b   :  { %v2308_v18 = vpop.xlane.xlu0 %2307 }
0x172c   :  { %3861 = vrcp.f32 %v2308_v18 }
0x1733   :  { %v2423_v19 = vpop.xlane.xlu1 %2422 }
0x1734   :  { %3863 = vrcp.f32 %v2423_v19 }
0x1736   :  { %v3862_v20 = vpop.eup %3861 }
0x1737   :  { %v2310_v21 = vmul.f32 %v3862_v20, %v3846_v63  ;;  %v2431_v7 = vpop.permute.xlu1 %2430 }
0x1738   :  { %v2436_v0 = vsel %vm907_vm4, %v2431_v7, 0 }
0x1739   :  { %v2313_v24 = vmul.f32 %v2312_v23, %v2310_v21 }
0x173b   :  { %v2537_v22 = vpop.xlane.xlu0 %2536  ;;  %v2314_v60 = vpack.c.bf16 %v2313_v24, %v2313_v24  ;;  %v2545_v56 = vpop.permute.xlu1 %2544 }
0x173c   :  { %3865 = vrcp.f32 %v2537_v22  ;;  %v2550_v61 = vsel %vm907_vm4, %v2545_v56, 0 }
0x173e   :  { %v3864_v25 = vpop.eup %3863 }
0x173f   :  { %v2317_v49 = vpop.permute.xlu0 %2316  ;;  %v2425_v58 = vmul.f32 %v3864_v25, %v4808_v33 }
0x1740   :  { %v2322_v13 = vsel %vm907_vm4, %v2317_v49, 0 }
0x1741   :  { %3491 = vmatpush3.bf16.msra.mxu1 %v2322_v13  ;;  %v2428_v1 = vmul.f32 %v2427_v62, %v2425_v58 }
0x1742   :  { %3502 = vmatprep.subr.bf16.mxu1 %v4948_v32 }
0x1743   :  { %v2429_v59 = vpack.c.bf16 %v2428_v1, %v2428_v1 }
0x1744   :  { %3493 = vmatmul.mubr.msk.bf16.vlgmr.msra.gmra.mrb[80].mxu1 %vm889_vm3, %v2314_v60 }
0x1745   :  { %3503 = vmatpush3.bf16.msra.mxu1 %v2436_v0  ;;  %3504 = vmatprep.mubr.msk.bf16.mxu1 %vm4086_vm0, %v4948_v32 }
0x1746   :  { %3514 = vmatprep.subr.bf16.mxu1 %v4948_v32  ;;  %v3866_v11 = vpop.eup %3865 }
0x1747   :  { %v2539_v5 = vmul.f32 %v3866_v11, %v4812_v28 }
0x1749   :  { %v2542_v9 = vmul.f32 %v2541_v16, %v2539_v5 }
0x174b   :  { %v2543_v2 = vpack.c.bf16 %v2542_v9, %v2542_v9 }
0x174c   :  { %3505 = vmatmul.mubr.msk.bf16.vlgmr.msra.gmra.mrb[84].mxu1 %vm889_vm3, %v2429_v59 }
0x174d   :  { %3515 = vmatpush3.bf16.msra.mxu1 %v2550_v61  ;;  %3516 = vmatprep.mubr.msk.bf16.mxu1 %vm4086_vm0, %v4948_v32 }
0x174e   :  { %3526 = vmatprep.subr.bf16.mxu1 %v4948_v32 }
0x1754   :  { %3517 = vmatmul.mubr.msk.bf16.vlgmr.msra.gmra.mrb[88].mxu1 %vm889_vm3, %v2543_v2 }
0x1755   :  { %3527 = vmatpush3.bf16.msra.mxu1 %v2661_v10  ;;  %3528 = vmatprep.mubr.msk.bf16.mxu1 %vm4086_vm0, %v4948_v32 }
0x1756   :  { %3538 = vmatprep.subr.bf16.mxu1 %v4948_v32 }
0x176c   :  { %v2650_v63 = vpop.xlane.xlu1 %2649 }
0x176d   :  { %3867 = vrcp.f32 %v2650_v63 }
0x1770   :  { %v2764_v26 = vpop.xlane.xlu1 %2763  ;;  %v2879_v27 = vpop.xlane.xlu0 %2878 }
0x1771   :  { %3869 = vrcp.f32 %v2764_v26 }
0x1772   :  { %3871 = vrcp.f32 %v2879_v27 }
0x1774   :  { %v2773_v35 = vpop.permute.xlu0 %2772  ;;  %v2993_v37 = vpop.xlane.xlu1 %2992 }
0x1775   :  { %v2778_v38 = vsel %vm907_vm4, %v2773_v35, 0  ;;  %3873 = vrcp.f32 %v2993_v37 }
0x1777   :  { %v3868_v4 = vpop.eup %3867 }
0x1778   :  { %v2652_v33 = vmul.f32 %v3868_v4, %v4825_v8  ;;  %v2887_v41 = vpop.permute.xlu1 %2886  ;;  %v3001_v57 = vpop.permute.xlu0 %3000 }
0x1779   :  { %v2892_v44 = vsel %vm907_vm4, %v2887_v41, 0  ;;  %v3006_v8 = vsel %vm907_vm4, %v3001_v57, 0 }
0x177a   :  { %v2655_v34 = vmul.f32 %v2654_v31, %v2652_v33 }
0x177b   :  { %v3870_v28 = vpop.eup %3869 }
0x177c   :  { %v2766_v36 = vmul.f32 %v3870_v28, %v4827_v47  ;;  %v2656_v6 = vpack.c.bf16 %v2655_v34, %v2655_v34  ;;  %v3872_v40 = vpop.eup %3871 }
0x177d   :  { %v2881_v48 = vmul.f32 %v3872_v40, %v4831_v52 }
0x177e   :  { %3529 = vmatmul.mubr.msk.bf16.vlgmr.msra.gmra.mrb[92].mxu1 %vm889_vm3, %v2656_v6  ;;  %v2769_v39 = vmul.f32 %v2768_v53, %v2766_v36 }
0x177f   :  { %3539 = vmatpush3.bf16.msra.mxu1 %v2778_v38  ;;  %3540 = vmatprep.mubr.msk.bf16.mxu1 %vm4086_vm0, %v4948_v32  ;;  %v2884_v46 = vmul.f32 %v2883_v43, %v2881_v48  ;;  %v3874_v50 = vpop.eup %3873 }
0x1780   :  { %3550 = vmatprep.subr.bf16.mxu1 %v4948_v32  ;;  %v2770_v42 = vpack.c.bf16 %v2769_v39, %v2769_v39  ;;  %v2995_v14 = vmul.f32 %v3874_v50, %v4837_v3 }
0x1781   :  { %v2885_v54 = vpack.c.bf16 %v2884_v46, %v2884_v46  ;;  %v3122_v46 = vld [vmem:[#allocation10 + $0x10] sm:$0xff] }
0x1782   :  { %v2998_v47 = vmul.f32 %v2997_v45, %v2995_v14  ;;  %v3123_v14 = vld [vmem:[#allocation10 + $0x18] sm:$0xff] }
0x1784   :  { %v2999_v51 = vpack.c.bf16 %v2998_v47, %v2998_v47 }
0x1786   :  { %3541 = vmatmul.mubr.msk.bf16.vlgmr.msra.gmra.mrb[96].mxu1 %vm889_vm3, %v2770_v42 }
0x1787   :  { %3551 = vmatpush3.bf16.msra.mxu1 %v2892_v44  ;;  %3552 = vmatprep.mubr.msk.bf16.mxu1 %vm4086_vm0, %v4948_v32 }
0x1788   :  { %3562 = vmatprep.subr.bf16.mxu1 %v4948_v32 }
0x178e   :  { %3553 = vmatmul.mubr.msk.bf16.vlgmr.msra.gmra.mrb[100].mxu1 %vm889_vm3, %v2885_v54 }
0x178f   :  { %3563 = vmatpush3.bf16.msra.mxu1 %v3006_v8  ;;  %3564 = vmatprep.mubr.msk.bf16.mxu1 %vm4086_vm0, %v4948_v32 }
0x1796   :  { %3565 = vmatmul.mubr.msk.bf16.vlgmr.msra.gmra.mrb[104].mxu1 %vm889_vm3, %v2999_v51 }
0x179e   :  { %v2241_v52 = vpop.f32.mrb[76].mxu1 }
0x179f   :  { %v3482_v12 = vpop.f32.mrb[77].mxu1 }
0x17a0   :  { %v2244_v55 = vpop.f32.mrb[78].mxu1 }
0x17a1   :  { %v3483_v15 = vpop.f32.mrb[79].mxu1 }
0x1817   :  { %v2358_v17 = vpop.f32.mrb[80].mxu1 }
0x1818   :  { %v3494_v3 = vpop.f32.mrb[81].mxu1 }
0x1819   :  { %v2361_v18 = vpop.f32.mrb[82].mxu1 }
0x181a   :  { %v3495_v19 = vpop.f32.mrb[83].mxu1 }
0x181f   :  { %v2472_v20 = vpop.f32.mrb[84].mxu1 }
0x1820   :  { %v3506_v21 = vpop.f32.mrb[85].mxu1 }
0x1821   :  { %v2475_v22 = vpop.f32.mrb[86].mxu1 }
0x1822   :  { %v3507_v23 = vpop.f32.mrb[87].mxu1 }
0x1827   :  { %v2586_v24 = vpop.f32.mrb[88].mxu1 }
0x1828   :  { %v3518_v25 = vpop.f32.mrb[89].mxu1 }
0x1829   :  { %v2589_v49 = vpop.f32.mrb[90].mxu1 }
0x182a   :  { %v3519_v32 = vpop.f32.mrb[91].mxu1 }
0x1851   :  { %v2697_v13 = vpop.f32.mrb[92].mxu1 }
0x1852   :  { %v3530_v7 = vpop.f32.mrb[93].mxu1 }
0x1853   :  { %v2700_v58 = vpop.f32.mrb[94].mxu1 }
0x1854   :  { %v3531_v60 = vpop.f32.mrb[95].mxu1 }
0x1859   :  { %v2814_v62 = vpop.f32.mrb[96].mxu1 }
0x185a   :  { %v3600_v0 = vpack.i.bf16 %v2358_v17, %v2814_v62  ;;  %v3542_v1 = vpop.f32.mrb[97].mxu1 }
0x185b   :  { %v2817_v11 = vpop.f32.mrb[98].mxu1 }
0x185c   :  { %3601 = vrot.lane.b32.xlu0 %v3600_v0, %s4089_s10  ;;  %v3543_v56 = vpop.f32.mrb[99].mxu1 }
0x1861   :  { %v2928_v5 = vpop.f32.mrb[100].mxu1 }
0x1862   :  { %v3605_v59 = vpack.i.bf16 %v2472_v20, %v2928_v5  ;;  %v3554_v16 = vpop.f32.mrb[101].mxu1 }
0x1863   :  { %v2931_v61 = vpop.f32.mrb[102].mxu1 }
0x1864   :  { %3606 = vrot.lane.b32.xlu1 %v3605_v59, %s4088_s4  ;;  %v3555_v9 = vpop.f32.mrb[103].mxu1 }
0x1869   :  { %v3042_v2 = vpop.f32.mrb[104].mxu1 }
0x186a   :  { %v3610_v10 = vpack.i.bf16 %v2586_v24, %v3042_v2  ;;  %v3566_v63 = vpop.f32.mrb[105].mxu1 }
0x186b   :  { %v3045_v26 = vpop.f32.mrb[106].mxu1 }
0x186c   :  { %3611 = vrot.lane.b32.xlu0 %v3610_v10, %s4087_s5  ;;  %v3567_v27 = vpop.f32.mrb[107].mxu1 }
0x18ce   :  { %v3602_v4 = vpop.permute.xlu0 %3601 }
0x18cf   :  { %v3604_v33 = vunpack.i.h.bf16 %v3602_v4  ;;  %v3603_v34 = vunpack.i.l.bf16 %v3602_v4 }
0x18d1   :  { %v3072_v37 = vsel %vm841_vm1, %v2241_v52, %v3604_v33  ;;  %v3075_v6 = vsel %vm841_vm1, %v2697_v13, %v3603_v34 }
0x18d6   :  { %v3607_v31 = vpop.permute.xlu1 %3606 }
0x18d7   :  { %v3609_v28 = vunpack.i.h.bf16 %v3607_v31  ;;  %v3608_v35 = vunpack.i.l.bf16 %v3607_v31 }
0x18d9   :  { %v3073_v39 = vsel %vm1777_vm5, %v3072_v37, %v3609_v28  ;;  %v3076_v40 = vsel %vm1777_vm5, %v3075_v6, %v3608_v35 }
0x18de   :  { %v3612_v36 = vpop.permute.xlu0 %3611 }
0x18df   :  { %v3614_v53 = vunpack.i.h.bf16 %v3612_v36  ;;  %v3613_v38 = vunpack.i.l.bf16 %v3612_v36 }
0x18e1   :  { %v3074_v41 = vsel %vm1779_vm6, %v3073_v39, %v3614_v53  ;;  %v3077_v48 = vsel %vm1779_vm6, %v3076_v40, %v3613_v38 }
0x18e2   :  { %v3078_v42 = vpack.c.bf16 %v3074_v41, %v3074_v41  ;;  %v3079_v43 = vpack.c.bf16 %v3077_v48, %v3077_v48 }
0x18e4   :  { %3112 = vmatprep.mubr.bf16.mxu0 %v3079_v43 }
0x18e5   :  { %3113 = vmatmul.mubr.bf16.vlgmr.msra.gmra.mrb[48].mxu0 %v3078_v42 }
0x19b8   :  { %v3114_v44 = vpop.f32.mrb[48].mxu0 }
0x19b9   :  { %v3115_v50 = vadd.f32 %v3114_v44, %v4678_v29  ;;  %v3116_v57 = vpop.f32.mrb[49].mxu0 }
0x19ba   :  { %v3117_v54 = vadd.f32 %v3116_v57, %v4680_v30  ;;  %v3118_v45 = vpop.f32.mrb[50].mxu0 }
0x19bb   :  { %v3124_v8 = vmul.f32 %v3122_v46, %v3115_v50  ;;  %v3119_v47 = vpop.f32.mrb[51].mxu0 }
0x19bc   :  { %v3125_v51 = vmul.f32 %v3123_v14, %v3117_v54 }
0x19bd   :  { %3127 = vst [vmem:[#allocation11 + $0x10] sm:$0xff] %v3124_v8 }
0x19be   :  { %3128 = vst [vmem:[#allocation11 + $0x18] sm:$0xff] %v3125_v51 }
0x19bf   :  { %4055 = shalt.err (!%p4052_p2)
}
0x19c0   :  { %s4056_s18 = scalar_lea.hbm %s4916_s6, 512 }
0x19c1   :  { %p4057_p3 = scmp.ne.s32.totalorder %s4916_s6, %s4056_s18  ;;  %p4060_p4 = scmp.lt.u32.totalorder %s4056_s18, %s4916_s6 }
0x19c3   :  { %p4062_p5 = pnand %p4060_p4, %p4057_p3 }
0x19c5   :  { %4065 = shalt.err (!%p4062_p5)
}
0x19c6   :  { %3140 = dma.vmem_to_hbm [thread:$0]  %s3135_s13, 512, %s4916_s6, [#allocation4], %s4083_s2, %s4083_s2, %s4084_s22  }
0x19c7   :  { %4072 = dma.done.wait [#allocation4], 512  }
0x19c8   :  { %4073 = vsyncadd [#allocation4], 4294966784 }
0x19c9   :  { %3144 = vsyncpa [#allocation3], 1 }
0x19ca   :  { %3145 = vsyncpa [#allocation6], 1 }
0x19cb   :  { %3146 = vsyncpa [#allocation9], 1 }
0x19cc   :  { %3147 = vsyncpa [#allocation4], 1 }

</bundles_post_ra>
